<compile_context>
chip_gen: v7x
topology: tpu7x:2x2x1
jax: 0.10.0
libtpu: 0.0.40
codegen_flags: <defaults>
</compile_context>

<pallas_src>
import numpy as np

import jax
import jax.numpy as jnp
from jax import lax
from jax.experimental import pallas as pl
from jax.experimental.pallas import tpu as pltpu


# --------------------------------------------------------------------------- #
# Host-side constant selection matrices (spatial resampling expressed as matmuls)
# --------------------------------------------------------------------------- #
def _embed_matrix(h, w):
    """(h*w, (h+2)*(w+2)): place an HxW image in the interior of a zero-ring buffer."""
    hp, wp = h + 2, w + 2
    m = np.zeros((h * w, hp * wp), np.float32)
    for i in range(h):
        for j in range(w):
            m[i * w + j, (i + 1) * wp + (j + 1)] = 1.0
    return m


def _pool_gather_matrix(h, w):
    """(hp*wp, (h//2+2)*(w//2+2)): pick the 2x2-window anchor (odd,odd) positions of
    the padded fine layout and drop them into the interior of the padded coarse
    layout.  Ring columns are all-zero, re-establishing the zero ring."""
    hp, wp = h + 2, w + 2
    hc, wc = h // 2, w // 2
    hcp, wcp = hc + 2, wc + 2
    m = np.zeros((hp * wp, hcp * wcp), np.float32)
    for i in range(hc):
        for j in range(wc):
            m[(2 * i + 1) * wp + (2 * j + 1), (i + 1) * wcp + (j + 1)] = 1.0
    return m


def _upsample_matrix(h, w):
    """(hp*wp, (2h+2)*(2w+2)): nearest-neighbour 2x upsample, padded coarse layout ->
    padded fine layout (zero ring preserved)."""
    hp, wp = h + 2, w + 2
    hf, wf = 2 * h, 2 * w
    hfp, wfp = hf + 2, wf + 2
    m = np.zeros((hp * wp, hfp * wfp), np.float32)
    for i in range(hf):
        for j in range(wf):
            m[(i // 2 + 1) * wp + (j // 2 + 1), (i + 1) * wfp + (j + 1)] = 1.0
    return m


def build_tables():
    return {
        "embed": jnp.asarray(_embed_matrix(16, 16)),        # (256, 324)
        "pool1": jnp.asarray(_pool_gather_matrix(16, 16)),  # (324, 100)
        "pool2": jnp.asarray(_pool_gather_matrix(8, 8)),    # (100, 36)
        "up1":   jnp.asarray(_upsample_matrix(4, 4)),       # (36, 100)
        "up2":   jnp.asarray(_upsample_matrix(8, 8)),       # (100, 324)
    }


# --------------------------------------------------------------------------- #
# In-kernel helpers
# --------------------------------------------------------------------------- #
def _shift_lanes_zero(x, s):
    """y[:, i] = x[:, i + s] for 0 <= i + s < N, else 0.  `s` is a static int."""
    if s == 0:
        return x
    c, n = x.shape
    fill = jnp.zeros((c, abs(s)), x.dtype)
    if s > 0:
        return jnp.concatenate([x[:, s:], fill], axis=1)
    return jnp.concatenate([fill, x[:, : n + s]], axis=1)


def _conv3x3(x, w_ref, b_ref, *, wp, activation):
    """3x3 conv, stride 1, pad 1, on a zero-ring padded flattened feature map.

    x      : (Cin, Hp*Wp) activation whose first/last buffer columns are zero.
    w_ref  : (9, Cout, Cin) per-tap weight matrices, tap index = ky*3 + kx.
    b_ref  : (Cout, 1) bias.
    Returns (Cout, Hp*Wp); every buffer position holds the correct conv value.
    """
    cout = b_ref.shape[0]
    hwp = x.shape[1]
    acc = jnp.broadcast_to(b_ref[...], (cout, hwp))          # bias-initialised acc
    tap = 0
    for dy in (-1, 0, 1):                                     # fully unrolled 3x3 taps
        for dx in (-1, 0, 1):
            shifted = _shift_lanes_zero(x, dy * wp + dx)      # (Cin, Hp*Wp), lane-dense
            acc = acc + jnp.dot(w_ref[tap], shifted,
                                preferred_element_type=jnp.float32)
            tap += 1
    if activation == "relu":
        acc = jnp.maximum(acc, 0.0)
    elif activation == "sigmoid":
        acc = 0.5 * jnp.tanh(0.5 * acc) + 0.5                 # sigmoid on the EUP slot
    return acc


def _maxpool2x2(x, wp, sel_ref):
    """2x2 / stride-2 max pool.  Window max is formed at each anchor via two lane
    shifts; the constant 0/1 matrix gathers anchors into the next padded layout."""
    m = jnp.maximum(x, _shift_lanes_zero(x, 1))
    m = jnp.maximum(m, _shift_lanes_zero(m, wp))
    return jnp.dot(m, sel_ref[...], preferred_element_type=jnp.float32)


# --------------------------------------------------------------------------- #
# Fused forward kernel (one image per grid step)
# --------------------------------------------------------------------------- #
def _autoencoder_kernel(x_ref, w1_ref, b1_ref, w2_ref, b2_ref, w3_ref, b3_ref,
                        w4_ref, b4_ref, emb_ref, pool1_ref, pool2_ref,
                        up1_ref, up2_ref, out_ref):
    x = x_ref[0]                                                        # (3, 256)
    # in-kernel zero-padding: embed 16x16 into the 18x18 zero-ring layout
    h = jnp.dot(x, emb_ref[...], preferred_element_type=jnp.float32)    # (3, 324)
    # ---- encoder ----
    h = _conv3x3(h, w1_ref, b1_ref, wp=18, activation="relu")           # (16, 324)
    h = _maxpool2x2(h, 18, pool1_ref)                                   # (16, 100)
    h = _conv3x3(h, w2_ref, b2_ref, wp=10, activation="relu")           # (32, 100)
    h = _maxpool2x2(h, 10, pool2_ref)                                   # (32, 36)
    # ---- decoder ----
    h = jnp.dot(h, up1_ref[...], preferred_element_type=jnp.float32)    # (32, 100)
    h = _conv3x3(h, w3_ref, b3_ref, wp=10, activation="relu")           # (16, 100)
    h = jnp.dot(h, up2_ref[...], preferred_element_type=jnp.float32)    # (16, 324)
    h = _conv3x3(h, w4_ref, b4_ref, wp=18, activation="sigmoid")        # (3, 324)
    out_ref[0] = h.astype(out_ref.dtype)


def autoencoder_forward(x_nchw, kparams, tables):
    B, C, H, W = x_nchw.shape
    assert (C, H, W) == (3, 16, 16), (C, H, W)
    x_flat = x_nchw.reshape(B, 3, H * W)          # NCHW -> (B, C, H*W), metadata-only

    args = (x_flat,
            kparams["w1"], kparams["b1"], kparams["w2"], kparams["b2"],
            kparams["w3"], kparams["b3"], kparams["w4"], kparams["b4"],
            tables["embed"], tables["pool1"], tables["pool2"],
            tables["up1"], tables["up2"])

    def _full_spec(a):
        zeros = (0,) * a.ndim
        return pl.BlockSpec(a.shape, lambda i: zeros)

    in_specs = [pl.BlockSpec((1, 3, H * W), lambda i: (i, 0, 0))]
    in_specs += [_full_spec(a) for a in args[1:]]

    conv_flops = 2 * 9 * (3 * 16 * 324 + 16 * 32 * 100 + 32 * 16 * 100 + 16 * 3 * 324)
    resample_flops = 2 * (3 * 256 * 324 + 16 * 324 * 100 + 32 * 100 * 36
                          + 32 * 36 * 100 + 16 * 100 * 324)
    table_bytes = 4 * (256 * 324 + 324 * 100 + 100 * 36 + 36 * 100 + 100 * 324)
    weight_bytes = 4 * (9 * (16 * 3 + 32 * 16 + 16 * 32 + 3 * 16) + 16 + 32 + 16 + 3)
    io_bytes = 4 * B * (3 * 256 + 3 * 324)

    out = pl.pallas_call(
        _autoencoder_kernel,
        out_shape=jax.ShapeDtypeStruct((B, 3, 18 * 18), jnp.float32),
        grid=(B,),
        in_specs=in_specs,
        out_specs=pl.BlockSpec((1, 3, 18 * 18), lambda i: (i, 0, 0)),
        compiler_params=pltpu.CompilerParams(
            dimension_semantics=("parallel",),
            vmem_limit_bytes=32 * 1024 * 1024),
        cost_estimate=pl.CostEstimate(
            flops=B * (conv_flops + resample_flops),
            transcendentals=B * 3 * 324,
            bytes_accessed=io_bytes + table_bytes + weight_bytes),
    )(*args)
    return out.reshape(B, 3, 18, 18)              # (B, C, H, W), PyTorch layout


# --------------------------------------------------------------------------- #
# Parameters (deterministic synthetic init; same shapes as the nn.Module)
# --------------------------------------------------------------------------- #
def init_params(key):
    shapes = {
        "w1": (3, 3, 3, 16), "b1": (16,),
        "w2": (3, 3, 16, 32), "b2": (32,),
        "w3": (3, 3, 32, 16), "b3": (16,),
        "w4": (3, 3, 16, 3), "b4": (3,),
    }
    params = {}
    for name in sorted(shapes):
        key, sub = jax.random.split(key)
        scale = 0.1 if name.startswith("w") else 0.01
        params[name] = scale * jax.random.normal(sub, shapes[name], jnp.float32)
    return params


def pack_params(params):
    """HWIO weights -> per-tap (9, Cout, Cin) matrices; biases -> (Cout, 1) columns."""
    def taps(w):
        kh, kw, cin, cout = w.shape
        return jnp.transpose(w, (0, 1, 3, 2)).reshape(kh * kw, cout, cin)
    return {
        "w1": taps(params["w1"]), "b1": params["b1"].reshape(-1, 1),
        "w2": taps(params["w2"]), "b2": params["b2"].reshape(-1, 1),
        "w3": taps(params["w3"]), "b3": params["b3"].reshape(-1, 1),
        "w4": taps(params["w4"]), "b4": params["b4"].reshape(-1, 1),
    }


# Pure-JAX reference to validate the Pallas implementation.
def reference_forward(x_nchw, params):
    x = jnp.transpose(x_nchw, (0, 2, 3, 1))

    def conv(x, w, b, pad):
        y = lax.conv_general_dilated(
            x, w, window_strides=(1, 1), padding=[(pad, pad), (pad, pad)],
            dimension_numbers=("NHWC", "HWIO", "NHWC"))
        return y + b

    def pool(x):
        return lax.reduce_window(x, -jnp.inf, lax.max,
                                 (1, 2, 2, 1), (1, 2, 2, 1), "VALID")

    x = jax.nn.relu(conv(x, params["w1"], params["b1"], 1)); x = pool(x)
    x = jax.nn.relu(conv(x, params["w2"], params["b2"], 1)); x = pool(x)
    x = jnp.repeat(jnp.repeat(x, 2, 1), 2, 2)
    x = jax.nn.relu(conv(x, params["w3"], params["b3"], 1))
    x = jnp.repeat(jnp.repeat(x, 2, 1), 2, 2)
    x = jax.nn.sigmoid(conv(x, params["w4"], params["b4"], 2))
    return jnp.transpose(x, (0, 3, 1, 2))


if __name__ == "__main__":
    key = jax.random.PRNGKey(0)
    pkey, xkey = jax.random.split(key)
    params = init_params(pkey)
    x = jax.random.uniform(xkey, (2, 3, 16, 16), jnp.float32)   # NCHW, like PyTorch

    kparams = pack_params(params)
    tables = build_tables()

    fwd = jax.jit(autoencoder_forward)
    out = jax.block_until_ready(fwd(x, kparams, tables))
    # last conv has padding=2 with a 3x3 kernel -> spatial grows 16 -> 18
    assert out.shape == (2, 3, 18, 18), out.shape

    ref = reference_forward(x, params)
    err = float(jnp.max(jnp.abs(out - ref)))
    assert err < 2e-4, f"max abs error vs reference: {err}"

    print("KERNEL_OK")
</pallas_src>

<mosaic_0001>
module attributes {stable_mosaic.version = 11 : i64} {
  func.func @_autoencoder_kernel(%arg0: i32, %arg1: memref<1x3x256xf32, #tpu.memory_space<vmem>>, %arg2: memref<9x16x3xf32, #tpu.memory_space<vmem>>, %arg3: memref<16x1xf32, #tpu.memory_space<vmem>>, %arg4: memref<9x32x16xf32, #tpu.memory_space<vmem>>, %arg5: memref<32x1xf32, #tpu.memory_space<vmem>>, %arg6: memref<9x16x32xf32, #tpu.memory_space<vmem>>, %arg7: memref<16x1xf32, #tpu.memory_space<vmem>>, %arg8: memref<9x3x16xf32, #tpu.memory_space<vmem>>, %arg9: memref<3x1xf32, #tpu.memory_space<vmem>>, %arg10: memref<256x324xf32, #tpu.memory_space<vmem>>, %arg11: memref<324x100xf32, #tpu.memory_space<vmem>>, %arg12: memref<100x36xf32, #tpu.memory_space<vmem>>, %arg13: memref<36x100xf32, #tpu.memory_space<vmem>>, %arg14: memref<100x324xf32, #tpu.memory_space<vmem>>, %arg15: memref<1x3x324xf32, #tpu.memory_space<vmem>>) attributes {dimension_semantics = [#tpu.dimension_semantics<parallel>], iteration_bounds = array<i64: 2>, scalar_prefetch = 0 : i64, scratch_operands = 0 : i64, tpu.core_type = #tpu.core_type<tc>, window_params = [{transform_indices = @transform_0, window_bounds = array<i64: 1, 3, 256>}, {pipeline_mode = #tpu.pipeline_mode<synchronous>, transform_indices = @transform_1, window_bounds = array<i64: 9, 16, 3>}, {pipeline_mode = #tpu.pipeline_mode<synchronous>, transform_indices = @transform_2, window_bounds = array<i64: 16, 1>}, {pipeline_mode = #tpu.pipeline_mode<synchronous>, transform_indices = @transform_3, window_bounds = array<i64: 9, 32, 16>}, {pipeline_mode = #tpu.pipeline_mode<synchronous>, transform_indices = @transform_4, window_bounds = array<i64: 32, 1>}, {pipeline_mode = #tpu.pipeline_mode<synchronous>, transform_indices = @transform_5, window_bounds = array<i64: 9, 16, 32>}, {pipeline_mode = #tpu.pipeline_mode<synchronous>, transform_indices = @transform_6, window_bounds = array<i64: 16, 1>}, {pipeline_mode = #tpu.pipeline_mode<synchronous>, transform_indices = @transform_7, window_bounds = array<i64: 9, 3, 16>}, {pipeline_mode = #tpu.pipeline_mode<synchronous>, transform_indices = @transform_8, window_bounds = array<i64: 3, 1>}, {pipeline_mode = #tpu.pipeline_mode<synchronous>, transform_indices = @transform_9, window_bounds = array<i64: 256, 324>}, {pipeline_mode = #tpu.pipeline_mode<synchronous>, transform_indices = @transform_10, window_bounds = array<i64: 324, 100>}, {pipeline_mode = #tpu.pipeline_mode<synchronous>, transform_indices = @transform_11, window_bounds = array<i64: 100, 36>}, {pipeline_mode = #tpu.pipeline_mode<synchronous>, transform_indices = @transform_12, window_bounds = array<i64: 36, 100>}, {pipeline_mode = #tpu.pipeline_mode<synchronous>, transform_indices = @transform_13, window_bounds = array<i64: 100, 324>}, {transform_indices = @transform_14, window_bounds = array<i64: 1, 3, 324>}]} {
    %c0 = arith.constant 0 : index
    %c0_0 = arith.constant 0 : index
    %c0_1 = arith.constant 0 : index
    %0 = vector.load %arg1[%c0, %c0_0, %c0_1] : memref<1x3x256xf32, #tpu.memory_space<vmem>>, vector<1x3x256xf32>
    %1 = vector.shape_cast %0 : vector<1x3x256xf32> to vector<3x256xf32>
    %c0_2 = arith.constant 0 : index
    %c0_3 = arith.constant 0 : index
    %2 = vector.load %arg10[%c0_2, %c0_3] : memref<256x324xf32, #tpu.memory_space<vmem>>, vector<256x324xf32>
    %cst = arith.constant dense<0.000000e+00> : vector<3x324xf32>
    %3 = tpu.matmul %1, %2, %cst {dimension_numbers = #tpu.dot_dimension_numbers<[1], [0], [0], [1], [0, 0, 1, 1], [], []>} : vector<3x256xf32>, vector<256x324xf32>, vector<3x324xf32> -> vector<3x324xf32>
    %c0_4 = arith.constant 0 : index
    %c0_5 = arith.constant 0 : index
    %4 = vector.load %arg3[%c0_4, %c0_5] : memref<16x1xf32, #tpu.memory_space<vmem>>, vector<16x1xf32>
    %5 = vector.shape_cast %4 : vector<16x1xf32> to vector<16x1xf32>
    %6 = vector.broadcast %5 : vector<16x1xf32> to vector<16x324xf32>
    %cst_6 = arith.constant 0.000000e+00 : f32
    %7 = vector.broadcast %cst_6 : f32 to vector<3x19xf32>
    %8 = vector.extract_strided_slice %3 {offsets = [0, 0], sizes = [3, 305], strides = [1, 1]} : vector<3x324xf32> to vector<3x305xf32>
    %9 = tpu.concatenate %7, %8 in 1 : vector<3x19xf32>, vector<3x305xf32> -> vector<3x324xf32>
    %c0_7 = arith.constant 0 : index
    %c0_8 = arith.constant 0 : index
    %c0_9 = arith.constant 0 : index
    %10 = vector.load %arg2[%c0_7, %c0_8, %c0_9] : memref<9x16x3xf32, #tpu.memory_space<vmem>>, vector<1x16x3xf32>
    %11 = vector.shape_cast %10 : vector<1x16x3xf32> to vector<16x3xf32>
    %cst_10 = arith.constant dense<0.000000e+00> : vector<16x324xf32>
    %12 = tpu.matmul %11, %9, %cst_10 {dimension_numbers = #tpu.dot_dimension_numbers<[1], [0], [0], [1], [0, 0, 1, 1], [], []>} : vector<16x3xf32>, vector<3x324xf32>, vector<16x324xf32> -> vector<16x324xf32>
    %13 = arith.addf %6, %12 : vector<16x324xf32>
    %cst_11 = arith.constant 0.000000e+00 : f32
    %14 = vector.broadcast %cst_11 : f32 to vector<3x18xf32>
    %15 = vector.extract_strided_slice %3 {offsets = [0, 0], sizes = [3, 306], strides = [1, 1]} : vector<3x324xf32> to vector<3x306xf32>
    %16 = tpu.concatenate %14, %15 in 1 : vector<3x18xf32>, vector<3x306xf32> -> vector<3x324xf32>
    %c1 = arith.constant 1 : index
    %c0_12 = arith.constant 0 : index
    %c0_13 = arith.constant 0 : index
    %17 = vector.load %arg2[%c1, %c0_12, %c0_13] : memref<9x16x3xf32, #tpu.memory_space<vmem>>, vector<1x16x3xf32>
    %18 = vector.shape_cast %17 : vector<1x16x3xf32> to vector<16x3xf32>
    %cst_14 = arith.constant dense<0.000000e+00> : vector<16x324xf32>
    %19 = tpu.matmul %18, %16, %cst_14 {dimension_numbers = #tpu.dot_dimension_numbers<[1], [0], [0], [1], [0, 0, 1, 1], [], []>} : vector<16x3xf32>, vector<3x324xf32>, vector<16x324xf32> -> vector<16x324xf32>
    %20 = arith.addf %13, %19 : vector<16x324xf32>
    %cst_15 = arith.constant 0.000000e+00 : f32
    %21 = vector.broadcast %cst_15 : f32 to vector<3x17xf32>
    %22 = vector.extract_strided_slice %3 {offsets = [0, 0], sizes = [3, 307], strides = [1, 1]} : vector<3x324xf32> to vector<3x307xf32>
    %23 = tpu.concatenate %21, %22 in 1 : vector<3x17xf32>, vector<3x307xf32> -> vector<3x324xf32>
    %c2 = arith.constant 2 : index
    %c0_16 = arith.constant 0 : index
    %c0_17 = arith.constant 0 : index
    %24 = vector.load %arg2[%c2, %c0_16, %c0_17] : memref<9x16x3xf32, #tpu.memory_space<vmem>>, vector<1x16x3xf32>
    %25 = vector.shape_cast %24 : vector<1x16x3xf32> to vector<16x3xf32>
    %cst_18 = arith.constant dense<0.000000e+00> : vector<16x324xf32>
    %26 = tpu.matmul %25, %23, %cst_18 {dimension_numbers = #tpu.dot_dimension_numbers<[1], [0], [0], [1], [0, 0, 1, 1], [], []>} : vector<16x3xf32>, vector<3x324xf32>, vector<16x324xf32> -> vector<16x324xf32>
    %27 = arith.addf %20, %26 : vector<16x324xf32>
    %cst_19 = arith.constant 0.000000e+00 : f32
    %28 = vector.broadcast %cst_19 : f32 to vector<3x1xf32>
    %29 = vector.extract_strided_slice %3 {offsets = [0, 0], sizes = [3, 323], strides = [1, 1]} : vector<3x324xf32> to vector<3x323xf32>
    %30 = tpu.concatenate %28, %29 in 1 : vector<3x1xf32>, vector<3x323xf32> -> vector<3x324xf32>
    %c3 = arith.constant 3 : index
    %c0_20 = arith.constant 0 : index
    %c0_21 = arith.constant 0 : index
    %31 = vector.load %arg2[%c3, %c0_20, %c0_21] : memref<9x16x3xf32, #tpu.memory_space<vmem>>, vector<1x16x3xf32>
    %32 = vector.shape_cast %31 : vector<1x16x3xf32> to vector<16x3xf32>
    %cst_22 = arith.constant dense<0.000000e+00> : vector<16x324xf32>
    %33 = tpu.matmul %32, %30, %cst_22 {dimension_numbers = #tpu.dot_dimension_numbers<[1], [0], [0], [1], [0, 0, 1, 1], [], []>} : vector<16x3xf32>, vector<3x324xf32>, vector<16x324xf32> -> vector<16x324xf32>
    %34 = arith.addf %27, %33 : vector<16x324xf32>
    %c4 = arith.constant 4 : index
    %c0_23 = arith.constant 0 : index
    %c0_24 = arith.constant 0 : index
    %35 = vector.load %arg2[%c4, %c0_23, %c0_24] : memref<9x16x3xf32, #tpu.memory_space<vmem>>, vector<1x16x3xf32>
    %36 = vector.shape_cast %35 : vector<1x16x3xf32> to vector<16x3xf32>
    %cst_25 = arith.constant dense<0.000000e+00> : vector<16x324xf32>
    %37 = tpu.matmul %36, %3, %cst_25 {dimension_numbers = #tpu.dot_dimension_numbers<[1], [0], [0], [1], [0, 0, 1, 1], [], []>} : vector<16x3xf32>, vector<3x324xf32>, vector<16x324xf32> -> vector<16x324xf32>
    %38 = arith.addf %34, %37 : vector<16x324xf32>
    %cst_26 = arith.constant 0.000000e+00 : f32
    %39 = vector.broadcast %cst_26 : f32 to vector<3x1xf32>
    %40 = vector.extract_strided_slice %3 {offsets = [0, 1], sizes = [3, 323], strides = [1, 1]} : vector<3x324xf32> to vector<3x323xf32>
    %41 = tpu.concatenate %40, %39 in 1 : vector<3x323xf32>, vector<3x1xf32> -> vector<3x324xf32>
    %c5 = arith.constant 5 : index
    %c0_27 = arith.constant 0 : index
    %c0_28 = arith.constant 0 : index
    %42 = vector.load %arg2[%c5, %c0_27, %c0_28] : memref<9x16x3xf32, #tpu.memory_space<vmem>>, vector<1x16x3xf32>
    %43 = vector.shape_cast %42 : vector<1x16x3xf32> to vector<16x3xf32>
    %cst_29 = arith.constant dense<0.000000e+00> : vector<16x324xf32>
    %44 = tpu.matmul %43, %41, %cst_29 {dimension_numbers = #tpu.dot_dimension_numbers<[1], [0], [0], [1], [0, 0, 1, 1], [], []>} : vector<16x3xf32>, vector<3x324xf32>, vector<16x324xf32> -> vector<16x324xf32>
    %45 = arith.addf %38, %44 : vector<16x324xf32>
    %cst_30 = arith.constant 0.000000e+00 : f32
    %46 = vector.broadcast %cst_30 : f32 to vector<3x17xf32>
    %47 = vector.extract_strided_slice %3 {offsets = [0, 17], sizes = [3, 307], strides = [1, 1]} : vector<3x324xf32> to vector<3x307xf32>
    %48 = tpu.concatenate %47, %46 in 1 : vector<3x307xf32>, vector<3x17xf32> -> vector<3x324xf32>
    %c6 = arith.constant 6 : index
    %c0_31 = arith.constant 0 : index
    %c0_32 = arith.constant 0 : index
    %49 = vector.load %arg2[%c6, %c0_31, %c0_32] : memref<9x16x3xf32, #tpu.memory_space<vmem>>, vector<1x16x3xf32>
    %50 = vector.shape_cast %49 : vector<1x16x3xf32> to vector<16x3xf32>
    %cst_33 = arith.constant dense<0.000000e+00> : vector<16x324xf32>
    %51 = tpu.matmul %50, %48, %cst_33 {dimension_numbers = #tpu.dot_dimension_numbers<[1], [0], [0], [1], [0, 0, 1, 1], [], []>} : vector<16x3xf32>, vector<3x324xf32>, vector<16x324xf32> -> vector<16x324xf32>
    %52 = arith.addf %45, %51 : vector<16x324xf32>
    %cst_34 = arith.constant 0.000000e+00 : f32
    %53 = vector.broadcast %cst_34 : f32 to vector<3x18xf32>
    %54 = vector.extract_strided_slice %3 {offsets = [0, 18], sizes = [3, 306], strides = [1, 1]} : vector<3x324xf32> to vector<3x306xf32>
    %55 = tpu.concatenate %54, %53 in 1 : vector<3x306xf32>, vector<3x18xf32> -> vector<3x324xf32>
    %c7 = arith.constant 7 : index
    %c0_35 = arith.constant 0 : index
    %c0_36 = arith.constant 0 : index
    %56 = vector.load %arg2[%c7, %c0_35, %c0_36] : memref<9x16x3xf32, #tpu.memory_space<vmem>>, vector<1x16x3xf32>
    %57 = vector.shape_cast %56 : vector<1x16x3xf32> to vector<16x3xf32>
    %cst_37 = arith.constant dense<0.000000e+00> : vector<16x324xf32>
    %58 = tpu.matmul %57, %55, %cst_37 {dimension_numbers = #tpu.dot_dimension_numbers<[1], [0], [0], [1], [0, 0, 1, 1], [], []>} : vector<16x3xf32>, vector<3x324xf32>, vector<16x324xf32> -> vector<16x324xf32>
    %59 = arith.addf %52, %58 : vector<16x324xf32>
    %cst_38 = arith.constant 0.000000e+00 : f32
    %60 = vector.broadcast %cst_38 : f32 to vector<3x19xf32>
    %61 = vector.extract_strided_slice %3 {offsets = [0, 19], sizes = [3, 305], strides = [1, 1]} : vector<3x324xf32> to vector<3x305xf32>
    %62 = tpu.concatenate %61, %60 in 1 : vector<3x305xf32>, vector<3x19xf32> -> vector<3x324xf32>
    %c8 = arith.constant 8 : index
    %c0_39 = arith.constant 0 : index
    %c0_40 = arith.constant 0 : index
    %63 = vector.load %arg2[%c8, %c0_39, %c0_40] : memref<9x16x3xf32, #tpu.memory_space<vmem>>, vector<1x16x3xf32>
    %64 = vector.shape_cast %63 : vector<1x16x3xf32> to vector<16x3xf32>
    %cst_41 = arith.constant dense<0.000000e+00> : vector<16x324xf32>
    %65 = tpu.matmul %64, %62, %cst_41 {dimension_numbers = #tpu.dot_dimension_numbers<[1], [0], [0], [1], [0, 0, 1, 1], [], []>} : vector<16x3xf32>, vector<3x324xf32>, vector<16x324xf32> -> vector<16x324xf32>
    %66 = arith.addf %59, %65 : vector<16x324xf32>
    %cst_42 = arith.constant 0.000000e+00 : f32
    %67 = vector.broadcast %cst_42 : f32 to vector<16x324xf32>
    %68 = arith.maximumf %66, %67 : vector<16x324xf32>
    %cst_43 = arith.constant 0.000000e+00 : f32
    %69 = vector.broadcast %cst_43 : f32 to vector<16x1xf32>
    %70 = vector.extract_strided_slice %68 {offsets = [0, 1], sizes = [16, 323], strides = [1, 1]} : vector<16x324xf32> to vector<16x323xf32>
    %71 = tpu.concatenate %70, %69 in 1 : vector<16x323xf32>, vector<16x1xf32> -> vector<16x324xf32>
    %72 = arith.maximumf %68, %71 : vector<16x324xf32>
    %cst_44 = arith.constant 0.000000e+00 : f32
    %73 = vector.broadcast %cst_44 : f32 to vector<16x18xf32>
    %74 = vector.extract_strided_slice %72 {offsets = [0, 18], sizes = [16, 306], strides = [1, 1]} : vector<16x324xf32> to vector<16x306xf32>
    %75 = tpu.concatenate %74, %73 in 1 : vector<16x306xf32>, vector<16x18xf32> -> vector<16x324xf32>
    %76 = arith.maximumf %72, %75 : vector<16x324xf32>
    %c0_45 = arith.constant 0 : index
    %c0_46 = arith.constant 0 : index
    %77 = vector.load %arg11[%c0_45, %c0_46] : memref<324x100xf32, #tpu.memory_space<vmem>>, vector<324x100xf32>
    %cst_47 = arith.constant dense<0.000000e+00> : vector<16x100xf32>
    %78 = tpu.matmul %76, %77, %cst_47 {dimension_numbers = #tpu.dot_dimension_numbers<[1], [0], [0], [1], [0, 0, 1, 1], [], []>} : vector<16x324xf32>, vector<324x100xf32>, vector<16x100xf32> -> vector<16x100xf32>
    %c0_48 = arith.constant 0 : index
    %c0_49 = arith.constant 0 : index
    %79 = vector.load %arg5[%c0_48, %c0_49] : memref<32x1xf32, #tpu.memory_space<vmem>>, vector<32x1xf32>
    %80 = vector.shape_cast %79 : vector<32x1xf32> to vector<32x1xf32>
    %81 = vector.broadcast %80 : vector<32x1xf32> to vector<32x100xf32>
    %cst_50 = arith.constant 0.000000e+00 : f32
    %82 = vector.broadcast %cst_50 : f32 to vector<16x11xf32>
    %83 = vector.extract_strided_slice %78 {offsets = [0, 0], sizes = [16, 89], strides = [1, 1]} : vector<16x100xf32> to vector<16x89xf32>
    %84 = tpu.concatenate %82, %83 in 1 : vector<16x11xf32>, vector<16x89xf32> -> vector<16x100xf32>
    %c0_51 = arith.constant 0 : index
    %c0_52 = arith.constant 0 : index
    %c0_53 = arith.constant 0 : index
    %85 = vector.load %arg4[%c0_51, %c0_52, %c0_53] : memref<9x32x16xf32, #tpu.memory_space<vmem>>, vector<1x32x16xf32>
    %86 = vector.shape_cast %85 : vector<1x32x16xf32> to vector<32x16xf32>
    %cst_54 = arith.constant dense<0.000000e+00> : vector<32x100xf32>
    %87 = tpu.matmul %86, %84, %cst_54 {dimension_numbers = #tpu.dot_dimension_numbers<[1], [0], [0], [1], [0, 0, 1, 1], [], []>} : vector<32x16xf32>, vector<16x100xf32>, vector<32x100xf32> -> vector<32x100xf32>
    %88 = arith.addf %81, %87 : vector<32x100xf32>
    %cst_55 = arith.constant 0.000000e+00 : f32
    %89 = vector.broadcast %cst_55 : f32 to vector<16x10xf32>
    %90 = vector.extract_strided_slice %78 {offsets = [0, 0], sizes = [16, 90], strides = [1, 1]} : vector<16x100xf32> to vector<16x90xf32>
    %91 = tpu.concatenate %89, %90 in 1 : vector<16x10xf32>, vector<16x90xf32> -> vector<16x100xf32>
    %c1_56 = arith.constant 1 : index
    %c0_57 = arith.constant 0 : index
    %c0_58 = arith.constant 0 : index
    %92 = vector.load %arg4[%c1_56, %c0_57, %c0_58] : memref<9x32x16xf32, #tpu.memory_space<vmem>>, vector<1x32x16xf32>
    %93 = vector.shape_cast %92 : vector<1x32x16xf32> to vector<32x16xf32>
    %cst_59 = arith.constant dense<0.000000e+00> : vector<32x100xf32>
    %94 = tpu.matmul %93, %91, %cst_59 {dimension_numbers = #tpu.dot_dimension_numbers<[1], [0], [0], [1], [0, 0, 1, 1], [], []>} : vector<32x16xf32>, vector<16x100xf32>, vector<32x100xf32> -> vector<32x100xf32>
    %95 = arith.addf %88, %94 : vector<32x100xf32>
    %cst_60 = arith.constant 0.000000e+00 : f32
    %96 = vector.broadcast %cst_60 : f32 to vector<16x9xf32>
    %97 = vector.extract_strided_slice %78 {offsets = [0, 0], sizes = [16, 91], strides = [1, 1]} : vector<16x100xf32> to vector<16x91xf32>
    %98 = tpu.concatenate %96, %97 in 1 : vector<16x9xf32>, vector<16x91xf32> -> vector<16x100xf32>
    %c2_61 = arith.constant 2 : index
    %c0_62 = arith.constant 0 : index
    %c0_63 = arith.constant 0 : index
    %99 = vector.load %arg4[%c2_61, %c0_62, %c0_63] : memref<9x32x16xf32, #tpu.memory_space<vmem>>, vector<1x32x16xf32>
    %100 = vector.shape_cast %99 : vector<1x32x16xf32> to vector<32x16xf32>
    %cst_64 = arith.constant dense<0.000000e+00> : vector<32x100xf32>
    %101 = tpu.matmul %100, %98, %cst_64 {dimension_numbers = #tpu.dot_dimension_numbers<[1], [0], [0], [1], [0, 0, 1, 1], [], []>} : vector<32x16xf32>, vector<16x100xf32>, vector<32x100xf32> -> vector<32x100xf32>
    %102 = arith.addf %95, %101 : vector<32x100xf32>
    %cst_65 = arith.constant 0.000000e+00 : f32
    %103 = vector.broadcast %cst_65 : f32 to vector<16x1xf32>
    %104 = vector.extract_strided_slice %78 {offsets = [0, 0], sizes = [16, 99], strides = [1, 1]} : vector<16x100xf32> to vector<16x99xf32>
    %105 = tpu.concatenate %103, %104 in 1 : vector<16x1xf32>, vector<16x99xf32> -> vector<16x100xf32>
    %c3_66 = arith.constant 3 : index
    %c0_67 = arith.constant 0 : index
    %c0_68 = arith.constant 0 : index
    %106 = vector.load %arg4[%c3_66, %c0_67, %c0_68] : memref<9x32x16xf32, #tpu.memory_space<vmem>>, vector<1x32x16xf32>
    %107 = vector.shape_cast %106 : vector<1x32x16xf32> to vector<32x16xf32>
    %cst_69 = arith.constant dense<0.000000e+00> : vector<32x100xf32>
    %108 = tpu.matmul %107, %105, %cst_69 {dimension_numbers = #tpu.dot_dimension_numbers<[1], [0], [0], [1], [0, 0, 1, 1], [], []>} : vector<32x16xf32>, vector<16x100xf32>, vector<32x100xf32> -> vector<32x100xf32>
    %109 = arith.addf %102, %108 : vector<32x100xf32>
    %c4_70 = arith.constant 4 : index
    %c0_71 = arith.constant 0 : index
    %c0_72 = arith.constant 0 : index
    %110 = vector.load %arg4[%c4_70, %c0_71, %c0_72] : memref<9x32x16xf32, #tpu.memory_space<vmem>>, vector<1x32x16xf32>
    %111 = vector.shape_cast %110 : vector<1x32x16xf32> to vector<32x16xf32>
    %cst_73 = arith.constant dense<0.000000e+00> : vector<32x100xf32>
    %112 = tpu.matmul %111, %78, %cst_73 {dimension_numbers = #tpu.dot_dimension_numbers<[1], [0], [0], [1], [0, 0, 1, 1], [], []>} : vector<32x16xf32>, vector<16x100xf32>, vector<32x100xf32> -> vector<32x100xf32>
    %113 = arith.addf %109, %112 : vector<32x100xf32>
    %cst_74 = arith.constant 0.000000e+00 : f32
    %114 = vector.broadcast %cst_74 : f32 to vector<16x1xf32>
    %115 = vector.extract_strided_slice %78 {offsets = [0, 1], sizes = [16, 99], strides = [1, 1]} : vector<16x100xf32> to vector<16x99xf32>
    %116 = tpu.concatenate %115, %114 in 1 : vector<16x99xf32>, vector<16x1xf32> -> vector<16x100xf32>
    %c5_75 = arith.constant 5 : index
    %c0_76 = arith.constant 0 : index
    %c0_77 = arith.constant 0 : index
    %117 = vector.load %arg4[%c5_75, %c0_76, %c0_77] : memref<9x32x16xf32, #tpu.memory_space<vmem>>, vector<1x32x16xf32>
    %118 = vector.shape_cast %117 : vector<1x32x16xf32> to vector<32x16xf32>
    %cst_78 = arith.constant dense<0.000000e+00> : vector<32x100xf32>
    %119 = tpu.matmul %118, %116, %cst_78 {dimension_numbers = #tpu.dot_dimension_numbers<[1], [0], [0], [1], [0, 0, 1, 1], [], []>} : vector<32x16xf32>, vector<16x100xf32>, vector<32x100xf32> -> vector<32x100xf32>
    %120 = arith.addf %113, %119 : vector<32x100xf32>
    %cst_79 = arith.constant 0.000000e+00 : f32
    %121 = vector.broadcast %cst_79 : f32 to vector<16x9xf32>
    %122 = vector.extract_strided_slice %78 {offsets = [0, 9], sizes = [16, 91], strides = [1, 1]} : vector<16x100xf32> to vector<16x91xf32>
    %123 = tpu.concatenate %122, %121 in 1 : vector<16x91xf32>, vector<16x9xf32> -> vector<16x100xf32>
    %c6_80 = arith.constant 6 : index
    %c0_81 = arith.constant 0 : index
    %c0_82 = arith.constant 0 : index
    %124 = vector.load %arg4[%c6_80, %c0_81, %c0_82] : memref<9x32x16xf32, #tpu.memory_space<vmem>>, vector<1x32x16xf32>
    %125 = vector.shape_cast %124 : vector<1x32x16xf32> to vector<32x16xf32>
    %cst_83 = arith.constant dense<0.000000e+00> : vector<32x100xf32>
    %126 = tpu.matmul %125, %123, %cst_83 {dimension_numbers = #tpu.dot_dimension_numbers<[1], [0], [0], [1], [0, 0, 1, 1], [], []>} : vector<32x16xf32>, vector<16x100xf32>, vector<32x100xf32> -> vector<32x100xf32>
    %127 = arith.addf %120, %126 : vector<32x100xf32>
    %cst_84 = arith.constant 0.000000e+00 : f32
    %128 = vector.broadcast %cst_84 : f32 to vector<16x10xf32>
    %129 = vector.extract_strided_slice %78 {offsets = [0, 10], sizes = [16, 90], strides = [1, 1]} : vector<16x100xf32> to vector<16x90xf32>
    %130 = tpu.concatenate %129, %128 in 1 : vector<16x90xf32>, vector<16x10xf32> -> vector<16x100xf32>
    %c7_85 = arith.constant 7 : index
    %c0_86 = arith.constant 0 : index
    %c0_87 = arith.constant 0 : index
    %131 = vector.load %arg4[%c7_85, %c0_86, %c0_87] : memref<9x32x16xf32, #tpu.memory_space<vmem>>, vector<1x32x16xf32>
    %132 = vector.shape_cast %131 : vector<1x32x16xf32> to vector<32x16xf32>
    %cst_88 = arith.constant dense<0.000000e+00> : vector<32x100xf32>
    %133 = tpu.matmul %132, %130, %cst_88 {dimension_numbers = #tpu.dot_dimension_numbers<[1], [0], [0], [1], [0, 0, 1, 1], [], []>} : vector<32x16xf32>, vector<16x100xf32>, vector<32x100xf32> -> vector<32x100xf32>
    %134 = arith.addf %127, %133 : vector<32x100xf32>
    %cst_89 = arith.constant 0.000000e+00 : f32
    %135 = vector.broadcast %cst_89 : f32 to vector<16x11xf32>
    %136 = vector.extract_strided_slice %78 {offsets = [0, 11], sizes = [16, 89], strides = [1, 1]} : vector<16x100xf32> to vector<16x89xf32>
    %137 = tpu.concatenate %136, %135 in 1 : vector<16x89xf32>, vector<16x11xf32> -> vector<16x100xf32>
    %c8_90 = arith.constant 8 : index
    %c0_91 = arith.constant 0 : index
    %c0_92 = arith.constant 0 : index
    %138 = vector.load %arg4[%c8_90, %c0_91, %c0_92] : memref<9x32x16xf32, #tpu.memory_space<vmem>>, vector<1x32x16xf32>
    %139 = vector.shape_cast %138 : vector<1x32x16xf32> to vector<32x16xf32>
    %cst_93 = arith.constant dense<0.000000e+00> : vector<32x100xf32>
    %140 = tpu.matmul %139, %137, %cst_93 {dimension_numbers = #tpu.dot_dimension_numbers<[1], [0], [0], [1], [0, 0, 1, 1], [], []>} : vector<32x16xf32>, vector<16x100xf32>, vector<32x100xf32> -> vector<32x100xf32>
    %141 = arith.addf %134, %140 : vector<32x100xf32>
    %cst_94 = arith.constant 0.000000e+00 : f32
    %142 = vector.broadcast %cst_94 : f32 to vector<32x100xf32>
    %143 = arith.maximumf %141, %142 : vector<32x100xf32>
    %cst_95 = arith.constant 0.000000e+00 : f32
    %144 = vector.broadcast %cst_95 : f32 to vector<32x1xf32>
    %145 = vector.extract_strided_slice %143 {offsets = [0, 1], sizes = [32, 99], strides = [1, 1]} : vector<32x100xf32> to vector<32x99xf32>
    %146 = tpu.concatenate %145, %144 in 1 : vector<32x99xf32>, vector<32x1xf32> -> vector<32x100xf32>
    %147 = arith.maximumf %143, %146 : vector<32x100xf32>
    %cst_96 = arith.constant 0.000000e+00 : f32
    %148 = vector.broadcast %cst_96 : f32 to vector<32x10xf32>
    %149 = vector.extract_strided_slice %147 {offsets = [0, 10], sizes = [32, 90], strides = [1, 1]} : vector<32x100xf32> to vector<32x90xf32>
    %150 = tpu.concatenate %149, %148 in 1 : vector<32x90xf32>, vector<32x10xf32> -> vector<32x100xf32>
    %151 = arith.maximumf %147, %150 : vector<32x100xf32>
    %c0_97 = arith.constant 0 : index
    %c0_98 = arith.constant 0 : index
    %152 = vector.load %arg12[%c0_97, %c0_98] : memref<100x36xf32, #tpu.memory_space<vmem>>, vector<100x36xf32>
    %cst_99 = arith.constant dense<0.000000e+00> : vector<32x36xf32>
    %153 = tpu.matmul %151, %152, %cst_99 {dimension_numbers = #tpu.dot_dimension_numbers<[1], [0], [0], [1], [0, 0, 1, 1], [], []>} : vector<32x100xf32>, vector<100x36xf32>, vector<32x36xf32> -> vector<32x36xf32>
    %c0_100 = arith.constant 0 : index
    %c0_101 = arith.constant 0 : index
    %154 = vector.load %arg13[%c0_100, %c0_101] : memref<36x100xf32, #tpu.memory_space<vmem>>, vector<36x100xf32>
    %cst_102 = arith.constant dense<0.000000e+00> : vector<32x100xf32>
    %155 = tpu.matmul %153, %154, %cst_102 {dimension_numbers = #tpu.dot_dimension_numbers<[1], [0], [0], [1], [0, 0, 1, 1], [], []>} : vector<32x36xf32>, vector<36x100xf32>, vector<32x100xf32> -> vector<32x100xf32>
    %c0_103 = arith.constant 0 : index
    %c0_104 = arith.constant 0 : index
    %156 = vector.load %arg7[%c0_103, %c0_104] : memref<16x1xf32, #tpu.memory_space<vmem>>, vector<16x1xf32>
    %157 = vector.shape_cast %156 : vector<16x1xf32> to vector<16x1xf32>
    %158 = vector.broadcast %157 : vector<16x1xf32> to vector<16x100xf32>
    %cst_105 = arith.constant 0.000000e+00 : f32
    %159 = vector.broadcast %cst_105 : f32 to vector<32x11xf32>
    %160 = vector.extract_strided_slice %155 {offsets = [0, 0], sizes = [32, 89], strides = [1, 1]} : vector<32x100xf32> to vector<32x89xf32>
    %161 = tpu.concatenate %159, %160 in 1 : vector<32x11xf32>, vector<32x89xf32> -> vector<32x100xf32>
    %c0_106 = arith.constant 0 : index
    %c0_107 = arith.constant 0 : index
    %c0_108 = arith.constant 0 : index
    %162 = vector.load %arg6[%c0_106, %c0_107, %c0_108] : memref<9x16x32xf32, #tpu.memory_space<vmem>>, vector<1x16x32xf32>
    %163 = vector.shape_cast %162 : vector<1x16x32xf32> to vector<16x32xf32>
    %cst_109 = arith.constant dense<0.000000e+00> : vector<16x100xf32>
    %164 = tpu.matmul %163, %161, %cst_109 {dimension_numbers = #tpu.dot_dimension_numbers<[1], [0], [0], [1], [0, 0, 1, 1], [], []>} : vector<16x32xf32>, vector<32x100xf32>, vector<16x100xf32> -> vector<16x100xf32>
    %165 = arith.addf %158, %164 : vector<16x100xf32>
    %cst_110 = arith.constant 0.000000e+00 : f32
    %166 = vector.broadcast %cst_110 : f32 to vector<32x10xf32>
    %167 = vector.extract_strided_slice %155 {offsets = [0, 0], sizes = [32, 90], strides = [1, 1]} : vector<32x100xf32> to vector<32x90xf32>
    %168 = tpu.concatenate %166, %167 in 1 : vector<32x10xf32>, vector<32x90xf32> -> vector<32x100xf32>
    %c1_111 = arith.constant 1 : index
    %c0_112 = arith.constant 0 : index
    %c0_113 = arith.constant 0 : index
    %169 = vector.load %arg6[%c1_111, %c0_112, %c0_113] : memref<9x16x32xf32, #tpu.memory_space<vmem>>, vector<1x16x32xf32>
    %170 = vector.shape_cast %169 : vector<1x16x32xf32> to vector<16x32xf32>
    %cst_114 = arith.constant dense<0.000000e+00> : vector<16x100xf32>
    %171 = tpu.matmul %170, %168, %cst_114 {dimension_numbers = #tpu.dot_dimension_numbers<[1], [0], [0], [1], [0, 0, 1, 1], [], []>} : vector<16x32xf32>, vector<32x100xf32>, vector<16x100xf32> -> vector<16x100xf32>
    %172 = arith.addf %165, %171 : vector<16x100xf32>
    %cst_115 = arith.constant 0.000000e+00 : f32
    %173 = vector.broadcast %cst_115 : f32 to vector<32x9xf32>
    %174 = vector.extract_strided_slice %155 {offsets = [0, 0], sizes = [32, 91], strides = [1, 1]} : vector<32x100xf32> to vector<32x91xf32>
    %175 = tpu.concatenate %173, %174 in 1 : vector<32x9xf32>, vector<32x91xf32> -> vector<32x100xf32>
    %c2_116 = arith.constant 2 : index
    %c0_117 = arith.constant 0 : index
    %c0_118 = arith.constant 0 : index
    %176 = vector.load %arg6[%c2_116, %c0_117, %c0_118] : memref<9x16x32xf32, #tpu.memory_space<vmem>>, vector<1x16x32xf32>
    %177 = vector.shape_cast %176 : vector<1x16x32xf32> to vector<16x32xf32>
    %cst_119 = arith.constant dense<0.000000e+00> : vector<16x100xf32>
    %178 = tpu.matmul %177, %175, %cst_119 {dimension_numbers = #tpu.dot_dimension_numbers<[1], [0], [0], [1], [0, 0, 1, 1], [], []>} : vector<16x32xf32>, vector<32x100xf32>, vector<16x100xf32> -> vector<16x100xf32>
    %179 = arith.addf %172, %178 : vector<16x100xf32>
    %cst_120 = arith.constant 0.000000e+00 : f32
    %180 = vector.broadcast %cst_120 : f32 to vector<32x1xf32>
    %181 = vector.extract_strided_slice %155 {offsets = [0, 0], sizes = [32, 99], strides = [1, 1]} : vector<32x100xf32> to vector<32x99xf32>
    %182 = tpu.concatenate %180, %181 in 1 : vector<32x1xf32>, vector<32x99xf32> -> vector<32x100xf32>
    %c3_121 = arith.constant 3 : index
    %c0_122 = arith.constant 0 : index
    %c0_123 = arith.constant 0 : index
    %183 = vector.load %arg6[%c3_121, %c0_122, %c0_123] : memref<9x16x32xf32, #tpu.memory_space<vmem>>, vector<1x16x32xf32>
    %184 = vector.shape_cast %183 : vector<1x16x32xf32> to vector<16x32xf32>
    %cst_124 = arith.constant dense<0.000000e+00> : vector<16x100xf32>
    %185 = tpu.matmul %184, %182, %cst_124 {dimension_numbers = #tpu.dot_dimension_numbers<[1], [0], [0], [1], [0, 0, 1, 1], [], []>} : vector<16x32xf32>, vector<32x100xf32>, vector<16x100xf32> -> vector<16x100xf32>
    %186 = arith.addf %179, %185 : vector<16x100xf32>
    %c4_125 = arith.constant 4 : index
    %c0_126 = arith.constant 0 : index
    %c0_127 = arith.constant 0 : index
    %187 = vector.load %arg6[%c4_125, %c0_126, %c0_127] : memref<9x16x32xf32, #tpu.memory_space<vmem>>, vector<1x16x32xf32>
    %188 = vector.shape_cast %187 : vector<1x16x32xf32> to vector<16x32xf32>
    %cst_128 = arith.constant dense<0.000000e+00> : vector<16x100xf32>
    %189 = tpu.matmul %188, %155, %cst_128 {dimension_numbers = #tpu.dot_dimension_numbers<[1], [0], [0], [1], [0, 0, 1, 1], [], []>} : vector<16x32xf32>, vector<32x100xf32>, vector<16x100xf32> -> vector<16x100xf32>
    %190 = arith.addf %186, %189 : vector<16x100xf32>
    %cst_129 = arith.constant 0.000000e+00 : f32
    %191 = vector.broadcast %cst_129 : f32 to vector<32x1xf32>
    %192 = vector.extract_strided_slice %155 {offsets = [0, 1], sizes = [32, 99], strides = [1, 1]} : vector<32x100xf32> to vector<32x99xf32>
    %193 = tpu.concatenate %192, %191 in 1 : vector<32x99xf32>, vector<32x1xf32> -> vector<32x100xf32>
    %c5_130 = arith.constant 5 : index
    %c0_131 = arith.constant 0 : index
    %c0_132 = arith.constant 0 : index
    %194 = vector.load %arg6[%c5_130, %c0_131, %c0_132] : memref<9x16x32xf32, #tpu.memory_space<vmem>>, vector<1x16x32xf32>
    %195 = vector.shape_cast %194 : vector<1x16x32xf32> to vector<16x32xf32>
    %cst_133 = arith.constant dense<0.000000e+00> : vector<16x100xf32>
    %196 = tpu.matmul %195, %193, %cst_133 {dimension_numbers = #tpu.dot_dimension_numbers<[1], [0], [0], [1], [0, 0, 1, 1], [], []>} : vector<16x32xf32>, vector<32x100xf32>, vector<16x100xf32> -> vector<16x100xf32>
    %197 = arith.addf %190, %196 : vector<16x100xf32>
    %cst_134 = arith.constant 0.000000e+00 : f32
    %198 = vector.broadcast %cst_134 : f32 to vector<32x9xf32>
    %199 = vector.extract_strided_slice %155 {offsets = [0, 9], sizes = [32, 91], strides = [1, 1]} : vector<32x100xf32> to vector<32x91xf32>
    %200 = tpu.concatenate %199, %198 in 1 : vector<32x91xf32>, vector<32x9xf32> -> vector<32x100xf32>
    %c6_135 = arith.constant 6 : index
    %c0_136 = arith.constant 0 : index
    %c0_137 = arith.constant 0 : index
    %201 = vector.load %arg6[%c6_135, %c0_136, %c0_137] : memref<9x16x32xf32, #tpu.memory_space<vmem>>, vector<1x16x32xf32>
    %202 = vector.shape_cast %201 : vector<1x16x32xf32> to vector<16x32xf32>
    %cst_138 = arith.constant dense<0.000000e+00> : vector<16x100xf32>
    %203 = tpu.matmul %202, %200, %cst_138 {dimension_numbers = #tpu.dot_dimension_numbers<[1], [0], [0], [1], [0, 0, 1, 1], [], []>} : vector<16x32xf32>, vector<32x100xf32>, vector<16x100xf32> -> vector<16x100xf32>
    %204 = arith.addf %197, %203 : vector<16x100xf32>
    %cst_139 = arith.constant 0.000000e+00 : f32
    %205 = vector.broadcast %cst_139 : f32 to vector<32x10xf32>
    %206 = vector.extract_strided_slice %155 {offsets = [0, 10], sizes = [32, 90], strides = [1, 1]} : vector<32x100xf32> to vector<32x90xf32>
    %207 = tpu.concatenate %206, %205 in 1 : vector<32x90xf32>, vector<32x10xf32> -> vector<32x100xf32>
    %c7_140 = arith.constant 7 : index
    %c0_141 = arith.constant 0 : index
    %c0_142 = arith.constant 0 : index
    %208 = vector.load %arg6[%c7_140, %c0_141, %c0_142] : memref<9x16x32xf32, #tpu.memory_space<vmem>>, vector<1x16x32xf32>
    %209 = vector.shape_cast %208 : vector<1x16x32xf32> to vector<16x32xf32>
    %cst_143 = arith.constant dense<0.000000e+00> : vector<16x100xf32>
    %210 = tpu.matmul %209, %207, %cst_143 {dimension_numbers = #tpu.dot_dimension_numbers<[1], [0], [0], [1], [0, 0, 1, 1], [], []>} : vector<16x32xf32>, vector<32x100xf32>, vector<16x100xf32> -> vector<16x100xf32>
    %211 = arith.addf %204, %210 : vector<16x100xf32>
    %cst_144 = arith.constant 0.000000e+00 : f32
    %212 = vector.broadcast %cst_144 : f32 to vector<32x11xf32>
    %213 = vector.extract_strided_slice %155 {offsets = [0, 11], sizes = [32, 89], strides = [1, 1]} : vector<32x100xf32> to vector<32x89xf32>
    %214 = tpu.concatenate %213, %212 in 1 : vector<32x89xf32>, vector<32x11xf32> -> vector<32x100xf32>
    %c8_145 = arith.constant 8 : index
    %c0_146 = arith.constant 0 : index
    %c0_147 = arith.constant 0 : index
    %215 = vector.load %arg6[%c8_145, %c0_146, %c0_147] : memref<9x16x32xf32, #tpu.memory_space<vmem>>, vector<1x16x32xf32>
    %216 = vector.shape_cast %215 : vector<1x16x32xf32> to vector<16x32xf32>
    %cst_148 = arith.constant dense<0.000000e+00> : vector<16x100xf32>
    %217 = tpu.matmul %216, %214, %cst_148 {dimension_numbers = #tpu.dot_dimension_numbers<[1], [0], [0], [1], [0, 0, 1, 1], [], []>} : vector<16x32xf32>, vector<32x100xf32>, vector<16x100xf32> -> vector<16x100xf32>
    %218 = arith.addf %211, %217 : vector<16x100xf32>
    %cst_149 = arith.constant 0.000000e+00 : f32
    %219 = vector.broadcast %cst_149 : f32 to vector<16x100xf32>
    %220 = arith.maximumf %218, %219 : vector<16x100xf32>
    %c0_150 = arith.constant 0 : index
    %c0_151 = arith.constant 0 : index
    %221 = vector.load %arg14[%c0_150, %c0_151] : memref<100x324xf32, #tpu.memory_space<vmem>>, vector<100x324xf32>
    %cst_152 = arith.constant dense<0.000000e+00> : vector<16x324xf32>
    %222 = tpu.matmul %220, %221, %cst_152 {dimension_numbers = #tpu.dot_dimension_numbers<[1], [0], [0], [1], [0, 0, 1, 1], [], []>} : vector<16x100xf32>, vector<100x324xf32>, vector<16x324xf32> -> vector<16x324xf32>
    %c0_153 = arith.constant 0 : index
    %c0_154 = arith.constant 0 : index
    %223 = vector.load %arg9[%c0_153, %c0_154] : memref<3x1xf32, #tpu.memory_space<vmem>>, vector<3x1xf32>
    %224 = vector.shape_cast %223 : vector<3x1xf32> to vector<3x1xf32>
    %225 = vector.broadcast %224 : vector<3x1xf32> to vector<3x324xf32>
    %cst_155 = arith.constant 0.000000e+00 : f32
    %226 = vector.broadcast %cst_155 : f32 to vector<16x19xf32>
    %227 = vector.extract_strided_slice %222 {offsets = [0, 0], sizes = [16, 305], strides = [1, 1]} : vector<16x324xf32> to vector<16x305xf32>
    %228 = tpu.concatenate %226, %227 in 1 : vector<16x19xf32>, vector<16x305xf32> -> vector<16x324xf32>
    %c0_156 = arith.constant 0 : index
    %c0_157 = arith.constant 0 : index
    %c0_158 = arith.constant 0 : index
    %229 = vector.load %arg8[%c0_156, %c0_157, %c0_158] : memref<9x3x16xf32, #tpu.memory_space<vmem>>, vector<1x3x16xf32>
    %230 = vector.shape_cast %229 : vector<1x3x16xf32> to vector<3x16xf32>
    %cst_159 = arith.constant dense<0.000000e+00> : vector<3x324xf32>
    %231 = tpu.matmul %230, %228, %cst_159 {dimension_numbers = #tpu.dot_dimension_numbers<[1], [0], [0], [1], [0, 0, 1, 1], [], []>} : vector<3x16xf32>, vector<16x324xf32>, vector<3x324xf32> -> vector<3x324xf32>
    %232 = arith.addf %225, %231 : vector<3x324xf32>
    %cst_160 = arith.constant 0.000000e+00 : f32
    %233 = vector.broadcast %cst_160 : f32 to vector<16x18xf32>
    %234 = vector.extract_strided_slice %222 {offsets = [0, 0], sizes = [16, 306], strides = [1, 1]} : vector<16x324xf32> to vector<16x306xf32>
    %235 = tpu.concatenate %233, %234 in 1 : vector<16x18xf32>, vector<16x306xf32> -> vector<16x324xf32>
    %c1_161 = arith.constant 1 : index
    %c0_162 = arith.constant 0 : index
    %c0_163 = arith.constant 0 : index
    %236 = vector.load %arg8[%c1_161, %c0_162, %c0_163] : memref<9x3x16xf32, #tpu.memory_space<vmem>>, vector<1x3x16xf32>
    %237 = vector.shape_cast %236 : vector<1x3x16xf32> to vector<3x16xf32>
    %cst_164 = arith.constant dense<0.000000e+00> : vector<3x324xf32>
    %238 = tpu.matmul %237, %235, %cst_164 {dimension_numbers = #tpu.dot_dimension_numbers<[1], [0], [0], [1], [0, 0, 1, 1], [], []>} : vector<3x16xf32>, vector<16x324xf32>, vector<3x324xf32> -> vector<3x324xf32>
    %239 = arith.addf %232, %238 : vector<3x324xf32>
    %cst_165 = arith.constant 0.000000e+00 : f32
    %240 = vector.broadcast %cst_165 : f32 to vector<16x17xf32>
    %241 = vector.extract_strided_slice %222 {offsets = [0, 0], sizes = [16, 307], strides = [1, 1]} : vector<16x324xf32> to vector<16x307xf32>
    %242 = tpu.concatenate %240, %241 in 1 : vector<16x17xf32>, vector<16x307xf32> -> vector<16x324xf32>
    %c2_166 = arith.constant 2 : index
    %c0_167 = arith.constant 0 : index
    %c0_168 = arith.constant 0 : index
    %243 = vector.load %arg8[%c2_166, %c0_167, %c0_168] : memref<9x3x16xf32, #tpu.memory_space<vmem>>, vector<1x3x16xf32>
    %244 = vector.shape_cast %243 : vector<1x3x16xf32> to vector<3x16xf32>
    %cst_169 = arith.constant dense<0.000000e+00> : vector<3x324xf32>
    %245 = tpu.matmul %244, %242, %cst_169 {dimension_numbers = #tpu.dot_dimension_numbers<[1], [0], [0], [1], [0, 0, 1, 1], [], []>} : vector<3x16xf32>, vector<16x324xf32>, vector<3x324xf32> -> vector<3x324xf32>
    %246 = arith.addf %239, %245 : vector<3x324xf32>
    %cst_170 = arith.constant 0.000000e+00 : f32
    %247 = vector.broadcast %cst_170 : f32 to vector<16x1xf32>
    %248 = vector.extract_strided_slice %222 {offsets = [0, 0], sizes = [16, 323], strides = [1, 1]} : vector<16x324xf32> to vector<16x323xf32>
    %249 = tpu.concatenate %247, %248 in 1 : vector<16x1xf32>, vector<16x323xf32> -> vector<16x324xf32>
    %c3_171 = arith.constant 3 : index
    %c0_172 = arith.constant 0 : index
    %c0_173 = arith.constant 0 : index
    %250 = vector.load %arg8[%c3_171, %c0_172, %c0_173] : memref<9x3x16xf32, #tpu.memory_space<vmem>>, vector<1x3x16xf32>
    %251 = vector.shape_cast %250 : vector<1x3x16xf32> to vector<3x16xf32>
    %cst_174 = arith.constant dense<0.000000e+00> : vector<3x324xf32>
    %252 = tpu.matmul %251, %249, %cst_174 {dimension_numbers = #tpu.dot_dimension_numbers<[1], [0], [0], [1], [0, 0, 1, 1], [], []>} : vector<3x16xf32>, vector<16x324xf32>, vector<3x324xf32> -> vector<3x324xf32>
    %253 = arith.addf %246, %252 : vector<3x324xf32>
    %c4_175 = arith.constant 4 : index
    %c0_176 = arith.constant 0 : index
    %c0_177 = arith.constant 0 : index
    %254 = vector.load %arg8[%c4_175, %c0_176, %c0_177] : memref<9x3x16xf32, #tpu.memory_space<vmem>>, vector<1x3x16xf32>
    %255 = vector.shape_cast %254 : vector<1x3x16xf32> to vector<3x16xf32>
    %cst_178 = arith.constant dense<0.000000e+00> : vector<3x324xf32>
    %256 = tpu.matmul %255, %222, %cst_178 {dimension_numbers = #tpu.dot_dimension_numbers<[1], [0], [0], [1], [0, 0, 1, 1], [], []>} : vector<3x16xf32>, vector<16x324xf32>, vector<3x324xf32> -> vector<3x324xf32>
    %257 = arith.addf %253, %256 : vector<3x324xf32>
    %cst_179 = arith.constant 0.000000e+00 : f32
    %258 = vector.broadcast %cst_179 : f32 to vector<16x1xf32>
    %259 = vector.extract_strided_slice %222 {offsets = [0, 1], sizes = [16, 323], strides = [1, 1]} : vector<16x324xf32> to vector<16x323xf32>
    %260 = tpu.concatenate %259, %258 in 1 : vector<16x323xf32>, vector<16x1xf32> -> vector<16x324xf32>
    %c5_180 = arith.constant 5 : index
    %c0_181 = arith.constant 0 : index
    %c0_182 = arith.constant 0 : index
    %261 = vector.load %arg8[%c5_180, %c0_181, %c0_182] : memref<9x3x16xf32, #tpu.memory_space<vmem>>, vector<1x3x16xf32>
    %262 = vector.shape_cast %261 : vector<1x3x16xf32> to vector<3x16xf32>
    %cst_183 = arith.constant dense<0.000000e+00> : vector<3x324xf32>
    %263 = tpu.matmul %262, %260, %cst_183 {dimension_numbers = #tpu.dot_dimension_numbers<[1], [0], [0], [1], [0, 0, 1, 1], [], []>} : vector<3x16xf32>, vector<16x324xf32>, vector<3x324xf32> -> vector<3x324xf32>
    %264 = arith.addf %257, %263 : vector<3x324xf32>
    %cst_184 = arith.constant 0.000000e+00 : f32
    %265 = vector.broadcast %cst_184 : f32 to vector<16x17xf32>
    %266 = vector.extract_strided_slice %222 {offsets = [0, 17], sizes = [16, 307], strides = [1, 1]} : vector<16x324xf32> to vector<16x307xf32>
    %267 = tpu.concatenate %266, %265 in 1 : vector<16x307xf32>, vector<16x17xf32> -> vector<16x324xf32>
    %c6_185 = arith.constant 6 : index
    %c0_186 = arith.constant 0 : index
    %c0_187 = arith.constant 0 : index
    %268 = vector.load %arg8[%c6_185, %c0_186, %c0_187] : memref<9x3x16xf32, #tpu.memory_space<vmem>>, vector<1x3x16xf32>
    %269 = vector.shape_cast %268 : vector<1x3x16xf32> to vector<3x16xf32>
    %cst_188 = arith.constant dense<0.000000e+00> : vector<3x324xf32>
    %270 = tpu.matmul %269, %267, %cst_188 {dimension_numbers = #tpu.dot_dimension_numbers<[1], [0], [0], [1], [0, 0, 1, 1], [], []>} : vector<3x16xf32>, vector<16x324xf32>, vector<3x324xf32> -> vector<3x324xf32>
    %271 = arith.addf %264, %270 : vector<3x324xf32>
    %cst_189 = arith.constant 0.000000e+00 : f32
    %272 = vector.broadcast %cst_189 : f32 to vector<16x18xf32>
    %273 = vector.extract_strided_slice %222 {offsets = [0, 18], sizes = [16, 306], strides = [1, 1]} : vector<16x324xf32> to vector<16x306xf32>
    %274 = tpu.concatenate %273, %272 in 1 : vector<16x306xf32>, vector<16x18xf32> -> vector<16x324xf32>
    %c7_190 = arith.constant 7 : index
    %c0_191 = arith.constant 0 : index
    %c0_192 = arith.constant 0 : index
    %275 = vector.load %arg8[%c7_190, %c0_191, %c0_192] : memref<9x3x16xf32, #tpu.memory_space<vmem>>, vector<1x3x16xf32>
    %276 = vector.shape_cast %275 : vector<1x3x16xf32> to vector<3x16xf32>
    %cst_193 = arith.constant dense<0.000000e+00> : vector<3x324xf32>
    %277 = tpu.matmul %276, %274, %cst_193 {dimension_numbers = #tpu.dot_dimension_numbers<[1], [0], [0], [1], [0, 0, 1, 1], [], []>} : vector<3x16xf32>, vector<16x324xf32>, vector<3x324xf32> -> vector<3x324xf32>
    %278 = arith.addf %271, %277 : vector<3x324xf32>
    %cst_194 = arith.constant 0.000000e+00 : f32
    %279 = vector.broadcast %cst_194 : f32 to vector<16x19xf32>
    %280 = vector.extract_strided_slice %222 {offsets = [0, 19], sizes = [16, 305], strides = [1, 1]} : vector<16x324xf32> to vector<16x305xf32>
    %281 = tpu.concatenate %280, %279 in 1 : vector<16x305xf32>, vector<16x19xf32> -> vector<16x324xf32>
    %c8_195 = arith.constant 8 : index
    %c0_196 = arith.constant 0 : index
    %c0_197 = arith.constant 0 : index
    %282 = vector.load %arg8[%c8_195, %c0_196, %c0_197] : memref<9x3x16xf32, #tpu.memory_space<vmem>>, vector<1x3x16xf32>
    %283 = vector.shape_cast %282 : vector<1x3x16xf32> to vector<3x16xf32>
    %cst_198 = arith.constant dense<0.000000e+00> : vector<3x324xf32>
    %284 = tpu.matmul %283, %281, %cst_198 {dimension_numbers = #tpu.dot_dimension_numbers<[1], [0], [0], [1], [0, 0, 1, 1], [], []>} : vector<3x16xf32>, vector<16x324xf32>, vector<3x324xf32> -> vector<3x324xf32>
    %285 = arith.addf %278, %284 : vector<3x324xf32>
    %cst_199 = arith.constant 5.000000e-01 : f32
    %286 = vector.broadcast %cst_199 : f32 to vector<3x324xf32>
    %287 = arith.mulf %286, %285 : vector<3x324xf32>
    %288 = math.tanh %287 : vector<3x324xf32>
    %cst_200 = arith.constant 5.000000e-01 : f32
    %289 = vector.broadcast %cst_200 : f32 to vector<3x324xf32>
    %290 = arith.mulf %289, %288 : vector<3x324xf32>
    %cst_201 = arith.constant 5.000000e-01 : f32
    %291 = vector.broadcast %cst_201 : f32 to vector<3x324xf32>
    %292 = arith.addf %290, %291 : vector<3x324xf32>
    %c0_202 = arith.constant 0 : index
    %c0_203 = arith.constant 0 : index
    %c0_204 = arith.constant 0 : index
    %293 = vector.load %arg15[%c0_202, %c0_203, %c0_204] : memref<1x3x324xf32, #tpu.memory_space<vmem>>, vector<1x3x324xf32>
    %294 = vector.shape_cast %293 : vector<1x3x324xf32> to vector<3x324xf32>
    %295 = vector.shape_cast %292 : vector<3x324xf32> to vector<1x3x324xf32>
    tpu.vector_store %arg15[%c0_202, %c0_203, %c0_204], %295 {strides = array<i32>} : memref<1x3x324xf32, #tpu.memory_space<vmem>>, vector<1x3x324xf32>,
    return
  }
  func.func @transform_0(%arg0: i32) -> (i32, i32, i32) {
    %c0_i32 = arith.constant 0 : i32
    %c0_i32_0 = arith.constant 0 : i32
    %c0_i32_1 = arith.constant 0 : i32
    return %arg0, %c0_i32, %c0_i32_0 : i32, i32, i32
  }
  func.func @transform_1(%arg0: i32) -> (i32, i32, i32) {
    %c0_i32 = arith.constant 0 : i32
    %c0_i32_0 = arith.constant 0 : i32
    %c0_i32_1 = arith.constant 0 : i32
    %c0_i32_2 = arith.constant 0 : i32
    return %c0_i32, %c0_i32_0, %c0_i32_1 : i32, i32, i32
  }
  func.func @transform_2(%arg0: i32) -> (i32, i32) {
    %c0_i32 = arith.constant 0 : i32
    %c0_i32_0 = arith.constant 0 : i32
    %c0_i32_1 = arith.constant 0 : i32
    return %c0_i32, %c0_i32_0 : i32, i32
  }
  func.func @transform_3(%arg0: i32) -> (i32, i32, i32) {
    %c0_i32 = arith.constant 0 : i32
    %c0_i32_0 = arith.constant 0 : i32
    %c0_i32_1 = arith.constant 0 : i32
    %c0_i32_2 = arith.constant 0 : i32
    return %c0_i32, %c0_i32_0, %c0_i32_1 : i32, i32, i32
  }
  func.func @transform_4(%arg0: i32) -> (i32, i32) {
    %c0_i32 = arith.constant 0 : i32
    %c0_i32_0 = arith.constant 0 : i32
    %c0_i32_1 = arith.constant 0 : i32
    return %c0_i32, %c0_i32_0 : i32, i32
  }
  func.func @transform_5(%arg0: i32) -> (i32, i32, i32) {
    %c0_i32 = arith.constant 0 : i32
    %c0_i32_0 = arith.constant 0 : i32
    %c0_i32_1 = arith.constant 0 : i32
    %c0_i32_2 = arith.constant 0 : i32
    return %c0_i32, %c0_i32_0, %c0_i32_1 : i32, i32, i32
  }
  func.func @transform_6(%arg0: i32) -> (i32, i32) {
    %c0_i32 = arith.constant 0 : i32
    %c0_i32_0 = arith.constant 0 : i32
    %c0_i32_1 = arith.constant 0 : i32
    return %c0_i32, %c0_i32_0 : i32, i32
  }
  func.func @transform_7(%arg0: i32) -> (i32, i32, i32) {
    %c0_i32 = arith.constant 0 : i32
    %c0_i32_0 = arith.constant 0 : i32
    %c0_i32_1 = arith.constant 0 : i32
    %c0_i32_2 = arith.constant 0 : i32
    return %c0_i32, %c0_i32_0, %c0_i32_1 : i32, i32, i32
  }
  func.func @transform_8(%arg0: i32) -> (i32, i32) {
    %c0_i32 = arith.constant 0 : i32
    %c0_i32_0 = arith.constant 0 : i32
    %c0_i32_1 = arith.constant 0 : i32
    return %c0_i32, %c0_i32_0 : i32, i32
  }
  func.func @transform_9(%arg0: i32) -> (i32, i32) {
    %c0_i32 = arith.constant 0 : i32
    %c0_i32_0 = arith.constant 0 : i32
    %c0_i32_1 = arith.constant 0 : i32
    return %c0_i32, %c0_i32_0 : i32, i32
  }
  func.func @transform_10(%arg0: i32) -> (i32, i32) {
    %c0_i32 = arith.constant 0 : i32
    %c0_i32_0 = arith.constant 0 : i32
    %c0_i32_1 = arith.constant 0 : i32
    return %c0_i32, %c0_i32_0 : i32, i32
  }
  func.func @transform_11(%arg0: i32) -> (i32, i32) {
    %c0_i32 = arith.constant 0 : i32
    %c0_i32_0 = arith.constant 0 : i32
    %c0_i32_1 = arith.constant 0 : i32
    return %c0_i32, %c0_i32_0 : i32, i32
  }
  func.func @transform_12(%arg0: i32) -> (i32, i32) {
    %c0_i32 = arith.constant 0 : i32
    %c0_i32_0 = arith.constant 0 : i32
    %c0_i32_1 = arith.constant 0 : i32
    return %c0_i32, %c0_i32_0 : i32, i32
  }
  func.func @transform_13(%arg0: i32) -> (i32, i32) {
    %c0_i32 = arith.constant 0 : i32
    %c0_i32_0 = arith.constant 0 : i32
    %c0_i32_1 = arith.constant 0 : i32
    return %c0_i32, %c0_i32_0 : i32, i32
  }
  func.func @transform_14(%arg0: i32) -> (i32, i32, i32) {
    %c0_i32 = arith.constant 0 : i32
    %c0_i32_0 = arith.constant 0 : i32
    %c0_i32_1 = arith.constant 0 : i32
    return %arg0, %c0_i32, %c0_i32_0 : i32, i32, i32
  }
}

</mosaic_0001>

<bundles_post_ra>
// kernel: autoencoder_forward.1
= control target key start
LH: loop header
LB: loop body
LE: loop exit
PB: predicated region body
PF: predicated region fallthrough
CT: control target
= control target key end

     0   :  { %s8736_s29 = smov 0   ;;  %s10378_s0 = inlined_call_operand.vmem [shape: f32[2,3,256], index: 0, kind: input, shape index: {}]   ;;  %s10379_s1 = inlined_call_operand.vmem [shape: f32[9,16,3], index: 1, kind: input, shape index: {}]   ;;  %s10380_s2 = inlined_call_operand.vmem [shape: f32[16,1], index: 2, kind: input, shape index: {}]   ;;  %s10381_s3 = inlined_call_operand.vmem [shape: f32[9,32,16], index: 3, kind: input, shape index: {}]   ;;  %s10382_s4 = inlined_call_operand.vmem [shape: f32[32,1], index: 4, kind: input, shape index: {}]   ;;  %s10383_s5 = inlined_call_operand.vmem [shape: f32[9,16,32], index: 5, kind: input, shape index: {}]   ;;  %s10384_s6 = inlined_call_operand.vmem [shape: f32[16,1], index: 6, kind: input, shape index: {}]   ;;  %s10385_s7 = inlined_call_operand.vmem [shape: f32[9,3,16], index: 7, kind: input, shape index: {}]   ;;  %s10386_s8 = inlined_call_operand.vmem [shape: f32[3,1], index: 8, kind: input, shape index: {}]   ;;  %s10387_s9 = inlined_call_operand.vmem [shape: f32[256,324], index: 9, kind: input, shape index: {}]   ;;  %s10388_s10 = inlined_call_operand.vmem [shape: f32[324,100], index: 10, kind: input, shape index: {}]   ;;  %s10389_s11 = inlined_call_operand.vmem [shape: f32[100,36], index: 11, kind: input, shape index: {}]   ;;  %s10390_s12 = inlined_call_operand.vmem [shape: f32[36,100], index: 12, kind: input, shape index: {}]   ;;  %s10391_s13 = inlined_call_operand.vmem [shape: f32[100,324], index: 13, kind: input, shape index: {}]   ;;  %s10392_s14 = inlined_call_operand.vmem [shape: f32[2,3,324], index: 14, kind: output, shape index: {}]  }
   0x1 LB: > { %s6729_s30 = sadd.s32 4294967295, %s8641_s29   ;;  %p6733_p0 = scmp.ge.s32.totalorder %s8641_s29, 1  ;;  %s8641_s29 = sphi %s8736_s29, %s24_s29  }
   0x2   : > { %p412_p1 = scmp.lt.s32.totalorder %s8641_s29, 3 }
   0x4   : > { %p413_p2 = pnand %p6733_p0, %p412_p1 }
   0x5   : > { %v470_v0 = vld [vmem:[%s10387_s9 + $0x8] sm:$0xff] (!%p413_p2)  ;;  %v473_v1 = vld [vmem:[%s10387_s9 + $0x20] sm:$0xff] (!%p413_p2)  ;;  %v472_v4 = vld [vmem:[%s10387_s9 + $0x18] sm:$0xff] (!%p413_p2)  ;;  %p8860_p3 = scmp.lt.s32.totalorder (!%p413_p2), %s6729_s30, 1  ;;  %vm737_vm0 = vcmask (!%p413_p2), 23552   ;;  %s10401_s20 = smov (!%p413_p2), 19  }
   0x6   : > { %416 = sbr.rel (%p413_p2) target bundleno = 3323 (0xcfb), region = 76  ;;  %v469_v2 = vld [vmem:[%s10387_s9] sm:$0xff] (!%p413_p2)  ;;  %v7745_v3 = vpack.c.bf16 (!%p413_p2), %v473_v1, %v470_v0  ;;  %v476_v5 = vld [vmem:[%s10387_s9 + $0x38] sm:$0xff] (!%p413_p2)  ;;  %v479_v6 = vld [vmem:[%s10387_s9 + $0x50] sm:$0xff] (!%p413_p2)  ;;  %s10397_s22 = smov (!%p413_p2), 17   ;;  %vm730_vm1 = vcmask (!%p413_p2), 154624  }
   0x7   : > { %v7747_v7 = vpack.c.bf16 (!%p413_p2), %v472_v4, %v469_v2  ;;  %v7749_v8 = vpack.c.bf16 (!%p413_p2), %v479_v6, %v476_v5  ;;  %v475_v9 = vld [vmem:[%s10387_s9 + $0x30] sm:$0xff] (!%p413_p2)  ;;  %v478_v10 = vld [vmem:[%s10387_s9 + $0x48] sm:$0xff] (!%p413_p2)  ;;  %v485_v12 = vld [vmem:[%s10387_s9 + $0x80] sm:$0xff] (!%p413_p2)  ;;  %s10407_s23 = smov (!%p413_p2), 1   ;;  %s8648_s24 = smov (!%p413_p2), 127   ;;  %vm744_vm2 = vcmask (!%p413_p2), 1042432  }
   0x8   : > { %v482_v11 = vld [vmem:[%s10387_s9 + $0x68] sm:$0xff] (!%p413_p2)  ;;  %7746 = vmatprep.subr.bf16.mxu0 (!%p413_p2), %v7745_v3  ;;  %v7751_v13 = vpack.c.bf16 (!%p413_p2), %v478_v10, %v475_v9  ;;  %v481_v15 = vld [vmem:[%s10387_s9 + $0x60] sm:$0xff] (!%p413_p2)  ;;  %v484_v16 = vld [vmem:[%s10387_s9 + $0x78] sm:$0xff] (!%p413_p2)  ;;  %s10395_s25 = smov (!%p413_p2), 111   ;;  %s10403_s26 = smov (!%p413_p2), 110   ;;  %vm916_vm3 = vcmask (!%p413_p2), 146432  }
   0x9   : > { %7748 = vmatpush1.bf16.msra.mxu0 (!%p413_p2), %v7747_v7  ;;  %v7753_v14 = vpack.c.bf16 (!%p413_p2), %v485_v12, %v482_v11  ;;  %v488_v17 = vld [vmem:[%s10387_s9 + $0x98] sm:$0xff] (!%p413_p2)  ;;  %v491_v18 = vld [vmem:[%s10387_s9 + $0xb0] sm:$0xff] (!%p413_p2)  ;;  %v7755_v19 = vpack.c.bf16 (!%p413_p2), %v484_v16, %v481_v15  ;;  %v490_v22 = vld [vmem:[%s10387_s9 + $0xa8] sm:$0xff] (!%p413_p2)  ;;  %vm1101_vm4 = vcmask (!%p413_p2), 138240   ;;  %vm10417_vm5 = vcmask (!%p413_p2), 7168   ;;  %s8654_s19 = smov (!%p413_p2), 11  }
   0xa   : > { %7750 = vmatprep.subr.bf16.mxu0 (!%p413_p2), %v7749_v8  ;;  %v7757_v20 = vpack.c.bf16 (!%p413_p2), %v491_v18, %v488_v17  ;;  %v487_v21 = vld [vmem:[%s10387_s9 + $0x90] sm:$0xff] (!%p413_p2)  ;;  %v494_v23 = vld [vmem:[%s10387_s9 + $0xc8] sm:$0xff] (!%p413_p2)  ;;  %v497_v24 = vld [vmem:[%s10387_s9 + $0xe0] sm:$0xff] (!%p413_p2)  ;;  %vm10416_vm6 = vcmask (!%p413_p2), 1039360   ;;  %vm10414_vm7 = vcmask (!%p413_p2), 547840   ;;  %vm10415_vm8 = vcmask (!%p413_p2), 908288  }
   0xb   : > { %v7759_v25 = vpack.c.bf16 (!%p413_p2), %v490_v22, %v487_v21  ;;  %v519_v26 = vld [vmem:[%s10387_s9 + $0x190] sm:$0xff] (!%p413_p2)  ;;  %v522_v27 = vld [vmem:[%s10387_s9 + $0x1a8] sm:$0xff] (!%p413_p2)  ;;  %v7761_v29 = vpack.c.bf16 (!%p413_p2), %v497_v24, %v494_v23  ;;  %v493_v30 = vld [vmem:[%s10387_s9 + $0xc0] sm:$0xff] (!%p413_p2)  ;;  %vm10412_vm9 = vcmask (!%p413_p2), 416768   ;;  %vm10413_vm10 = vcmask (!%p413_p2), 900096   ;;  %s8655_s27 = smov (!%p413_p2), 9  }
   0xc   : > { %v471_v28 = vld [vmem:[%s10387_s9 + $0x10] sm:$0xff] (!%p413_p2)  ;;  %v496_v31 = vld [vmem:[%s10387_s9 + $0xd8] sm:$0xff] (!%p413_p2)  ;;  %v7809_v32 = vpack.c.bf16 (!%p413_p2), %v522_v27, %v519_v26  ;;  %v474_v33 = vld [vmem:[%s10387_s9 + $0x28] sm:$0xff] (!%p413_p2)  ;;  %vm10410_vm11 = vcmask (!%p413_p2), 408576   ;;  %vm10411_vm12 = vcmask (!%p413_p2), 891904   ;;  %vm10409_vm13 = vcmask (!%p413_p2), 400384  }
   0xd   : > { %7752 = vmatpush1.bf16.msra.mxu0 %v7751_v13  ;;  %v500_v34 = vld [vmem:[%s10387_s9 + $0xf8] sm:$0xff]  ;;  %v503_v35 = vld [vmem:[%s10387_s9 + $0x110] sm:$0xff]  ;;  %v7811_v36 = vpack.c.bf16 %v474_v33, %v471_v28  ;;  %v525_v37 = vld [vmem:[%s10387_s9 + $0x1c0] sm:$0xff]  ;;  %v7763_v41 = vpack.c.bf16 %v496_v31, %v493_v30  ;;  %s10477_s30 = smov (!%p8860_p3, %s6729_s30), 1  ;;  %vm2508_vm14 = vcmask 1043456   ;;  %vm2501_vm15 = vcmask 556032  }
   0xe   : > { %7754 = vmatprep.subr.bf16.mxu0 %v7753_v14  ;;  %7810 = vmatprep.subr.bf16.mxu1 %v7809_v32  ;;  %v528_v38 = vld [vmem:[%s10387_s9 + $0x1d8] sm:$0xff]  ;;  %v477_v39 = vld [vmem:[%s10387_s9 + $0x40] sm:$0xff]  ;;  %v499_v42 = vld [vmem:[%s10387_s9 + $0xf0] sm:$0xff]  ;;  %v7765_v46 = vpack.c.bf16 %v503_v35, %v500_v34  ;;  %s7062_s17 = sshll.u32 %s10477_s30, 3  ;;  %s10405_s28 = smov 119  }
   0xf   : > { %v480_v40 = vld [vmem:[%s10387_s9 + $0x58] sm:$0xff]  ;;  %v502_v43 = vld [vmem:[%s10387_s9 + $0x108] sm:$0xff]  ;;  %7812 = vmatpush3.bf16.msra.mxu1 %v7811_v36  ;;  %v7813_v44 = vpack.c.bf16 %v528_v38, %v525_v37  ;;  %v531_v48 = vld [vmem:[%s10387_s9 + $0x1f0] sm:$0xff]  ;;  %s462_s16 = scalar_lea.vmem %s10378_s0, %s7062_s17  ;;  %s10393_s17 = smov 109  }
  0x10   : > { %v7815_v45 = vpack.c.bf16 %v480_v40, %v477_v39  ;;  %v506_v47 = vld [vmem:[%s10387_s9 + $0x128] sm:$0xff]  ;;  %v509_v50 = vld [vmem:[%s10387_s9 + $0x140] sm:$0xff]  ;;  %v483_v52 = vld [vmem:[%s10387_s9 + $0x70] sm:$0xff]  ;;  %v7767_v54 = vpack.c.bf16 %v502_v43, %v499_v42  ;;  %s10418_s15 = smov 117   ;;  %s8658_s18 = smov 118  }
  0x11   : > { %7756 = vmatpush1.bf16.msra.mxu0 %v7755_v19  ;;  %v534_v49 = vld [vmem:[%s10387_s9 + $0x208] sm:$0xff]  ;;  %7814 = vmatprep.subr.bf16.mxu1 %v7813_v44  ;;  %v505_v55 = vld [vmem:[%s10387_s9 + $0x120] sm:$0xff]  ;;  %v540_v58 = vld [vmem:[%s10387_s9 + $0x238] sm:$0xff]  ;;  %v7769_v59 = vpack.c.bf16 %v509_v50, %v506_v47 }
  0x12   : > { %7758 = vmatprep.subr.bf16.mxu0 %v7757_v20  ;;  %v7817_v51 = vpack.c.bf16 %v534_v49, %v531_v48  ;;  %v486_v53 = vld [vmem:[%s10387_s9 + $0x88] sm:$0xff]  ;;  %v537_v57 = vld [vmem:[%s10387_s9 + $0x220] sm:$0xff]  ;;  %v508_v60 = vld [vmem:[%s10387_s9 + $0x138] sm:$0xff] }
  0x13   : > { %7816 = vmatpush3.bf16.msra.mxu1 %v7815_v45  ;;  %v7819_v56 = vpack.c.bf16 %v486_v53, %v483_v52  ;;  %v7821_v61 = vpack.c.bf16 %v540_v58, %v537_v57  ;;  %v489_v62 = vld [vmem:[%s10387_s9 + $0xa0] sm:$0xff]  ;;  %v492_v63 = vld [vmem:[%s10387_s9 + $0xb8] sm:$0xff]  ;;  %v515_v1 = vld [vmem:[%s10387_s9 + $0x170] sm:$0xff]  ;;  %v7771_v4 = vpack.c.bf16 %v508_v60, %v505_v55 }
  0x14   : > { %7818 = vmatprep.subr.bf16.mxu1 %v7817_v51  ;;  %v512_v0 = vld [vmem:[%s10387_s9 + $0x158] sm:$0xff]  ;;  %v543_v2 = vld [vmem:[%s10387_s9 + $0x250] sm:$0xff]  ;;  %v546_v3 = vld [vmem:[%s10387_s9 + $0x268] sm:$0xff]  ;;  %v7823_v7 = vpack.c.bf16 %v492_v63, %v489_v62 }
  0x15   : > { %7760 = vmatpush1.bf16.msra.mxu0 %v7759_v25  ;;  %v511_v5 = vld [vmem:[%s10387_s9 + $0x150] sm:$0xff]  ;;  %v514_v6 = vld [vmem:[%s10387_s9 + $0x168] sm:$0xff]  ;;  %v7773_v8 = vpack.c.bf16 %v515_v1, %v512_v0  ;;  %v7825_v10 = vpack.c.bf16 %v546_v3, %v543_v2  ;;  %v521_v13 = vld [vmem:[%s10387_s9 + $0x1a0] sm:$0xff] }
  0x16   : > { %7762 = vmatprep.subr.bf16.mxu0 %v7761_v29  ;;  %v518_v9 = vld [vmem:[%s10387_s9 + $0x188] sm:$0xff]  ;;  %v495_v11 = vld [vmem:[%s10387_s9 + $0xd0] sm:$0xff]  ;;  %v549_v14 = vld [vmem:[%s10387_s9 + $0x280] sm:$0xff]  ;;  %v7775_v16 = vpack.c.bf16 %v514_v6, %v511_v5 }
  0x17   : > { %7820 = vmatpush3.bf16.msra.mxu1 %v7819_v56  ;;  %v498_v12 = vld [vmem:[%s10387_s9 + $0xe8] sm:$0xff]  ;;  %v552_v15 = vld [vmem:[%s10387_s9 + $0x298] sm:$0xff]  ;;  %v517_v17 = vld [vmem:[%s10387_s9 + $0x180] sm:$0xff]  ;;  %v7777_v20 = vpack.c.bf16 %v521_v13, %v518_v9 }
  0x18   : > { %7822 = vmatprep.subr.bf16.mxu1 %v7821_v61  ;;  %v520_v18 = vld [vmem:[%s10387_s9 + $0x198] sm:$0xff]  ;;  %v7827_v19 = vpack.c.bf16 %v498_v12, %v495_v11  ;;  %v7829_v22 = vpack.c.bf16 %v552_v15, %v549_v14  ;;  %v501_v23 = vld [vmem:[%s10387_s9 + $0x100] sm:$0xff]  ;;  %v527_v25 = vld [vmem:[%s10387_s9 + $0x1d0] sm:$0xff] }
  0x19   : > { %7764 = vmatpush1.bf16.msra.mxu0 %v7763_v41  ;;  %v524_v21 = vld [vmem:[%s10387_s9 + $0x1b8] sm:$0xff]  ;;  %v555_v26 = vld [vmem:[%s10387_s9 + $0x2b0] sm:$0xff]  ;;  %v558_v27 = vld [vmem:[%s10387_s9 + $0x2c8] sm:$0xff]  ;;  %v7779_v28 = vpack.c.bf16 %v520_v18, %v517_v17 }
  0x1a   : > { %7766 = vmatprep.subr.bf16.mxu0 %v7765_v46  ;;  %v504_v24 = vld [vmem:[%s10387_s9 + $0x118] sm:$0xff]  ;;  %v523_v29 = vld [vmem:[%s10387_s9 + $0x1b0] sm:$0xff]  ;;  %v526_v30 = vld [vmem:[%s10387_s9 + $0x1c8] sm:$0xff]  ;;  %v7781_v33 = vpack.c.bf16 %v527_v25, %v524_v21  ;;  %v7833_v35 = vpack.c.bf16 %v558_v27, %v555_v26  ;;  %v8652_v27 = vmov 0  }
  0x1b   : > { %7824 = vmatpush3.bf16.msra.mxu1 %v7823_v7  ;;  %v7831_v31 = vpack.c.bf16 %v504_v24, %v501_v23  ;;  %v8958_v32 = vld [vmem:[%s462_s16] sm:$0x77]  ;;  %v530_v34 = vld [vmem:[%s10387_s9 + $0x1e8] sm:$0xff]  ;;  %v507_v36 = vld [vmem:[%s10387_s9 + $0x130] sm:$0xff]  ;;  %v7783_v42 = vpack.c.bf16 %v526_v30, %v523_v29  ;;  %s10399_s16 = smov 18   ;;  %8366 = vset.pattern.permute.xlu0 %v8652_v27 }
  0x1c   : > { %7826 = vmatprep.subr.bf16.mxu1 %v7825_v10  ;;  %v510_v37 = vld [vmem:[%s10387_s9 + $0x148] sm:$0xff]  ;;  %v566_v38 = vcombine.high %v8958_v32, %v8958_v32  ;;  %v533_v39 = vld [vmem:[%s10387_s9 + $0x200] sm:$0xff]  ;;  %v564_v41 = vld [vmem:[%s10387_s9 + $0x2f8] sm:$0xff]  ;;  %8367 = vset.pattern.permute.xlu1 %v8652_v27 }
  0x1d   : > { %7768 = vmatpush1.bf16.msra.mxu0 %v7767_v54  ;;  %v561_v40 = vld [vmem:[%s10387_s9 + $0x2e0] sm:$0xff]  ;;  %v7835_v44 = vpack.c.bf16 %v510_v37, %v507_v36  ;;  %v7785_v45 = vpack.c.bf16 %v533_v39, %v530_v34  ;;  %v532_v46 = vld [vmem:[%s10387_s9 + $0x1f8] sm:$0xff]  ;;  %v539_v51 = vld [vmem:[%s10387_s9 + $0x230] sm:$0xff] }
  0x1e   : > { %7770 = vmatprep.subr.bf16.mxu0 %v7769_v59  ;;  %632 = vmatprep.mubr.f32.mxu0 %v566_v38  ;;  %v529_v43 = vld [vmem:[%s10387_s9 + $0x1e0] sm:$0xff]  ;;  %v7837_v47 = vpack.c.bf16 %v564_v41, %v561_v40  ;;  %v516_v49 = vld [vmem:[%s10387_s9 + $0x178] sm:$0xff]  ;;  %v535_v55 = vld [vmem:[%s10387_s9 + $0x210] sm:$0xff] }
  0x1f   : > { %7828 = vmatpush3.bf16.msra.mxu1 %v7827_v19  ;;  %703 = vmatprep.mubr.f32.mxu1 %v566_v38  ;;  %v513_v48 = vld [vmem:[%s10387_s9 + $0x160] sm:$0xff]  ;;  %v536_v50 = vld [vmem:[%s10387_s9 + $0x218] sm:$0xff]  ;;  %v7787_v52 = vpack.c.bf16 %v532_v46, %v529_v43  ;;  %v538_v56 = vld [vmem:[%s10387_s9 + $0x228] sm:$0xff] }
  0x20   : > { %7830 = vmatprep.subr.bf16.mxu1 %v7829_v22  ;;  %v7839_v53 = vpack.c.bf16 %v516_v49, %v513_v48  ;;  %v7789_v54 = vpack.c.bf16 %v539_v51, %v536_v50  ;;  %v542_v57 = vld [vmem:[%s10387_s9 + $0x248] sm:$0xff]  ;;  %v545_v58 = vld [vmem:[%s10387_s9 + $0x260] sm:$0xff]  ;;  %v7791_v59 = vpack.c.bf16 %v538_v56, %v535_v55  ;;  %v544_v62 = vld [vmem:[%s10387_s9 + $0x258] sm:$0xff]  ;;  %v8643_v22 = vmov 0.0  }
  0x21   : > { %7772 = vmatpush1.bf16.msra.mxu0 %v7771_v4  ;;  %v7793_v60 = vpack.c.bf16 %v545_v58, %v542_v57  ;;  %v541_v61 = vld [vmem:[%s10387_s9 + $0x240] sm:$0xff]  ;;  %v548_v63 = vld [vmem:[%s10387_s9 + $0x278] sm:$0xff]  ;;  %v551_v0 = vld [vmem:[%s10387_s9 + $0x290] sm:$0xff] }
  0x22   : > { %7774 = vmatprep.subr.bf16.mxu0 %v7773_v8  ;;  %v7795_v1 = vpack.c.bf16 %v544_v62, %v541_v61  ;;  %v7797_v2 = vpack.c.bf16 %v551_v0, %v548_v63  ;;  %v547_v3 = vld [vmem:[%s10387_s9 + $0x270] sm:$0xff]  ;;  %v550_v4 = vld [vmem:[%s10387_s9 + $0x288] sm:$0xff]  ;;  %v557_v6 = vld [vmem:[%s10387_s9 + $0x2c0] sm:$0xff] }
  0x23   : > { %7832 = vmatpush3.bf16.msra.mxu1 %v7831_v31  ;;  %v554_v5 = vld [vmem:[%s10387_s9 + $0x2a8] sm:$0xff]  ;;  %v7799_v7 = vpack.c.bf16 %v550_v4, %v547_v3  ;;  %v553_v9 = vld [vmem:[%s10387_s9 + $0x2a0] sm:$0xff]  ;;  %v556_v10 = vld [vmem:[%s10387_s9 + $0x2b8] sm:$0xff] }
  0x24   : > { %7834 = vmatprep.subr.bf16.mxu1 %v7833_v35  ;;  %v7801_v8 = vpack.c.bf16 %v557_v6, %v554_v5  ;;  %v560_v11 = vld [vmem:[%s10387_s9 + $0x2d8] sm:$0xff]  ;;  %v563_v12 = vld [vmem:[%s10387_s9 + $0x2f0] sm:$0xff]  ;;  %v7803_v13 = vpack.c.bf16 %v556_v10, %v553_v9  ;;  %v9059_v21 = vld [vmem:[%s10379_s1] sm:$0xff] }
  0x25   : > { %7776 = vmatpush1.bf16.msra.mxu0 %v7775_v16  ;;  %v7805_v14 = vpack.c.bf16 %v563_v12, %v560_v11  ;;  %v559_v15 = vld [vmem:[%s10387_s9 + $0x2d0] sm:$0xff]  ;;  %v562_v16 = vld [vmem:[%s10387_s9 + $0x2e8] sm:$0xff]  ;;  %v709_v25 = vld [vmem:[%s10380_s2] sm:$0xff] }
  0x26   : > { %7778 = vmatprep.subr.bf16.mxu0 %v7777_v20  ;;  %v7807_v17 = vpack.c.bf16 %v562_v16, %v559_v15  ;;  %v710_v26 = vld [vmem:[%s10380_s2 + $0x8] sm:$0xff]  ;;  %v6744_v39 = vld [vmem:[%s10379_s1 + $0x10] sm:$0xff]  ;;  %v6745_v43 = vld [vmem:[%s10379_s1 + $0x18] sm:$0xff] }
  0x27   : > { %7836 = vmatpush3.bf16.msra.mxu1 %v7835_v44  ;;  %v6753_v48 = vld [vmem:[%s10379_s1 + $0x20] sm:$0xff]  ;;  %v6762_v58 = vld [vmem:[%s10379_s1 + $0x30] sm:$0xff]  ;;  %v6772_v4 = vld [vmem:[%s10379_s1 + $0x48] sm:$0xff] }
  0x28   : > { %7838 = vmatprep.subr.bf16.mxu1 %v7837_v47  ;;  %v6781_v10 = vld [vmem:[%s10379_s1 + $0x58] sm:$0xff] }
  0x29   : > { %7780 = vmatpush1.bf16.msra.mxu0 %v7779_v28 }
  0x2a   : > { %7782 = vmatprep.subr.bf16.mxu0 %v7781_v33  ;;  %v9129_v33 = vld [vmem:[%s10379_s1 + $0x8] sm:$0xff] }
  0x2b   : > { %7840 = vmatpush3.bf16.msra.mxu1 %v7839_v53 }
  0x2d   : > { %7784 = vmatpush1.bf16.msra.mxu0 %v7783_v42 }
  0x2e   : > { %7786 = vmatprep.subr.bf16.mxu0 %v7785_v45  ;;  %704 = vmatmul.mubr.f32.vlgmr.msra.gmra.mrb[0].mxu1 %v8958_v32 }
  0x2f   : > { %7352 = vmatprep.mubr.msk.f32.mxu1 %vm737_vm0, %v9059_v21 }
  0x31   : > { %7788 = vmatpush1.bf16.msra.mxu0 %v7787_v52  ;;  %v6754_v52 = vld [vmem:[%s10379_s1 + $0x28] sm:$0xff] }
  0x32   : > { %7790 = vmatprep.subr.bf16.mxu0 %v7789_v54 }
  0x35   : > { %7792 = vmatpush1.bf16.msra.mxu0 %v7791_v59 }
  0x36   : > { %7794 = vmatprep.subr.bf16.mxu0 %v7793_v60  ;;  %v6763_v60 = vld [vmem:[%s10379_s1 + $0x38] sm:$0xff] }
  0x39   : > { %7796 = vmatpush1.bf16.msra.mxu0 %v7795_v1  ;;  %v6771_v1 = vld [vmem:[%s10379_s1 + $0x40] sm:$0xff] }
  0x3a   : > { %7798 = vmatprep.subr.bf16.mxu0 %v7797_v2 }
  0x3d   : > { %7800 = vmatpush1.bf16.msra.mxu0 %v7799_v7  ;;  %v6780_v7 = vld [vmem:[%s10379_s1 + $0x50] sm:$0xff] }
  0x3e   : > { %7802 = vmatprep.subr.bf16.mxu0 %v7801_v8 }
  0x41   : > { %7804 = vmatpush1.bf16.msra.mxu0 %v7803_v13 }
  0x42   : > { %7806 = vmatprep.subr.bf16.mxu0 %v7805_v14  ;;  %v6789_v14 = vld [vmem:[%s10379_s1 + $0x60] sm:$0xff] }
  0x45   : > { %7808 = vmatpush1.bf16.msra.mxu0 %v7807_v17  ;;  %v6790_v17 = vld [vmem:[%s10379_s1 + $0x68] sm:$0xff] }
  0x48   : > { %633 = vmatmul.mubr.f32.vlgmr.msra.gmra.mrb[0].mxu0 %v8958_v32 }
  0x49   : > { %816 = vmatprep.mubr.f32.mxu0 %v8643_v22 }
 0x101   : > { %v7095_v18 = vpop.f32.mrb[0].mxu1 }
 0x102   : > { %v7096_v19 = vpop.f32.mrb[1].mxu1 }
 0x103   : > { %v9054_v20 = vadd.f32 %v7096_v19, %v7095_v18 }
 0x11b   : > { %v9064_v23 = vpop.f32.mrb[0].mxu0 }
 0x11c   : > { %910 = vrot.lane.b32.xlu1 %v9064_v23, %s10399_s16  ;;  %v9068_v24 = vpop.f32.mrb[1].mxu0 }
 0x11d   : > { %726 = vrot.lane.b32.xlu0 %v9068_v24, %s10401_s20 }
 0x120   : > { %912 = vrot.lane.b32.xlu1 %v9068_v24, %s10399_s16 }
 0x121   : > { %728 = vrot.lane.b32.xlu0 %v9054_v20, %s10401_s20 }
 0x124   : > { %1095 = vrot.lane.b32.xlu1 %v9064_v23, %s10397_s22 }
 0x125   : > { %914 = vrot.lane.b32.xlu0 %v9054_v20, %s10399_s16 }
 0x128   : > { %1099 = vrot.lane.b32.xlu1 %v9054_v20, %s10397_s22 }
 0x129   : > { %1097 = vrot.lane.b32.xlu0 %v9068_v24, %s10397_s22  ;;  %s10441_s22 = smov 18  }
 0x12c   : > { %1282 = vrot.lane.b32.xlu1 %v9068_v24, %s10407_s23 }
 0x12d   : > { %1280 = vrot.lane.b32.xlu0 %v9064_v23, %s10407_s23 }
 0x130   : > { %1640 = vrot.lane.b32.xlu1 %v9068_v24, %s8648_s24 }
 0x131   : > { %1284 = vrot.lane.b32.xlu0 %v9054_v20, %s10407_s23 }
 0x134   : > { %1638 = vrot.lane.b32.xlu1 %v9064_v23, %s8648_s24 }
 0x135   : > { %1642 = vrot.lane.b32.xlu0 %v9054_v20, %s8648_s24 }
 0x138   : > { %1828 = vrot.lane.b32.xlu1 %v9054_v20, %s10395_s25 }
 0x139   : > { %1826 = vrot.lane.b32.xlu0 %v9068_v24, %s10395_s25 }
 0x13c   : > { %2012 = vrot.lane.b32.xlu1 %v9068_v24, %s10403_s26 }
 0x13d   : > { %1824 = vrot.lane.b32.xlu0 %v9064_v23, %s10395_s25 }
 0x140   : > { %2010 = vrot.lane.b32.xlu1 %v9064_v23, %s10403_s26 }
 0x141   : > { %2014 = vrot.lane.b32.xlu0 %v9054_v20, %s10403_s26 }
 0x144   : > { %2200 = vrot.lane.b32.xlu1 %v9054_v20, %s10393_s17 }
 0x145   : > { %2198 = vrot.lane.b32.xlu0 %v9068_v24, %s10393_s17 }
 0x148   : > { %724 = vrot.lane.b32.xlu1 %v9064_v23, %s10401_s20  ;;  %s8653_s20 = smov 10  }
 0x149   : > { %2196 = vrot.lane.b32.xlu0 %v9064_v23, %s10393_s17  ;;  %s8339_s17 = smul.u32 12, %s10477_s30 }
 0x14c   : > { %718 = vperm.xlu1 %8367, %v710_v26  }
 0x14d   : > { %713 = vperm.xlu0 %8366, %v709_v25  }
 0x18e   : > { %v911_v28 = vpop.permute.xlu1 %910 }
 0x18f   : > { %v9122_v29 = vpop.permute.xlu0 %726  ;;  %v920_v36 = vsel %vm916_vm3, 0.0, %v911_v28 }
 0x192   : > { %v913_v30 = vpop.permute.xlu1 %912 }
 0x193   : > { %v729_v31 = vpop.permute.xlu0 %728  ;;  %v917_v34 = vsel %vm916_vm3, %v911_v28, %v913_v30  ;;  %v6807_v28 = vld [vmem:[%s10379_s1 + $0x80] sm:$0xff] }
 0x194   : > { %v732_v32 = vsel %vm730_vm1, %v9122_v29, %v729_v31 }
 0x195   : > { %7350 = vmatprep.subr.msk.mxu1 %vm744_vm2, %v732_v32 }
 0x196   : > { %v1096_v35 = vpop.permute.xlu1 %1095  ;;  %7351 = vmatpush3.msk.msra.mxu1 %vm744_vm2, %v732_v32 }
 0x197   : > { %7353 = vmatmul.mubr.msk.f32.vlgmr.msra.gmra.mrb[2].mxu1 %vm737_vm0, %v9129_v33  ;;  %6746 = vmatprep.subr.msk.mxu1 %vm744_vm2, %v917_v34  ;;  %v915_v37 = vpop.permute.xlu0 %914  ;;  %v1105_v46 = vsel %vm1101_vm4, 0.0, %v1096_v35 }
 0x198   : > { %v918_v38 = vsel %vm916_vm3, %v913_v30, %v915_v37  ;;  %6747 = vmatpush1.msk.msra.mxu1 %vm744_vm2, %v920_v36  ;;  %1001 = vmatprep.mubr.f32.mxu1 %v8643_v22 }
 0x199   : > { %7355 = vmatprep.subr.msk.mxu1 %vm744_vm2, %v918_v38 }
 0x19a   : > { %v1100_v40 = vpop.permute.xlu1 %1099 }
 0x19b   : > { %6748 = vmatmul.mubr.msk.f32.vlgmr.msra.gmra.mrb[4].mxu1 %vm737_vm0, %v6744_v39  ;;  %v1098_v41 = vpop.permute.xlu0 %1097 }
 0x19c   : > { %7356 = vmatpush3.msk.msra.mxu1 %vm744_vm2, %v918_v38  ;;  %v1102_v42 = vsel %vm1101_vm4, %v1096_v35, %v1098_v41  ;;  %1007 = vmatprep.mubr.f32.mxu1 %v8643_v22  ;;  %v1103_v47 = vsel %vm1101_vm4, %v1098_v41, %v1100_v40 }
 0x19d   : > { %6755 = vmatprep.subr.msk.mxu1 %vm744_vm2, %v1102_v42 }
 0x19e   : > { %v1283_v44 = vpop.permute.xlu1 %1282 }
 0x19f   : > { %6749 = vmatmul.mubr.msk.f32.gmra.mrb[6].mxu1 %vm737_vm0, %v6745_v43  ;;  %v1281_v49 = vpop.permute.xlu0 %1280 }
 0x1a0   : > { %7357 = vmatprep.mubr.msk.f32.mxu1 %vm737_vm0, %v6744_v39  ;;  %v1287_v51 = vsel %vm10417_vm5, %v1281_v49, %v1283_v44  ;;  %v1290_v56 = vsel %vm10417_vm5, 0.0, %v1281_v49 }
 0x1a2   : > { %v9155_v45 = vpop.permute.xlu1 %1640 }
 0x1a3   : > { %7358 = vmatmul.mubr.msk.f32.vlgmr.msra.gmra.mrb[2].mxu1 %vm737_vm0, %v6745_v43  ;;  %v1285_v54 = vpop.permute.xlu0 %1284 }
 0x1a4   : > { %6756 = vmatpush1.msk.msra.mxu1 %vm744_vm2, %v1105_v46  ;;  %1186 = vmatprep.mubr.f32.mxu1 %v8643_v22  ;;  %v1288_v57 = vsel %vm10417_vm5, %v1283_v44, %v1285_v54 }
 0x1a5   : > { %7360 = vmatprep.subr.msk.mxu1 %vm744_vm2, %v1103_v47 }
 0x1a6   : > { %v1639_v50 = vpop.permute.xlu1 %1638 }
 0x1a7   : > { %6757 = vmatmul.mubr.msk.f32.vlgmr.msra.gmra.mrb[4].mxu1 %vm737_vm0, %v6753_v48  ;;  %v1643_v2 = vpop.permute.xlu0 %1642  ;;  %v1645_v5 = vsel %vm10416_vm6, %v1639_v50, %v9155_v45 }
 0x1a8   : > { %7361 = vmatpush3.msk.msra.mxu1 %vm744_vm2, %v1103_v47  ;;  %1192 = vmatprep.mubr.f32.mxu1 %v8643_v22  ;;  %v1646_v3 = vsel %vm10416_vm6, %v9155_v45, %v1643_v2  ;;  %v1649_v6 = vsel %vm10414_vm7, %v1643_v2, 0.0 }
 0x1a9   : > { %6764 = vmatprep.subr.msk.mxu1 %vm744_vm2, %v1287_v51 }
 0x1aa   : > { %v9174_v53 = vpop.permute.xlu1 %1828 }
 0x1ab   : > { %6758 = vmatmul.mubr.msk.f32.gmra.mrb[6].mxu1 %vm737_vm0, %v6754_v52  ;;  %v1827_v8 = vpop.permute.xlu0 %1826  ;;  %v1835_v13 = vsel %vm10412_vm9, %v9174_v53, 0.0  ;;  %vm2924_vm9 = vcmask 72704  }
 0x1ac   : > { %7362 = vmatprep.mubr.msk.f32.mxu1 %vm737_vm0, %v6753_v48  ;;  %v1832_v9 = vsel %vm10415_vm8, %v1827_v8, %v9174_v53 }
 0x1ae   : > { %v9178_v55 = vpop.permute.xlu1 %2012 }
 0x1af   : > { %7363 = vmatmul.mubr.msk.f32.vlgmr.msra.gmra.mrb[2].mxu1 %vm737_vm0, %v6754_v52  ;;  %v1825_v11 = vpop.permute.xlu0 %1824 }
 0x1b0   : > { %6765 = vmatpush1.msk.msra.mxu1 %vm744_vm2, %v1290_v56  ;;  %1371 = vmatprep.mubr.f32.mxu1 %v8643_v22  ;;  %v1831_v12 = vsel %vm10415_vm8, %v1825_v11, %v1827_v8  ;;  %v2465_v11 = vld [vmem:[%s10388_s10 + $0x28] sm:$0xff] }
 0x1b1   : > { %7365 = vmatprep.subr.msk.mxu1 %vm744_vm2, %v1288_v57 }
 0x1b2   : > { %v9189_v59 = vpop.permute.xlu1 %2010 }
 0x1b3   : > { %6766 = vmatmul.mubr.msk.f32.vlgmr.msra.gmra.mrb[4].mxu1 %vm737_vm0, %v6762_v58  ;;  %v2015_v15 = vpop.permute.xlu0 %2014  ;;  %v2017_v18 = vsel %vm10413_vm10, %v9189_v59, %v9178_v55  ;;  %v2460_v59 = vld [vmem:[%s10388_s10] sm:$0xff] }
 0x1b4   : > { %7366 = vmatpush3.msk.msra.mxu1 %vm744_vm2, %v1288_v57  ;;  %1377 = vmatprep.mubr.f32.mxu1 %v8643_v22  ;;  %v2018_v16 = vsel %vm10413_vm10, %v9178_v55, %v2015_v15  ;;  %v2021_v19 = vsel %vm10410_vm11, %v2015_v15, 0.0  ;;  %v2476_v57 = vld [vmem:[%s10388_s10 + $0x80] sm:$0xff]  ;;  %v2482_v15 = vld [vmem:[%s10388_s10 + $0xb0] sm:$0xff] }
 0x1b5   : > { %6773 = vmatprep.subr.msk.mxu1 %vm744_vm2, %v9068_v24  ;;  %v6799_v24 = vld [vmem:[%s10379_s1 + $0x78] sm:$0xff] }
 0x1b6   : > { %v9199_v61 = vpop.permute.xlu1 %2200 }
 0x1b7   : > { %6767 = vmatmul.mubr.msk.f32.gmra.mrb[6].mxu1 %vm737_vm0, %v6763_v60  ;;  %v2207_v27 = vsel %vm10409_vm13, %v9199_v61, 0.0 }
 0x1b8   : > { %7367 = vmatprep.mubr.msk.f32.mxu1 %vm737_vm0, %v6762_v58  ;;  %v2477_v58 = vld [vmem:[%s10388_s10 + $0x88] sm:$0xff] }
 0x1ba   : > { %v725_v62 = vpop.permute.xlu1 %724 }
 0x1bb   : > { %v731_v63 = vsel %vm730_vm1, %v725_v62, %v9122_v29  ;;  %v734_v0 = vsel %vm730_vm1, 0.0, %v725_v62  ;;  %7368 = vmatmul.mubr.msk.f32.vlgmr.msra.gmra.mrb[2].mxu1 %vm737_vm0, %v6763_v60  ;;  %v6808_v29 = vld [vmem:[%s10379_s1 + $0x88] sm:$0xff]  ;;  %v7841_v60 = vpack.c.bf16 %v2477_v58, %v2476_v57  ;;  %v2478_v62 = vld [vmem:[%s10388_s10 + $0x90] sm:$0xff]  ;;  %v2499_v58 = vld [vmem:[%s10388_s10 + $0x138] sm:$0xff] }
 0x1bc   : > { %6774 = vmatpush1.msk.msra.mxu1 %vm744_vm2, %v9064_v23  ;;  %6737 = vmatprep.subr.msk.mxu0 %vm744_vm2, %v731_v63  ;;  %v2479_v63 = vld [vmem:[%s10388_s10 + $0x98] sm:$0xff] }
 0x1bd   : > { %7370 = vmatprep.subr.msk.mxu1 %vm744_vm2, %v9054_v20  ;;  %6738 = vmatpush1.msk.msra.mxu0 %vm744_vm2, %v734_v0 }
 0x1be   : > { %1544 = vmatprep.mubr.f32.mxu1 %v8643_v22  ;;  %6739 = vmatmul.mubr.msk.f32.vlgmr.msra.gmra.mrb[2].mxu0 %vm737_vm0, %v9059_v21  ;;  %v2199_v21 = vpop.permute.xlu0 %2198 }
 0x1bf   : > { %6775 = vmatmul.mubr.msk.f32.vlgmr.msra.gmra.mrb[4].mxu1 %vm737_vm0, %v6771_v1  ;;  %822 = vmatprep.mubr.f32.mxu0 %v8643_v22  ;;  %v2204_v23 = vsel %vm10411_vm12, %v2199_v21, %v9199_v61  ;;  %v2461_v61 = vld [vmem:[%s10388_s10 + $0x8] sm:$0xff] }
 0x1c0   : > { %7371 = vmatpush3.msk.msra.mxu1 %vm744_vm2, %v9054_v20  ;;  %1550 = vmatprep.mubr.f32.mxu1 %v8643_v22  ;;  %v6798_v20 = vld [vmem:[%s10379_s1 + $0x70] sm:$0xff]  ;;  %v7843_v2 = vpack.c.bf16 %v2461_v61, %v2460_v59  ;;  %v2491_v61 = vld [vmem:[%s10388_s10 + $0xf8] sm:$0xff] }
 0x1c1   : > { %6782 = vmatprep.subr.msk.mxu1 %vm744_vm2, %v1646_v3  ;;  %v7845_v3 = vpack.c.bf16 %v2479_v63, %v2478_v62 }
 0x1c2   : > { %6740 = vmatmul.mubr.msk.f32.gmra.mrb[4].mxu0 %vm737_vm0, %v9129_v33  ;;  %v2197_v25 = vpop.permute.xlu0 %2196 }
 0x1c3   : > { %6776 = vmatmul.mubr.msk.f32.gmra.mrb[6].mxu1 %vm737_vm0, %v6772_v4  ;;  %v2203_v26 = vsel %vm10411_vm12, %v2197_v25, %v2199_v21  ;;  %v2466_v21 = vld [vmem:[%s10388_s10 + $0x30] sm:$0xff]  ;;  %v2467_v25 = vld [vmem:[%s10388_s10 + $0x38] sm:$0xff] }
 0x1c4   : > { %7372 = vmatprep.mubr.msk.f32.mxu1 %vm737_vm0, %v6771_v1 }
 0x1c7   : > { %7373 = vmatmul.mubr.msk.f32.vlgmr.msra.gmra.mrb[2].mxu1 %vm737_vm0, %v6772_v4  ;;  %v2462_v4 = vld [vmem:[%s10388_s10 + $0x10] sm:$0xff] }
 0x1c8   : > { %6783 = vmatpush1.msk.msra.mxu1 %vm744_vm2, %v1645_v5  ;;  %1730 = vmatprep.mubr.f32.mxu1 %v8643_v22  ;;  %v2463_v5 = vld [vmem:[%s10388_s10 + $0x18] sm:$0xff] }
 0x1c9   : > { %7375 = vmatprep.subr.msk.mxu1 %vm744_vm2, %v1649_v6  ;;  %v7847_v8 = vpack.c.bf16 %v2463_v5, %v2462_v4 }
 0x1cb   : > { %6784 = vmatmul.mubr.msk.f32.vlgmr.msra.gmra.mrb[4].mxu1 %vm737_vm0, %v6780_v7  ;;  %v719_v37 = vpop.permute.xlu1 %718 }
 0x1cc   : > { %7376 = vmatpush3.msk.msra.mxu1 %vm744_vm2, %v1649_v6  ;;  %1736 = vmatprep.mubr.f32.mxu1 %v8643_v22  ;;  %v714_v34 = vpop.permute.xlu0 %713  ;;  %v2480_v6 = vld [vmem:[%s10388_s10 + $0xa0] sm:$0xff] }
 0x1cd   : > { %6791 = vmatprep.subr.msk.mxu1 %vm744_vm2, %v1832_v9  ;;  %v2464_v9 = vld [vmem:[%s10388_s10 + $0x20] sm:$0xff] }
 0x1cf   : > { %6785 = vmatmul.mubr.msk.f32.gmra.mrb[6].mxu1 %vm737_vm0, %v6781_v10 }
 0x1d0   : > { %7377 = vmatprep.mubr.msk.f32.mxu1 %vm737_vm0, %v6780_v7  ;;  %v2481_v7 = vld [vmem:[%s10388_s10 + $0xa8] sm:$0xff] }
 0x1d3   : > { %7378 = vmatmul.mubr.msk.f32.vlgmr.msra.gmra.mrb[2].mxu1 %vm737_vm0, %v6781_v10  ;;  %v7849_v10 = vpack.c.bf16 %v2481_v7, %v2480_v6  ;;  %v2500_v7 = vld [vmem:[%s10388_s10 + $0x140] sm:$0xf] }
 0x1d4   : > { %6792 = vmatpush1.msk.msra.mxu1 %vm744_vm2, %v1831_v12  ;;  %1916 = vmatprep.mubr.f32.mxu1 %v8643_v22  ;;  %v2492_v12 = vld [vmem:[%s10388_s10 + $0x100] sm:$0xff] }
 0x1d5   : > { %7380 = vmatprep.subr.msk.mxu1 %vm744_vm2, %v1835_v13 }
 0x1d7   : > { %6793 = vmatmul.mubr.msk.f32.vlgmr.msra.gmra.mrb[4].mxu1 %vm737_vm0, %v6789_v14 }
 0x1d8   : > { %7381 = vmatpush3.msk.msra.mxu1 %vm744_vm2, %v1835_v13  ;;  %1922 = vmatprep.mubr.f32.mxu1 %v8643_v22  ;;  %v2493_v13 = vld [vmem:[%s10388_s10 + $0x108] sm:$0xff] }
 0x1d9   : > { %6800 = vmatprep.subr.msk.mxu1 %vm744_vm2, %v2018_v16  ;;  %v2483_v16 = vld [vmem:[%s10388_s10 + $0xb8] sm:$0xff] }
 0x1db   : > { %6794 = vmatmul.mubr.msk.f32.gmra.mrb[6].mxu1 %vm737_vm0, %v6790_v17 }
 0x1dc   : > { %7382 = vmatprep.mubr.msk.f32.mxu1 %vm737_vm0, %v6789_v14 }
 0x1df   : > { %7383 = vmatmul.mubr.msk.f32.vlgmr.msra.gmra.mrb[2].mxu1 %vm737_vm0, %v6790_v17  ;;  %v7873_v17 = vpack.c.bf16 %v2493_v13, %v2492_v12 }
 0x1e0   : > { %6801 = vmatpush1.msk.msra.mxu1 %vm744_vm2, %v2017_v18  ;;  %2102 = vmatprep.mubr.f32.mxu1 %v8643_v22  ;;  %v2494_v18 = vld [vmem:[%s10388_s10 + $0x110] sm:$0xff] }
 0x1e1   : > { %7385 = vmatprep.subr.msk.mxu1 %vm744_vm2, %v2021_v19  ;;  %7874 = vmatprep.subr.bf16.mxu0 %v7873_v17 }
 0x1e2   : > { %7876 = vmatpush3.bf16.msra.mxu0 %v7873_v17 }
 0x1e3   : > { %6802 = vmatmul.mubr.msk.f32.vlgmr.msra.gmra.mrb[4].mxu1 %vm737_vm0, %v6798_v20 }
 0x1e4   : > { %7386 = vmatpush3.msk.msra.mxu1 %vm744_vm2, %v2021_v19  ;;  %2108 = vmatprep.mubr.f32.mxu1 %v8643_v22  ;;  %v2495_v19 = vld [vmem:[%s10388_s10 + $0x118] sm:$0xff] }
 0x1e5   : > { %6809 = vmatprep.subr.msk.mxu1 %vm744_vm2, %v2204_v23  ;;  %v7877_v23 = vpack.c.bf16 %v2495_v19, %v2494_v18 }
 0x1e7   : > { %6803 = vmatmul.mubr.msk.f32.gmra.mrb[6].mxu1 %vm737_vm0, %v6799_v24  ;;  %7878 = vmatprep.subr.bf16.mxu0 %v7877_v23 }
 0x1e8   : > { %7387 = vmatprep.mubr.msk.f32.mxu1 %vm737_vm0, %v6798_v20  ;;  %v7851_v20 = vpack.c.bf16 %v2465_v11, %v2464_v9  ;;  %7880 = vmatpush3.bf16.msra.mxu0 %v7877_v23 }
 0x1eb   : > { %7388 = vmatmul.mubr.msk.f32.vlgmr.msra.gmra.mrb[2].mxu1 %vm737_vm0, %v6799_v24  ;;  %v7853_v24 = vpack.c.bf16 %v2483_v16, %v2482_v15 }
 0x1ec   : > { %6810 = vmatpush1.msk.msra.mxu1 %vm744_vm2, %v2203_v26  ;;  %2288 = vmatprep.mubr.f32.mxu1 %v8643_v22  ;;  %v2496_v26 = vld [vmem:[%s10388_s10 + $0x120] sm:$0xff] }
 0x1ed   : > { %7390 = vmatprep.subr.msk.mxu1 %vm744_vm2, %v2207_v27 }
 0x1ef   : > { %6811 = vmatmul.mubr.msk.f32.vlgmr.msra.gmra.mrb[4].mxu1 %vm737_vm0, %v6807_v28 }
 0x1f0   : > { %7391 = vmatpush3.msk.msra.mxu1 %vm744_vm2, %v2207_v27  ;;  %2294 = vmatprep.mubr.f32.mxu1 %v8643_v22  ;;  %v2497_v27 = vld [vmem:[%s10388_s10 + $0x128] sm:$0xff]  ;;  %vm2694_vm2 = vcmask 89088  }
 0x1f1   : > { %7842 = vmatprep.subr.bf16.mxu1 %v7841_v60  ;;  %v2490_v60 = vld [vmem:[%s10388_s10 + $0xf0] sm:$0xff]  ;;  %vm6819_vm13 = vmneg %vm2694_vm2 }
 0x1f2   : > { %v7869_v63 = vpack.c.bf16 %v2491_v61, %v2490_v60  ;;  %v2662_v60 = vld [vmem:[%s10382_s4] sm:$0xff]  ;;  %v2665_v61 = vld [vmem:[%s10382_s4 + $0x18] sm:$0xff]  ;;  %vm9532_vm12 = vmpackc.low %vm6819_vm13, %vm6819_vm13 }
 0x1f3   : > { %6812 = vmatmul.mubr.msk.f32.gmra.mrb[6].mxu1 %vm737_vm0, %v6808_v29  ;;  %vm6843_vm2 = vmneg %vm2924_vm9 }
 0x1f4   : > { %7392 = vmatprep.mubr.msk.f32.mxu1 %vm737_vm0, %v6807_v28  ;;  %v2484_v28 = vld [vmem:[%s10388_s10 + $0xc0] sm:$0xff]  ;;  %vm6855_vm9 = vmneg %vm10417_vm5 }
 0x1f5   : > { %vm9577_vm13 = vmpackc.low %vm6855_vm9, %vm6855_vm9  ;;  %vm3374_vm9 = vcmask 744448  }
 0x1f7   : > { %7393 = vmatmul.mubr.msk.f32.vlgmr.msra.gmra.mrb[2].mxu1 %vm737_vm0, %v6808_v29  ;;  %v2485_v29 = vld [vmem:[%s10388_s10 + $0xc8] sm:$0xff]  ;;  %vm2701_vm0 = vcmask 130048  }
 0x1f8   : > { %7844 = vmatpush3.bf16.msra.mxu1 %v7843_v2  ;;  %v2474_v2 = vld [vmem:[%s10388_s10 + $0x70] sm:$0xff] }
 0x1f9   : > { %7846 = vmatprep.subr.bf16.mxu1 %v7845_v3  ;;  %v2475_v3 = vld [vmem:[%s10388_s10 + $0x78] sm:$0xff] }
 0x1fa   : > { %v7871_v6 = vpack.c.bf16 %v2475_v3, %v2474_v2 }
 0x1fc   : > { %7848 = vmatpush3.bf16.msra.mxu1 %v7847_v8 }
 0x1fd   : > { %7850 = vmatprep.subr.bf16.mxu1 %v7849_v10 }
 0x200   : > { %7852 = vmatpush3.bf16.msra.mxu1 %v7851_v20 }
 0x201   : > { %7854 = vmatprep.subr.bf16.mxu1 %v7853_v24 }
 0x291   : > { %v818_v30 = vpop.f32.mrb[2].mxu0 }
 0x292   : > { %v820_v31 = vpop.f32.mrb[3].mxu0  ;;  %v904_v35 = vadd.f32 %v818_v30, %v714_v34  ;;  %v7881_v30 = vpack.c.bf16 %v2497_v27, %v2496_v26 }
 0x293   : > { %v905_v36 = vadd.f32 %v820_v31, %v714_v34  ;;  %v7855_v31 = vpack.c.bf16 %v2467_v25, %v2466_v21 }
 0x294   : > { %7882 = vmatprep.subr.bf16.mxu0 %v7881_v30 }
 0x295   : > { %v824_v32 = vpop.f32.mrb[4].mxu0  ;;  %7856 = vmatpush3.bf16.msra.mxu1 %v7855_v31  ;;  %7884 = vmatpush3.bf16.msra.mxu0 %v7881_v30 }
 0x296   : > { %v826_v33 = vpop.f32.mrb[5].mxu0  ;;  %v907_v41 = vadd.f32 %v824_v32, %v719_v37  ;;  %v7857_v32 = vpack.c.bf16 %v2485_v29, %v2484_v28 }
 0x297   : > { %v908_v43 = vadd.f32 %v826_v33, %v719_v37  ;;  %v2468_v33 = vld [vmem:[%s10388_s10 + $0x40] sm:$0xff] }
 0x298   : > { %7858 = vmatprep.subr.bf16.mxu1 %v7857_v32 }
 0x2c2   : > { %v2290_v38 = vpop.f32.mrb[4].mxu1 }
 0x2c3   : > { %v9317_v39 = vadd.f32 %v2290_v38, %v904_v35  ;;  %v2292_v40 = vpop.f32.mrb[5].mxu1  ;;  %v2486_v35 = vld [vmem:[%s10388_s10 + $0xd0] sm:$0xff] }
 0x2c4   : > { %v9319_v42 = vadd.f32 %v2292_v40, %v905_v36  ;;  %v2487_v36 = vld [vmem:[%s10388_s10 + $0xd8] sm:$0xff]  ;;  %v2470_v40 = vld [vmem:[%s10388_s10 + $0x50] sm:$0xff] }
 0x2c5   : > { %v2382_v44 = vmax.f32 %v9317_v39, 0.0  ;;  %v7861_v38 = vpack.c.bf16 %v2487_v36, %v2486_v35 }
 0x2c6   : > { %v2383_v45 = vmax.f32 %v9319_v42, 0.0  ;;  %v2296_v46 = vpop.f32.mrb[6].mxu1 }
 0x2c7   : > { %v9323_v47 = vadd.f32 %v2296_v46, %v907_v41  ;;  %v2298_v48 = vpop.f32.mrb[7].mxu1  ;;  %v2471_v41 = vld [vmem:[%s10388_s10 + $0x58] sm:$0xff]  ;;  %v2488_v46 = vld [vmem:[%s10388_s10 + $0xe0] sm:$0xff] }
 0x2c8   : > { %v8368_v49 = vpack.i.bf16 %v2382_v44, %v2383_v45  ;;  %v9329_v50 = vadd.f32 %v2298_v48, %v908_v43  ;;  %v7863_v43 = vpack.c.bf16 %v2471_v41, %v2470_v40  ;;  %v2489_v48 = vld [vmem:[%s10388_s10 + $0xe8] sm:$0xff] }
 0x2c9   : > { %v2385_v51 = vmax.f32 %v9323_v47, 0.0 }
 0x2ca   : > { %v2386_v52 = vmax.f32 %v9329_v50, 0.0  ;;  %v7394_v53 = vpop.f32.mrb[2].mxu1  ;;  %8369 = vrot.lane.b32.xlu1 %v8368_v49, %s8648_s24  ;;  %v7865_v49 = vpack.c.bf16 %v2489_v48, %v2488_v46 }
 0x2cb   : > { %v2367_v54 = vpop.f32.mrb[3].mxu1  ;;  %v9358_v0 = vadd.f32 %v7394_v53, %v719_v37  ;;  %v2472_v53 = vld [vmem:[%s10388_s10 + $0x60] sm:$0xff] }
 0x2cc   : > { %v8373_v55 = vpack.i.bf16 %v2385_v51, %v2386_v52  ;;  %v9338_v56 = vadd.f32 %v2367_v54, %v714_v34  ;;  %v2469_v34 = vld [vmem:[%s10388_s10 + $0x48] sm:$0xff] }
 0x2cd   : > { %v2387_v14 = vmax.f32 %v9358_v0, 0.0  ;;  %v7859_v37 = vpack.c.bf16 %v2469_v34, %v2468_v33  ;;  %v2473_v54 = vld [vmem:[%s10388_s10 + $0x68] sm:$0xff] }
 0x2ce   : > { %v2384_v1 = vmax.f32 %v9338_v56, 0.0  ;;  %8374 = vrot.lane.b32.xlu1 %v8373_v55, %s8648_s24  ;;  %v2498_v55 = vld [vmem:[%s10388_s10 + $0x130] sm:$0xff]  ;;  %v7867_v57 = vpack.c.bf16 %v2473_v54, %v2472_v53  ;;  %v2697_v53 = vld [vmem:[%s10381_s3] sm:$0xff] }
 0x2cf   : > { %7860 = vmatpush3.bf16.msra.mxu1 %v7859_v37  ;;  %v7885_v59 = vpack.c.bf16 %v2499_v58, %v2498_v55 }
 0x2d0   : > { %2398 = vrot.lane.b32.xlu0 %v2384_v1, %s8648_s24  ;;  %7862 = vmatprep.subr.bf16.mxu1 %v7861_v38 }
 0x2d1   : > { %7886 = vmatprep.subr.bf16.mxu0 %v7885_v59 }
 0x2d2   : > { %7888 = vmatpush3.bf16.msra.mxu0 %v7885_v59  ;;  %v2663_v59 = vld [vmem:[%s10382_s4 + $0x8] sm:$0xff] }
 0x2d3   : > { %7864 = vmatpush3.bf16.msra.mxu1 %v7863_v43  ;;  %7411 = vmatprep.subr.msk.mxu0 %vm2508_vm14, %v2500_v7 }
 0x2d4   : > { %2404 = vrot.lane.b32.xlu0 %v2387_v14, %s8648_s24  ;;  %7866 = vmatprep.subr.bf16.mxu1 %v7865_v49 }
 0x2d6   : > { %7412 = vmatpush3.msk.msra.mxu0 %vm2508_vm14, %v2500_v7 }
 0x2d7   : > { %7868 = vmatpush3.bf16.msra.mxu1 %v7867_v57 }
 0x2d8   : > { %7870 = vmatprep.subr.bf16.mxu1 %v7869_v63 }
 0x2db   : > { %7872 = vmatpush3.bf16.msra.mxu1 %v7871_v6 }
 0x33c   : > { %v8370_v62 = vpop.permute.xlu1 %8369 }
 0x33d   : > { %v8372_v4 = vunpack.i.h.bf16 %v8370_v62  ;;  %v8371_v5 = vunpack.i.l.bf16 %v8370_v62  ;;  %v2664_v62 = vld [vmem:[%s10382_s4 + $0x10] sm:$0xff] }
 0x33f   : > { %v2406_v9 = vsel %vm10416_vm6, %v8372_v4, %v8371_v5 }
 0x340   : > { %v8375_v8 = vpop.permute.xlu1 %8374  ;;  %v2418_v18 = vmax.f32 %v2382_v44, %v2406_v9 }
 0x341   : > { %v8377_v10 = vunpack.i.h.bf16 %v8375_v8  ;;  %v8376_v11 = vunpack.i.l.bf16 %v8375_v8 }
 0x342   : > { %v2399_v12 = vpop.permute.xlu0 %2398 }
 0x343   : > { %v2407_v13 = vsel %vm10416_vm6, %v8371_v5, %v2399_v12  ;;  %v2416_v15 = vsel %vm10414_vm7, %v2399_v12, 0.0  ;;  %v2408_v19 = vsel %vm10416_vm6, %v8377_v10, %v8376_v11 }
 0x344   : > { %v2419_v16 = vmax.f32 %v2383_v45, %v2407_v13  ;;  %v2420_v17 = vmax.f32 %v2384_v1, %v2416_v15  ;;  %v2421_v39 = vmax.f32 %v2385_v51, %v2408_v19  ;;  %v2698_v15 = vld [vmem:[%s10381_s3 + $0x8] sm:$0xff] }
 0x346   : > { %2434 = vrot.lane.b32.xlu0 %v2420_v17, %s10403_s26  ;;  %v2405_v20 = vpop.permute.xlu0 %2404  ;;  %v8378_v21 = vpack.i.bf16 %v2418_v18, %v2419_v16 }
 0x347   : > { %v2409_v23 = vsel %vm10416_vm6, %v8376_v11, %v2405_v20  ;;  %v2417_v24 = vsel %vm10414_vm7, %v2405_v20, 0.0  ;;  %v2700_v20 = vld [vmem:[%s10381_s3 + $0x18] sm:$0xff]  ;;  %vm9645_vm7 = vmpackc.low %vm3374_vm9, %vm3374_vm9  ;;  %vm3489_vm9 = vcmask 736256   ;;  %vm3604_vm6 = vcmask 728064  }
 0x348   : > { %v2422_v42 = vmax.f32 %v2386_v52, %v2409_v23  ;;  %v2423_v45 = vmax.f32 %v2387_v14, %v2417_v24  ;;  %8379 = vrot.lane.b32.xlu1 %v8378_v21, %s10403_s26  ;;  %v6827_v21 = vld [vmem:[%s10381_s3 + $0x20] sm:$0xff]  ;;  %vm9671_vm8 = vmpackc.low %vm3489_vm9, %vm3489_vm9 }
 0x349   : > { %vm9695_vm5 = vmpackc.low %vm3604_vm6, %vm3604_vm6  ;;  %vm3778_vm6 = vcmask 818176  }
 0x34a   : > { %2440 = vrot.lane.b32.xlu0 %v2423_v45, %s10403_s26  ;;  %v8383_v44 = vpack.i.bf16 %v2421_v39, %v2422_v42 }
 0x34c   : > { %8384 = vrot.lane.b32.xlu1 %v8383_v44, %s10403_s26  ;;  %s10445_s26 = smov 109  }
 0x3b8   : > { %v2435_v56 = vpop.permute.xlu0 %2434 }
 0x3b9   : > { %v2452_v1 = vsel %vm10410_vm11, %v2435_v56, 0.0 }
 0x3ba   : > { %v2456_v25 = vmax.f32 %v2420_v17, %v2452_v1  ;;  %v8380_v50 = vpop.permute.xlu1 %8379  ;;  %v6839_v1 = vld [vmem:[%s10381_s3 + $0x40] sm:$0xff] }
 0x3bb   : > { %v8382_v52 = vunpack.i.h.bf16 %v8380_v50  ;;  %v8381_v26 = vunpack.i.l.bf16 %v8380_v50  ;;  %v6841_v50 = vld [vmem:[%s10381_s3 + $0x50] sm:$0xff] }
 0x3bc   : > { %7413 = vmatprep.mubr.msk.f32.mxu0 %vm2501_vm15, %v2456_v25  ;;  %v2441_v0 = vpop.permute.xlu0 %2440  ;;  %v6840_v25 = vld [vmem:[%s10381_s3 + $0x48] sm:$0xff] }
 0x3bd   : > { %v2442_v14 = vsel %vm10413_vm10, %v8382_v52, %v8381_v26  ;;  %v2453_v47 = vsel %vm10410_vm11, %v2441_v0, 0.0  ;;  %v2443_v51 = vsel %vm10413_vm10, %v8381_v26, %v2435_v56  ;;  %v6830_v56 = vld [vmem:[%s10381_s3 + $0x38] sm:$0xff] }
 0x3be   : > { %v2454_v27 = vmax.f32 %v2418_v18, %v2442_v14  ;;  %v2459_v28 = vmax.f32 %v2423_v45, %v2453_v47  ;;  %v8385_v29 = vpop.permute.xlu1 %8384  ;;  %v2455_v30 = vmax.f32 %v2419_v16, %v2443_v51  ;;  %v2699_v16 = vld [vmem:[%s10381_s3 + $0x10] sm:$0xff]  ;;  %v6842_v26 = vld [vmem:[%s10381_s3 + $0x58] sm:$0xff]  ;;  %v6852_v51 = vld [vmem:[%s10381_s3 + $0x68] sm:$0xff] }
 0x3bf   : > { %v8387_v31 = vunpack.i.h.bf16 %v8385_v29  ;;  %v8386_v32 = vunpack.i.l.bf16 %v8385_v29  ;;  %v6829_v45 = vld [vmem:[%s10381_s3 + $0x30] sm:$0xff] }
 0x3c0   : > { %2576 = vmatprep.mubr.f32.mxu1 %v2455_v30  ;;  %7414 = vmatmul.mubr.msk.f32.vlgmr.msra.gmra.mrb[6].mxu0 %vm2501_vm15, %v2459_v28  ;;  %vm2809_vm15 = vcmask 80896  }
 0x3c1   : > { %2577 = vmatmul.mubr.f32.vlgmr.msra.gmra.mrb[8].mxu1 %v2454_v27  ;;  %v2445_v33 = vsel %vm10413_vm10, %v8386_v32, %v2441_v0  ;;  %v2444_v34 = vsel %vm10413_vm10, %v8387_v31, %v8386_v32  ;;  %7420 = vmatprep.mubr.msk.f32.mxu0 %vm2701_vm0, %v2697_v53  ;;  %vm6831_vm11 = vmneg %vm2809_vm15  ;;  %v6851_v0 = vld [vmem:[%s10381_s3 + $0x60] sm:$0xff]  ;;  %vm3259_vm15 = vcmask 809984   ;;  %v6853_v27 = vld [vmem:[%s10381_s3 + $0x70] sm:$0xff] }
 0x3c2   : > { %v2458_v35 = vmax.f32 %v2422_v42, %v2445_v33  ;;  %v2457_v36 = vmax.f32 %v2421_v39, %v2444_v34  ;;  %vm9536_vm10 = vmpackc.low %vm6831_vm11, %vm6831_vm11  ;;  %v6828_v42 = vld [vmem:[%s10381_s3 + $0x28] sm:$0xff]  ;;  %v6854_v31 = vld [vmem:[%s10381_s3 + $0x78] sm:$0xff] }
 0x3c3   : > { %vm9552_vm11 = vmpackc.low %vm6843_vm2, %vm6843_vm2  ;;  %v6863_v32 = vld [vmem:[%s10381_s3 + $0x80] sm:$0xff]  ;;  %v6873_v53 = vld [vmem:[%s10381_s3 + $0xb0] sm:$0xff] }
 0x3c4   : > { %2581 = vmatprep.mubr.f32.mxu1 %v2458_v35  ;;  %vm9622_vm2 = vmpackc.low %vm3259_vm15, %vm3259_vm15  ;;  %v6864_v35 = vld [vmem:[%s10381_s3 + $0x88] sm:$0xff] }
 0x3c5   : > { %2582 = vmatmul.mubr.f32.gmra.mrb[10].mxu1 %v2457_v36  ;;  %v6865_v36 = vld [vmem:[%s10381_s3 + $0x90] sm:$0xff] }
 0x493   : > { %v7415_v37 = vpop.f32.mrb[6].mxu0 }
 0x494   : > { %v7157_v38 = vpop.f32.mrb[8].mxu1  ;;  %v2653_v40 = vpop.f32.mrb[7].mxu0 }
 0x495   : > { %v7158_v41 = vpop.f32.mrb[9].mxu1 }
 0x496   : > { %v7159_v43 = vadd.f32 %v7158_v41, %v7157_v38  ;;  %v6866_v41 = vld [vmem:[%s10381_s3 + $0x98] sm:$0xff] }
 0x498   : > { %v2654_v46 = vadd.f32 %v7159_v43, %v2653_v40  ;;  %v7160_v48 = vpop.f32.mrb[10].mxu1  ;;  %v6871_v43 = vld [vmem:[%s10381_s3 + $0xa0] sm:$0xff] }
 0x499   : > { %v7161_v49 = vpop.f32.mrb[11].mxu1 }
 0x49a   : > { %v7162_v54 = vadd.f32 %v7161_v49, %v7160_v48  ;;  %v6872_v49 = vld [vmem:[%s10381_s3 + $0xa8] sm:$0xff] }
 0x49c   : > { %v2659_v55 = vadd.f32 %v7415_v37, %v7162_v54  ;;  %v6996_v54 = vld [vmem:[%s10383_s5 + $0x88] sm:$0xff] }
 0x49e   : > { %v8393_v57 = vpack.i.bf16 %v2659_v55, %v2654_v46  ;;  %v9512_v58 = vpack.c.bf16 %v2659_v55, %v2654_v46 }
 0x4a0   : > { %8394 = vrot.lane.b32.xlu0 %v8393_v57, %s8653_s20  ;;  %8389 = vrot.lane.b32.xlu1 %v8393_v57, %s8654_s19 }
 0x4a4   : > { %8404 = vrot.lane.b32.xlu0 %v8393_v57, %s10407_s23  ;;  %8399 = vrot.lane.b32.xlu1 %v8393_v57, %s8655_s27  ;;  %s10437_s23 = smov 1  }
 0x4a8   : > { %8414 = vrot.lane.b32.xlu0 %v8393_v57, %s10405_s28  ;;  %8409 = vrot.lane.b32.xlu1 %v8393_v57, %s8648_s24 }
 0x4ac   : > { %8424 = vrot.lane.b32.xlu0 %v8393_v57, %s10418_s15  ;;  %8419 = vrot.lane.b32.xlu1 %v8393_v57, %s8658_s18  ;;  %s10438_s15 = smov 119  }
 0x4b0   : > { %2673 = vperm.xlu0 %8366, %v2663_v59   ;;  %2668 = vperm.xlu1 %8367, %v2662_v60   ;;  %v6881_v59 = vld [vmem:[%s10381_s3 + $0xc0] sm:$0xff] }
 0x4b4   : > { %2683 = vperm.xlu0 %8366, %v2665_v61   ;;  %2678 = vperm.xlu1 %8367, %v2664_v62   ;;  %v6882_v62 = vld [vmem:[%s10381_s3 + $0xc8] sm:$0xff] }
 0x512   : > { %v8395_v63 = vpop.permute.xlu0 %8394  ;;  %v8390_v2 = vpop.permute.xlu1 %8389 }
 0x513   : > { %v8397_v3 = vunpack.i.h.bf16 %v8395_v63  ;;  %v8396_v4 = vunpack.i.l.bf16 %v8395_v63  ;;  %v8392_v5 = vunpack.i.h.bf16 %v8390_v2  ;;  %v8391_v6 = vunpack.i.l.bf16 %v8390_v2  ;;  %v6883_v63 = vld [vmem:[%s10381_s3 + $0xd0] sm:$0xff]  ;;  %v4942_v2 = vld [vmem:[%s10391_s13 + $0x128] sm:$0xf] }
 0x515   : > { %v7889_v8 = vpack.c.bf16 %v8392_v5, %v8391_v6  ;;  %v7895_v11 = vpack.c.bf16 %v8397_v3, %v8396_v4  ;;  %v6884_v4 = vld [vmem:[%s10381_s3 + $0xd8] sm:$0xff]  ;;  %v6891_v5 = vld [vmem:[%s10381_s3 + $0xe0] sm:$0xff]  ;;  %v6892_v6 = vld [vmem:[%s10381_s3 + $0xe8] sm:$0xff] }
 0x516   : > { %v8400_v9 = vpop.permute.xlu1 %8399  ;;  %v8405_v19 = vpop.permute.xlu0 %8404 }
 0x517   : > { %v8402_v12 = vunpack.i.h.bf16 %v8400_v9  ;;  %v8401_v13 = vunpack.i.l.bf16 %v8400_v9  ;;  %7891 = vmatprep.subr.msk.bf16.mxu0 %vm9532_vm12, %v7889_v8  ;;  %v8407_v23 = vunpack.i.h.bf16 %v8405_v19  ;;  %v8406_v24 = vunpack.i.l.bf16 %v8405_v19  ;;  %v6894_v9 = vld [vmem:[%s10381_s3 + $0xf8] sm:$0xff] }
 0x518   : > { %7894 = vmatpush3.bf16.msk.msra.mxu0 %vm9532_vm12, %v7889_v8  ;;  %v6893_v8 = vld [vmem:[%s10381_s3 + $0xf0] sm:$0xff] }
 0x519   : > { %7897 = vmatprep.subr.msk.bf16.mxu0 %vm9536_vm10, %v7895_v11  ;;  %v7901_v18 = vpack.c.bf16 %v8402_v12, %v8401_v13  ;;  %v7907_v44 = vpack.c.bf16 %v8407_v23, %v8406_v24  ;;  %v6902_v12 = vld [vmem:[%s10381_s3 + $0x108] sm:$0xff]  ;;  %v6903_v13 = vld [vmem:[%s10381_s3 + $0x110] sm:$0xff] }
 0x51a   : > { %v8410_v52 = vpop.permute.xlu1 %8409  ;;  %v8415_v30 = vpop.permute.xlu0 %8414  ;;  %v3767_v23 = vld [vmem:[%s10389_s11 + $0x10] sm:$0xff] }
 0x51b   : > { %7421 = vmatmul.mubr.msk.f32.vlgmr.msra.gmra.mrb[8].mxu0 %vm2701_vm0, %v2698_v15  ;;  %v8412_v14 = vunpack.i.h.bf16 %v8410_v52  ;;  %v8411_v47 = vunpack.i.l.bf16 %v8410_v52  ;;  %v8417_v33 = vunpack.i.h.bf16 %v8415_v30  ;;  %v8416_v34 = vunpack.i.l.bf16 %v8415_v30  ;;  %v6904_v15 = vld [vmem:[%s10381_s3 + $0x118] sm:$0xff] }
 0x51c   : > { %7900 = vmatpush3.bf16.msk.msra.mxu0 %vm9536_vm10, %v7895_v11  ;;  %7423 = vmatprep.mubr.msk.f32.mxu0 %vm2701_vm0, %v2699_v16  ;;  %v6901_v11 = vld [vmem:[%s10381_s3 + $0x100] sm:$0xff] }
 0x51d   : > { %7903 = vmatprep.subr.msk.bf16.mxu0 %vm9552_vm11, %v7901_v18  ;;  %v7917_v29 = vpack.c.bf16 %v8412_v14, %v8411_v47  ;;  %v7923_v38 = vpack.c.bf16 %v8417_v33, %v8416_v34 }
 0x51e   : > { %v8420_v40 = vpop.permute.xlu1 %8419  ;;  %v8425_v57 = vpop.permute.xlu0 %8424 }
 0x51f   : > { %7424 = vmatmul.mubr.msk.f32.gmra.mrb[10].mxu0 %vm2701_vm0, %v2700_v20  ;;  %v8422_v46 = vunpack.i.h.bf16 %v8420_v40  ;;  %v8421_v48 = vunpack.i.l.bf16 %v8420_v40  ;;  %v8427_v60 = vunpack.i.h.bf16 %v8425_v57  ;;  %v8426_v61 = vunpack.i.l.bf16 %v8425_v57  ;;  %v3765_v20 = vld [vmem:[%s10389_s11] sm:$0xff] }
 0x520   : > { %7430 = vmatprep.mubr.msk.f32.mxu0 %vm2701_vm0, %v6827_v21  ;;  %v3766_v21 = vld [vmem:[%s10389_s11 + $0x8] sm:$0xff] }
 0x521   : > { %v7929_v55 = vpack.c.bf16 %v8422_v46, %v8421_v48  ;;  %v7935_v3 = vpack.c.bf16 %v8427_v60, %v8426_v61  ;;  %v3777_v48 = vld [vmem:[%s10389_s11 + $0x60] sm:$0xf] }
 0x523   : > { %7431 = vmatmul.mubr.msk.f32.vlgmr.msra.gmra.mrb[8].mxu0 %vm2701_vm0, %v6828_v42 }
 0x524   : > { %7906 = vmatpush3.bf16.msk.msra.mxu0 %vm9552_vm11, %v7901_v18  ;;  %7433 = vmatprep.mubr.msk.f32.mxu0 %vm2701_vm0, %v6829_v45  ;;  %v7941_v45 = vpack.c.bf16 %v3766_v21, %v3765_v20 }
 0x525   : > { %7909 = vmatprep.subr.msk.bf16.mxu0 %vm9577_vm13, %v7907_v44 }
 0x526   : > { %7942 = vmatprep.subr.bf16.mxu1 %v7941_v45 }
 0x527   : > { %7434 = vmatmul.mubr.msk.f32.gmra.mrb[10].mxu0 %vm2701_vm0, %v6830_v56  ;;  %7944 = vmatpush3.bf16.msra.mxu1 %v7941_v45 }
 0x528   : > { %7440 = vmatprep.mubr.msk.f32.mxu0 %vm2701_vm0, %v6839_v1 }
 0x52b   : > { %7441 = vmatmul.mubr.msk.f32.vlgmr.msra.gmra.mrb[8].mxu0 %vm2701_vm0, %v6840_v25  ;;  %v3769_v25 = vld [vmem:[%s10389_s11 + $0x20] sm:$0xff] }
 0x52c   : > { %7912 = vmatpush3.bf16.msk.msra.mxu0 %vm9577_vm13, %v7907_v44  ;;  %7443 = vmatprep.mubr.msk.f32.mxu0 %vm2701_vm0, %v6841_v50  ;;  %v3768_v44 = vld [vmem:[%s10389_s11 + $0x18] sm:$0xff]  ;;  %v3770_v50 = vld [vmem:[%s10389_s11 + $0x28] sm:$0xff] }
 0x52d   : > { %7914 = vmatprep.subr.bf16.mxu0 %v9512_v58  ;;  %v7945_v1 = vpack.c.bf16 %v3768_v44, %v3767_v23 }
 0x52f   : > { %7444 = vmatmul.mubr.msk.f32.gmra.mrb[10].mxu0 %vm2701_vm0, %v6842_v26  ;;  %v2674_v16 = vpop.permute.xlu0 %2673  ;;  %v2669_v18 = vpop.permute.xlu1 %2668  ;;  %7946 = vmatprep.subr.bf16.mxu1 %v7945_v1 }
 0x530   : > { %7450 = vmatprep.mubr.msk.f32.mxu0 %vm2701_vm0, %v6851_v0  ;;  %7948 = vmatpush3.bf16.msra.mxu1 %v7945_v1 }
 0x533   : > { %7451 = vmatmul.mubr.msk.f32.vlgmr.msra.gmra.mrb[8].mxu0 %vm2701_vm0, %v6852_v51  ;;  %v2684_v26 = vpop.permute.xlu0 %2683  ;;  %v2679_v47 = vpop.permute.xlu1 %2678 }
 0x534   : > { %7916 = vmatpush3.bf16.msra.mxu0 %v9512_v58  ;;  %7453 = vmatprep.mubr.msk.f32.mxu0 %vm2701_vm0, %v6853_v27  ;;  %v6874_v58 = vld [vmem:[%s10381_s3 + $0xb8] sm:$0xff] }
 0x535   : > { %7919 = vmatprep.subr.msk.bf16.mxu0 %vm9622_vm2, %v7917_v29 }
 0x537   : > { %7454 = vmatmul.mubr.msk.f32.gmra.mrb[10].mxu0 %vm2701_vm0, %v6854_v31  ;;  %v3771_v31 = vld [vmem:[%s10389_s11 + $0x30] sm:$0xff] }
 0x538   : > { %7460 = vmatprep.mubr.msk.f32.mxu0 %vm2701_vm0, %v6863_v32  ;;  %v3772_v32 = vld [vmem:[%s10389_s11 + $0x38] sm:$0xff] }
 0x53b   : > { %7461 = vmatmul.mubr.msk.f32.vlgmr.msra.gmra.mrb[8].mxu0 %vm2701_vm0, %v6864_v35  ;;  %v7953_v35 = vpack.c.bf16 %v3772_v32, %v3771_v31  ;;  %v3985_v32 = vld [vmem:[%s10384_s6] sm:$0xff] }
 0x53c   : > { %7922 = vmatpush3.bf16.msk.msra.mxu0 %vm9622_vm2, %v7917_v29  ;;  %7463 = vmatprep.mubr.msk.f32.mxu0 %vm2701_vm0, %v6865_v36  ;;  %v7949_v29 = vpack.c.bf16 %v3770_v50, %v3769_v25  ;;  %v3773_v36 = vld [vmem:[%s10389_s11 + $0x40] sm:$0xff] }
 0x53d   : > { %7925 = vmatprep.subr.msk.bf16.mxu0 %vm9645_vm7, %v7923_v38 }
 0x53e   : > { %7950 = vmatprep.subr.bf16.mxu1 %v7949_v29 }
 0x53f   : > { %7464 = vmatmul.mubr.msk.f32.gmra.mrb[10].mxu0 %vm2701_vm0, %v6866_v41  ;;  %7952 = vmatpush3.bf16.msra.mxu1 %v7949_v29  ;;  %v3775_v41 = vld [vmem:[%s10389_s11 + $0x50] sm:$0xff] }
 0x540   : > { %7470 = vmatprep.mubr.msk.f32.mxu0 %vm2701_vm0, %v6871_v43  ;;  %7954 = vmatprep.subr.bf16.mxu1 %v7953_v35  ;;  %v3776_v43 = vld [vmem:[%s10389_s11 + $0x58] sm:$0xff] }
 0x541   : > { %v7961_v46 = vpack.c.bf16 %v3776_v43, %v3775_v41  ;;  %v4912_v41 = vld [vmem:[%s10391_s13 + $0x38] sm:$0xff]  ;;  %v4915_v43 = vld [vmem:[%s10391_s13 + $0x50] sm:$0xff] }
 0x543   : > { %7471 = vmatmul.mubr.msk.f32.vlgmr.msra.gmra.mrb[8].mxu0 %vm2701_vm0, %v6872_v49  ;;  %7956 = vmatpush3.bf16.msra.mxu1 %v7953_v35  ;;  %v4909_v35 = vld [vmem:[%s10391_s13 + $0x20] sm:$0xff] }
 0x544   : > { %7928 = vmatpush3.bf16.msk.msra.mxu0 %vm9645_vm7, %v7923_v38  ;;  %7473 = vmatprep.mubr.msk.f32.mxu0 %vm2701_vm0, %v6873_v53  ;;  %v3774_v38 = vld [vmem:[%s10389_s11 + $0x48] sm:$0xff]  ;;  %v3879_v53 = vld [vmem:[%s10390_s12] sm:$0xff] }
 0x545   : > { %7931 = vmatprep.subr.msk.bf16.mxu0 %vm9671_vm8, %v7929_v55  ;;  %v7957_v40 = vpack.c.bf16 %v3774_v38, %v3773_v36  ;;  %v4905_v36 = vld [vmem:[%s10391_s13] sm:$0xff] }
 0x547   : > { %7474 = vmatmul.mubr.msk.f32.gmra.mrb[10].mxu0 %vm2701_vm0, %v6874_v58  ;;  %7958 = vmatprep.subr.bf16.mxu1 %v7957_v40 }
 0x548   : > { %7480 = vmatprep.mubr.msk.f32.mxu0 %vm2701_vm0, %v6881_v59  ;;  %7960 = vmatpush3.bf16.msra.mxu1 %v7957_v40  ;;  %v4908_v40 = vld [vmem:[%s10391_s13 + $0x18] sm:$0xff] }
 0x549   : > { %7962 = vmatprep.subr.bf16.mxu1 %v7961_v46 }
 0x54b   : > { %7481 = vmatmul.mubr.msk.f32.vlgmr.msra.gmra.mrb[8].mxu0 %vm2701_vm0, %v6882_v62 }
 0x54c   : > { %7934 = vmatpush3.bf16.msk.msra.mxu0 %vm9671_vm8, %v7929_v55  ;;  %7483 = vmatprep.mubr.msk.f32.mxu0 %vm2701_vm0, %v6883_v63  ;;  %v3880_v55 = vld [vmem:[%s10390_s12 + $0x8] sm:$0xff] }
 0x54d   : > { %7937 = vmatprep.subr.msk.bf16.mxu0 %vm9695_vm5, %v7935_v3  ;;  %7964 = vmatpush3.bf16.msra.mxu1 %v7961_v46  ;;  %v7965_v59 = vpack.c.bf16 %v3880_v55, %v3879_v53  ;;  %v8079_v46 = vpack.c.bf16 %v4908_v40, %v4905_v36  ;;  %v4914_v53 = vld [vmem:[%s10391_s13 + $0x48] sm:$0xff] }
 0x54e   : > { %7530 = vmatprep.subr.msk.mxu1 %vm2508_vm14, %v3777_v48  ;;  %v4918_v55 = vld [vmem:[%s10391_s13 + $0x68] sm:$0xff] }
 0x54f   : > { %7484 = vmatmul.mubr.msk.f32.gmra.mrb[10].mxu0 %vm2701_vm0, %v6884_v4 }
 0x550   : > { %7490 = vmatprep.mubr.msk.f32.mxu0 %vm2701_vm0, %v6891_v5 }
 0x551   : > { %7531 = vmatpush3.msk.msra.mxu1 %vm2508_vm14, %v3777_v48  ;;  %v8081_v48 = vpack.c.bf16 %v4915_v43, %v4912_v41  ;;  %v6932_v41 = vld [vmem:[%s10383_s5 + $0x18] sm:$0xff]  ;;  %v6943_v43 = vld [vmem:[%s10383_s5 + $0x20] sm:$0xff] }
 0x552   : > { %7966 = vmatprep.subr.bf16.mxu1 %v7965_v59 }
 0x553   : > { %7491 = vmatmul.mubr.msk.f32.vlgmr.msra.gmra.mrb[8].mxu0 %vm2701_vm0, %v6892_v6 }
 0x554   : > { %7940 = vmatpush3.bf16.msk.msra.mxu0 %vm9695_vm5, %v7935_v3  ;;  %7493 = vmatprep.mubr.msk.f32.mxu0 %vm2701_vm0, %v6893_v8 }
 0x557   : > { %7494 = vmatmul.mubr.msk.f32.gmra.mrb[10].mxu0 %vm2701_vm0, %v6894_v9 }
 0x558   : > { %7500 = vmatprep.mubr.msk.f32.mxu0 %vm2701_vm0, %v6901_v11 }
 0x55b   : > { %7501 = vmatmul.mubr.msk.f32.vlgmr.msra.gmra.mrb[8].mxu0 %vm2701_vm0, %v6902_v12 }
 0x55c   : > { %7503 = vmatprep.mubr.msk.f32.mxu0 %vm2701_vm0, %v6903_v13  ;;  %v3881_v13 = vld [vmem:[%s10390_s12 + $0x10] sm:$0xff] }
 0x55f   : > { %7504 = vmatmul.mubr.msk.f32.gmra.mrb[10].mxu0 %vm2701_vm0, %v6904_v15  ;;  %v3882_v15 = vld [vmem:[%s10390_s12 + $0x18] sm:$0xff] }
 0x560   : > { %5023 = vmatprep.mubr.f32.mxu0 %v8643_v22  ;;  %v7969_v21 = vpack.c.bf16 %v3882_v15, %v3881_v13  ;;  %v4929_v13 = vld [vmem:[%s10391_s13 + $0xc0] sm:$0xff]  ;;  %v4932_v15 = vld [vmem:[%s10391_s13 + $0xd8] sm:$0xff] }
 0x62e   : > { %v7502_v19 = vpop.f32.mrb[8].mxu0 }
 0x62f   : > { %v8206_v24 = vadd.f32 %v7502_v19, %v2674_v16  ;;  %v3690_v42 = vpop.f32.mrb[9].mxu0 }
 0x630   : > { %v8207_v56 = vadd.f32 %v3690_v42, %v2669_v18 }
 0x631   : > { %v3714_v52 = vmax.f32 %v8206_v24, 0.0 }
 0x632   : > { %v3713_v0 = vmax.f32 %v8207_v56, 0.0  ;;  %v7505_v14 = vpop.f32.mrb[10].mxu0  ;;  %v3883_v56 = vld [vmem:[%s10390_s12 + $0x20] sm:$0xf] }
 0x633   : > { %v8208_v51 = vadd.f32 %v7505_v14, %v2684_v26  ;;  %3723 = vrot.lane.b32.xlu0 %v3714_v52, %s8648_s24  ;;  %v3700_v27 = vpop.f32.mrb[11].mxu0  ;;  %v4017_v14 = vld [vmem:[%s10383_s5] sm:$0xff] }
 0x634   : > { %v8209_v30 = vadd.f32 %v3700_v27, %v2679_v47  ;;  %3721 = vrot.lane.b32.xlu1 %v3713_v0, %s8648_s24 }
 0x635   : > { %v3716_v33 = vmax.f32 %v8208_v51, 0.0 }
 0x636   : > { %v3715_v34 = vmax.f32 %v8209_v30, 0.0 }
 0x637   : > { %3727 = vrot.lane.b32.xlu0 %v3716_v33, %s8648_s24 }
 0x638   : > { %3725 = vrot.lane.b32.xlu1 %v3715_v34, %s8648_s24 }
 0x6a5   : > { %v3724_v49 = vpop.permute.xlu0 %3723 }
 0x6a6   : > { %v3734_v57 = vsel %vm3259_vm15, %v3724_v49, 0.0  ;;  %v3722_v58 = vpop.permute.xlu1 %3721  ;;  %v4911_v49 = vld [vmem:[%s10391_s13 + $0x30] sm:$0xff] }
 0x6a7   : > { %v3738_v60 = vmax.f32 %v3714_v52, %v3734_v57  ;;  %v3733_v61 = vsel %vm3259_vm15, %v3722_v58, 0.0  ;;  %v4921_v57 = vld [vmem:[%s10391_s13 + $0x80] sm:$0xff]  ;;  %v8083_v58 = vpack.c.bf16 %v4914_v53, %v4911_v49 }
 0x6a8   : > { %v3737_v62 = vmax.f32 %v3713_v0, %v3733_v61  ;;  %v4920_v61 = vld [vmem:[%s10391_s13 + $0x78] sm:$0xff] }
 0x6a9   : > { %3747 = vrot.lane.b32.xlu0 %v3738_v60, %s8658_s18  ;;  %v3728_v63 = vpop.permute.xlu0 %3727 }
 0x6aa   : > { %v3736_v3 = vsel %vm3259_vm15, %v3728_v63, 0.0  ;;  %3745 = vrot.lane.b32.xlu1 %v3737_v62, %s8658_s18  ;;  %v3726_v4 = vpop.permute.xlu1 %3725  ;;  %v4927_v63 = vld [vmem:[%s10391_s13 + $0xb0] sm:$0xff] }
 0x6ab   : > { %v3740_v5 = vmax.f32 %v3716_v33, %v3736_v3  ;;  %v3735_v6 = vsel %vm3259_vm15, %v3726_v4, 0.0  ;;  %vm3884_vm15 = vcmask 293888   ;;  %v3986_v33 = vld [vmem:[%s10384_s6 + $0x8] sm:$0xff] }
 0x6ac   : > { %v3739_v8 = vmax.f32 %v3715_v34, %v3735_v6  ;;  %v4906_v34 = vld [vmem:[%s10391_s13 + $0x8] sm:$0xff] }
 0x6ad   : > { %3751 = vrot.lane.b32.xlu0 %v3740_v5, %s8658_s18  ;;  %v8077_v38 = vpack.c.bf16 %v4909_v35, %v4906_v34  ;;  %v4926_v6 = vld [vmem:[%s10391_s13 + $0xa8] sm:$0xff] }
 0x6ae   : > { %3749 = vrot.lane.b32.xlu1 %v3739_v8, %s8658_s18 }
 0x6af   : > { %8078 = vmatprep.subr.bf16.mxu0 %v8077_v38 }
 0x6b0   : > { %8080 = vmatpush1.bf16.msra.mxu0 %v8079_v46 }
 0x6b1   : > { %8082 = vmatprep.subr.bf16.mxu0 %v8081_v48 }
 0x6b4   : > { %8084 = vmatpush1.bf16.msra.mxu0 %v8083_v58  ;;  %v6944_v58 = vld [vmem:[%s10383_s5 + $0x28] sm:$0xff] }
 0x71b   : > { %v3748_v9 = vpop.permute.xlu0 %3747 }
 0x71c   : > { %v3758_v11 = vsel %vm3489_vm9, %v3748_v9, 0.0  ;;  %v3746_v12 = vpop.permute.xlu1 %3745  ;;  %v4933_v9 = vld [vmem:[%s10391_s13 + $0xe0] sm:$0xff] }
 0x71d   : > { %v3757_v16 = vsel %vm3489_vm9, %v3746_v12, 0.0  ;;  %v3762_v19 = vmax.f32 %v3738_v60, %v3758_v11  ;;  %v4917_v60 = vld [vmem:[%s10391_s13 + $0x60] sm:$0xff] }
 0x71e   : > { %v3761_v18 = vmax.f32 %v3737_v62, %v3757_v16  ;;  %v4924_v62 = vld [vmem:[%s10391_s13 + $0x98] sm:$0xff]  ;;  %v8087_v3 = vpack.c.bf16 %v4920_v61, %v4917_v60 }
 0x71f   : > { %v3752_v20 = vpop.permute.xlu0 %3751  ;;  %v8089_v4 = vpack.c.bf16 %v4927_v63, %v4924_v62  ;;  %v4936_v16 = vld [vmem:[%s10391_s13 + $0xf8] sm:$0xff]  ;;  %v6967_v62 = vld [vmem:[%s10383_s5 + $0x40] sm:$0xff] }
 0x720   : > { %v3760_v23 = vsel %vm3489_vm9, %v3752_v20, 0.0  ;;  %7532 = vmatprep.mubr.msk.f32.mxu1 %vm3778_vm6, %v3761_v18  ;;  %v3750_v24 = vpop.permute.xlu1 %3749  ;;  %v4939_v18 = vld [vmem:[%s10391_s13 + $0x110] sm:$0xff]  ;;  %v6956_v61 = vld [vmem:[%s10383_s5 + $0x38] sm:$0xff] }
 0x721   : > { %v3759_v42 = vsel %vm3489_vm9, %v3750_v24, 0.0  ;;  %7533 = vmatmul.mubr.msk.f32.vlgmr.msra.gmra.mrb[12].mxu1 %vm3778_vm6, %v3762_v19  ;;  %v3764_v44 = vmax.f32 %v3740_v5, %v3760_v23  ;;  %vm4019_vm9 = vcmask 261120   ;;  %v4923_v5 = vld [vmem:[%s10391_s13 + $0x90] sm:$0xff]  ;;  %v8095_v19 = vpack.c.bf16 %v4932_v15, %v4929_v13 }
 0x722   : > { %v3763_v45 = vmax.f32 %v3739_v8, %v3759_v42  ;;  %7968 = vmatpush3.bf16.msra.mxu1 %v7965_v59  ;;  %v8085_v59 = vpack.c.bf16 %v4921_v57, %v4918_v55  ;;  %v4930_v8 = vld [vmem:[%s10391_s13 + $0xc8] sm:$0xff]  ;;  %v8091_v11 = vpack.c.bf16 %v4926_v6, %v4923_v5  ;;  %v8097_v20 = vpack.c.bf16 %v4939_v18, %v4936_v16 }
 0x723   : > { %7970 = vmatprep.subr.bf16.mxu1 %v7969_v21  ;;  %v8093_v12 = vpack.c.bf16 %v4933_v9, %v4930_v8 }
 0x724   : > { %7535 = vmatprep.mubr.msk.f32.mxu1 %vm3778_vm6, %v3763_v45  ;;  %8086 = vmatprep.subr.bf16.mxu0 %v8085_v59  ;;  %v6955_v59 = vld [vmem:[%s10383_s5 + $0x30] sm:$0xff] }
 0x725   : > { %7536 = vmatmul.mubr.msk.f32.gmra.mrb[14].mxu1 %vm3778_vm6, %v3764_v44  ;;  %8088 = vmatpush1.bf16.msra.mxu0 %v8087_v3 }
 0x726   : > { %7972 = vmatpush3.bf16.msra.mxu1 %v7969_v21  ;;  %8090 = vmatprep.subr.bf16.mxu0 %v8089_v4 }
 0x727   : > { %7546 = vmatprep.subr.msk.mxu1 %vm2508_vm14, %v3883_v56 }
 0x729   : > { %8092 = vmatpush1.bf16.msra.mxu0 %v8091_v11  ;;  %v6968_v11 = vld [vmem:[%s10383_s5 + $0x48] sm:$0xff] }
 0x72a   : > { %7547 = vmatpush3.msk.msra.mxu1 %vm2508_vm14, %v3883_v56  ;;  %8094 = vmatprep.subr.bf16.mxu0 %v8093_v12 }
 0x72d   : > { %8096 = vmatpush1.bf16.msra.mxu0 %v8095_v19 }
 0x72e   : > { %8098 = vmatprep.subr.bf16.mxu0 %v8097_v20 }
 0x7f4   : > { %v7534_v1 = vpop.f32.mrb[12].mxu1 }
 0x7f5   : > { %v3860_v25 = vpop.f32.mrb[13].mxu1 }
 0x7f6   : > { %7548 = vmatprep.mubr.msk.f32.mxu1 %vm3884_vm15, %v3860_v25 }
 0x7f7   : > { %7549 = vmatmul.mubr.msk.f32.vlgmr.msra.gmra.mrb[16].mxu1 %vm3884_vm15, %v7534_v1 }
 0x7f8   : > { %v7537_v50 = vpop.f32.mrb[14].mxu1 }
 0x7f9   : > { %v3870_v52 = vpop.f32.mrb[15].mxu1 }
 0x7fa   : > { %7551 = vmatprep.mubr.msk.f32.mxu1 %vm3884_vm15, %v3870_v52 }
 0x7fb   : > { %7552 = vmatmul.mubr.msk.f32.gmra.mrb[18].mxu1 %vm3884_vm15, %v7537_v50 }
 0x7fc   : > { %7562 = vmatprep.mubr.msk.f32.mxu1 %vm4019_vm9, %v4017_v14 }
 0x8ca   : > { %v7550_v26 = vpop.f32.mrb[16].mxu1 }
 0x8cb   : > { %v3966_v0 = vpop.f32.mrb[17].mxu1 }
 0x8cc   : > { %v8428_v47 = vpack.i.bf16 %v7550_v26, %v3966_v0  ;;  %v9827_v27 = vpack.c.bf16 %v7550_v26, %v3966_v0 }
 0x8ce   : > { %8429 = vrot.lane.b32.xlu1 %v8428_v47, %s8654_s19  ;;  %v7553_v51 = vpop.f32.mrb[18].mxu1 }
 0x8cf   : > { %v3976_v29 = vpop.f32.mrb[19].mxu1 }
 0x8d0   : > { %v8433_v30 = vpack.i.bf16 %v7553_v51, %v3976_v29  ;;  %v9831_v31 = vpack.c.bf16 %v7553_v51, %v3976_v29  ;;  %v4018_v29 = vld [vmem:[%s10383_s5 + $0x8] sm:$0xff] }
 0x8d2   : > { %8439 = vrot.lane.b32.xlu1 %v8428_v47, %s8653_s20  ;;  %8434 = vrot.lane.b32.xlu0 %v8433_v30, %s8654_s19  ;;  %s10439_s19 = smov 117  }
 0x8d6   : > { %8449 = vrot.lane.b32.xlu1 %v8428_v47, %s8655_s27  ;;  %8444 = vrot.lane.b32.xlu0 %v8433_v30, %s8653_s20  ;;  %s10444_s20 = smov 110  }
 0x8da   : > { %8459 = vrot.lane.b32.xlu1 %v8428_v47, %s10437_s23  ;;  %8454 = vrot.lane.b32.xlu0 %v8433_v30, %s8655_s27 }
 0x8de   : > { %8469 = vrot.lane.b32.xlu1 %v8428_v47, %s8648_s24  ;;  %8464 = vrot.lane.b32.xlu0 %v8433_v30, %s10437_s23 }
 0x8e2   : > { %8479 = vrot.lane.b32.xlu1 %v8428_v47, %s10438_s15  ;;  %8474 = vrot.lane.b32.xlu0 %v8433_v30, %s8648_s24 }
 0x8e6   : > { %8489 = vrot.lane.b32.xlu1 %v8428_v47, %s8658_s18  ;;  %8484 = vrot.lane.b32.xlu0 %v8433_v30, %s10438_s15  ;;  %s10442_s15 = smov 17  }
 0x8ea   : > { %8499 = vrot.lane.b32.xlu1 %v8428_v47, %s10439_s19  ;;  %8494 = vrot.lane.b32.xlu0 %v8433_v30, %s8658_s18  ;;  %s10440_s18 = smov 19  }
 0x8ee   : > { %3989 = vperm.xlu1 %8367, %v3985_v32   ;;  %8504 = vrot.lane.b32.xlu0 %v8433_v30, %s10439_s19  ;;  %v6931_v30 = vld [vmem:[%s10383_s5 + $0x10] sm:$0xff]  ;;  %s10443_s19 = smov 111  }
 0x8f2   : > { %3994 = vperm.xlu0 %8366, %v3986_v33  }
 0x940   : > { %v8430_v21 = vpop.permute.xlu1 %8429 }
 0x941   : > { %v8432_v23 = vunpack.i.h.bf16 %v8430_v21  ;;  %v8431_v24 = vunpack.i.l.bf16 %v8430_v21  ;;  %v6972_v21 = vld [vmem:[%s10383_s5 + $0x58] sm:$0xff] }
 0x943   : > { %v7973_v42 = vpack.c.bf16 %v8432_v23, %v8431_v24  ;;  %v6979_v23 = vld [vmem:[%s10383_s5 + $0x60] sm:$0xff] }
 0x944   : > { %v8440_v45 = vpop.permute.xlu1 %8439  ;;  %v8435_v44 = vpop.permute.xlu0 %8434 }
 0x945   : > { %v8442_v56 = vunpack.i.h.bf16 %v8440_v45  ;;  %v8441_v1 = vunpack.i.l.bf16 %v8440_v45  ;;  %v8437_v25 = vunpack.i.h.bf16 %v8435_v44  ;;  %v8436_v50 = vunpack.i.l.bf16 %v8435_v44  ;;  %7975 = vmatprep.subr.msk.bf16.mxu1 %vm9532_vm12, %v7973_v42 }
 0x946   : > { %7978 = vmatpush3.bf16.msk.msra.mxu1 %vm9532_vm12, %v7973_v42 }
 0x947   : > { %v7979_v52 = vpack.c.bf16 %v8437_v25, %v8436_v50  ;;  %v7985_v0 = vpack.c.bf16 %v8442_v56, %v8441_v1  ;;  %v6980_v50 = vld [vmem:[%s10383_s5 + $0x68] sm:$0xff] }
 0x948   : > { %v8445_v26 = vpop.permute.xlu0 %8444  ;;  %v8450_v51 = vpop.permute.xlu1 %8449 }
 0x949   : > { %v8447_v14 = vunpack.i.h.bf16 %v8445_v26  ;;  %v8446_v47 = vunpack.i.l.bf16 %v8445_v26  ;;  %7981 = vmatprep.subr.msk.bf16.mxu1 %vm9532_vm12, %v7979_v52  ;;  %v8452_v32 = vunpack.i.h.bf16 %v8450_v51  ;;  %v8451_v33 = vunpack.i.l.bf16 %v8450_v51 }
 0x94a   : > { %7984 = vmatpush3.bf16.msk.msra.mxu1 %vm9532_vm12, %v7979_v52  ;;  %v6987_v52 = vld [vmem:[%s10383_s5 + $0x70] sm:$0xff]  ;;  %vm10450_vm12 = vcmask 7168  }
 0x94b   : > { %7987 = vmatprep.subr.msk.bf16.mxu1 %vm9536_vm10, %v7985_v0  ;;  %v7991_v34 = vpack.c.bf16 %v8447_v14, %v8446_v47  ;;  %v7997_v7 = vpack.c.bf16 %v8452_v32, %v8451_v33  ;;  %v6995_v32 = vld [vmem:[%s10383_s5 + $0x80] sm:$0xff] }
 0x94c   : > { %v8455_v35 = vpop.permute.xlu0 %8454  ;;  %v8460_v40 = vpop.permute.xlu1 %8459 }
 0x94d   : > { %7563 = vmatmul.mubr.msk.f32.vlgmr.msra.gmra.mrb[20].mxu1 %vm4019_vm9, %v4018_v29  ;;  %v8457_v36 = vunpack.i.h.bf16 %v8455_v35  ;;  %v8456_v38 = vunpack.i.l.bf16 %v8455_v35  ;;  %v8462_v46 = vunpack.i.h.bf16 %v8460_v40  ;;  %v8461_v48 = vunpack.i.l.bf16 %v8460_v40  ;;  %v4938_v35 = vld [vmem:[%s10391_s13 + $0x108] sm:$0xff] }
 0x94e   : > { %7990 = vmatpush3.bf16.msk.msra.mxu1 %vm9536_vm10, %v7985_v0  ;;  %7573 = vmatprep.mubr.msk.f32.mxu1 %vm4019_vm9, %v6931_v30  ;;  %v6988_v30 = vld [vmem:[%s10383_s5 + $0x78] sm:$0xff]  ;;  %v4910_v40 = vld [vmem:[%s10391_s13 + $0x28] sm:$0xff] }
 0x94f   : > { %7993 = vmatprep.subr.msk.bf16.mxu1 %vm9536_vm10, %v7991_v34  ;;  %v8003_v49 = vpack.c.bf16 %v8457_v36, %v8456_v38  ;;  %v8009_v10 = vpack.c.bf16 %v8462_v46, %v8461_v48  ;;  %v4941_v36 = vld [vmem:[%s10391_s13 + $0x120] sm:$0xf]  ;;  %v4907_v38 = vld [vmem:[%s10391_s13 + $0x10] sm:$0xff] }
 0x950   : > { %v8465_v53 = vpop.permute.xlu0 %8464  ;;  %v8470_v17 = vpop.permute.xlu1 %8469 }
 0x951   : > { %v8467_v55 = vunpack.i.h.bf16 %v8465_v53  ;;  %v8466_v57 = vunpack.i.l.bf16 %v8465_v53  ;;  %v8472_v63 = vunpack.i.h.bf16 %v8470_v17  ;;  %v8471_v3 = vunpack.i.l.bf16 %v8470_v17  ;;  %v4916_v53 = vld [vmem:[%s10391_s13 + $0x58] sm:$0xff]  ;;  %v4922_v17 = vld [vmem:[%s10391_s13 + $0x88] sm:$0xff] }
 0x952   : > { %7996 = vmatpush3.bf16.msk.msra.mxu1 %vm9536_vm10, %v7991_v34  ;;  %v4935_v34 = vld [vmem:[%s10391_s13 + $0xf0] sm:$0xff]  ;;  %vm10214_vm10 = vmneg %vm1101_vm4 }
 0x953   : > { %7999 = vmatprep.subr.msk.bf16.mxu1 %vm9552_vm11, %v7997_v7  ;;  %v8015_v60 = vpack.c.bf16 %v8467_v55, %v8466_v57  ;;  %v8029_v5 = vpack.c.bf16 %v8472_v63, %v8471_v3  ;;  %v4925_v63 = vld [vmem:[%s10391_s13 + $0xa0] sm:$0xff]  ;;  %v4928_v3 = vld [vmem:[%s10391_s13 + $0xb8] sm:$0xff] }
 0x954   : > { %v8475_v4 = vpop.permute.xlu0 %8474  ;;  %v8480_v9 = vpop.permute.xlu1 %8479 }
 0x955   : > { %7574 = vmatmul.mubr.msk.f32.vlgmr.msra.gmra.mrb[20].mxu1 %vm4019_vm9, %v6932_v41  ;;  %v8477_v6 = vunpack.i.h.bf16 %v8475_v4  ;;  %v8476_v8 = vunpack.i.l.bf16 %v8475_v4  ;;  %v8482_v12 = vunpack.i.h.bf16 %v8480_v9  ;;  %v8481_v13 = vunpack.i.l.bf16 %v8480_v9  ;;  %v4937_v9 = vld [vmem:[%s10391_s13 + $0x100] sm:$0xff] }
 0x956   : > { %8002 = vmatpush3.bf16.msk.msra.mxu1 %vm9552_vm11, %v7997_v7  ;;  %7584 = vmatprep.mubr.msk.f32.mxu1 %vm4019_vm9, %v6943_v43  ;;  %v8099_v7 = vpack.c.bf16 %v4938_v35, %v4935_v34  ;;  %v8101_v41 = vpack.c.bf16 %v4910_v40, %v4907_v38  ;;  %v8113_v4 = vpack.c.bf16 %v4928_v3, %v4925_v63 }
 0x957   : > { %8005 = vmatprep.subr.msk.bf16.mxu1 %vm9552_vm11, %v8003_v49  ;;  %v8035_v15 = vpack.c.bf16 %v8477_v6, %v8476_v8  ;;  %v4934_v6 = vld [vmem:[%s10391_s13 + $0xe8] sm:$0xff] }
 0x958   : > { %v8485_v16 = vpop.permute.xlu0 %8484  ;;  %v8490_v20 = vpop.permute.xlu1 %8489  ;;  %8100 = vmatpush1.bf16.msra.mxu0 %v8099_v7 }
 0x959   : > { %v8487_v18 = vunpack.i.h.bf16 %v8485_v16  ;;  %v8486_v19 = vunpack.i.l.bf16 %v8485_v16  ;;  %v8492_v24 = vunpack.i.h.bf16 %v8490_v20  ;;  %v8491_v42 = vunpack.i.l.bf16 %v8490_v20  ;;  %7003 = vmatprep.subr.msk.mxu0 %vm2508_vm14, %v4942_v2  ;;  %v10197_v2 = vld [vmem:[%s10385_s7] sm:$0x7] }
 0x95a   : > { %8008 = vmatpush3.bf16.msk.msra.mxu1 %vm9552_vm11, %v8003_v49  ;;  %v4913_v49 = vld [vmem:[%s10391_s13 + $0x40] sm:$0xff] }
 0x95b   : > { %8011 = vmatprep.subr.msk.bf16.mxu1 %vm9577_vm13, %v8009_v10  ;;  %v8047_v45 = vpack.c.bf16 %v8487_v18, %v8486_v19  ;;  %v8053_v28 = vpack.c.bf16 %v8492_v24, %v8491_v42  ;;  %v8659_v24 = vmov 0.0|0.0  }
 0x95c   : > { %v8495_v44 = vpop.permute.xlu0 %8494  ;;  %v8500_v25 = vpop.permute.xlu1 %8499  ;;  %7004 = vmatpush1.msk.msra.mxu0 %vm2508_vm14, %v4941_v36 }
 0x95d   : > { %7585 = vmatmul.mubr.msk.f32.vlgmr.msra.gmra.mrb[20].mxu1 %vm4019_vm9, %v6944_v58  ;;  %v8497_v56 = vunpack.i.h.bf16 %v8495_v44  ;;  %v8496_v1 = vunpack.i.l.bf16 %v8495_v44  ;;  %v8502_v26 = vunpack.i.h.bf16 %v8500_v25  ;;  %v8501_v0 = vunpack.i.l.bf16 %v8500_v25  ;;  %8102 = vmatprep.subr.bf16.mxu0 %v8101_v41  ;;  %v5111_v25 = vld [vmem:[%s10386_s8] sm:$0x7] }
 0x95e   : > { %8014 = vmatpush3.bf16.msk.msra.mxu1 %vm9577_vm13, %v8009_v10  ;;  %7595 = vmatprep.mubr.msk.f32.mxu1 %vm4019_vm9, %v6955_v59  ;;  %v8105_v59 = vpack.c.bf16 %v4916_v53, %v4913_v49 }
 0x95f   : > { %8017 = vmatprep.subr.msk.bf16.mxu1 %vm9577_vm13, %v8015_v60  ;;  %v8059_v14 = vpack.c.bf16 %v8497_v56, %v8496_v1  ;;  %v8065_v37 = vpack.c.bf16 %v8502_v26, %v8501_v0 }
 0x960   : > { %v8505_v47 = vpop.permute.xlu0 %8504 }
 0x961   : > { %v8507_v51 = vunpack.i.h.bf16 %v8505_v47  ;;  %v8506_v29 = vunpack.i.l.bf16 %v8505_v47 }
 0x962   : > { %8020 = vmatpush3.bf16.msk.msra.mxu1 %vm9577_vm13, %v8015_v60  ;;  %v4919_v60 = vld [vmem:[%s10391_s13 + $0x70] sm:$0xff] }
 0x963   : > { %8022 = vmatprep.subr.bf16.mxu1 %v9827_v27  ;;  %v8071_v33 = vpack.c.bf16 %v8507_v51, %v8506_v29 }
 0x965   : > { %7596 = vmatmul.mubr.msk.f32.vlgmr.msra.gmra.mrb[20].mxu1 %vm4019_vm9, %v6956_v61 }
 0x966   : > { %8024 = vmatpush3.bf16.msra.mxu1 %v9827_v27  ;;  %7606 = vmatprep.mubr.msk.f32.mxu1 %vm4019_vm9, %v6967_v62  ;;  %v6971_v27 = vld [vmem:[%s10383_s5 + $0x50] sm:$0xff]  ;;  %v8109_v62 = vpack.c.bf16 %v4922_v17, %v4919_v60 }
 0x967   : > { %8026 = vmatprep.subr.bf16.mxu1 %v9831_v31 }
 0x96a   : > { %8028 = vmatpush3.bf16.msra.mxu1 %v9831_v31  ;;  %v8041_v31 = vpack.c.bf16 %v8482_v12, %v8481_v13  ;;  %v4943_v12 = vld [vmem:[%s10391_s13 + $0x130] sm:$0xf] }
 0x96b   : > { %8031 = vmatprep.subr.msk.bf16.mxu1 %vm9622_vm2, %v8029_v5 }
 0x96d   : > { %7607 = vmatmul.mubr.msk.f32.vlgmr.msra.gmra.mrb[20].mxu1 %vm4019_vm9, %v6968_v11  ;;  %v3990_v46 = vpop.permute.xlu1 %3989  ;;  %v4940_v11 = vld [vmem:[%s10391_s13 + $0x118] sm:$0xff] }
 0x96e   : > { %8034 = vmatpush3.bf16.msk.msra.mxu1 %vm9622_vm2, %v8029_v5  ;;  %7617 = vmatprep.mubr.msk.f32.mxu1 %vm4019_vm9, %v6971_v27  ;;  %v4931_v5 = vld [vmem:[%s10391_s13 + $0xd0] sm:$0xff]  ;;  %v8121_v27 = vpack.c.bf16 %v4940_v11, %v4937_v9 }
 0x96f   : > { %8037 = vmatprep.subr.msk.bf16.mxu1 %vm9622_vm2, %v8035_v15  ;;  %v8117_v8 = vpack.c.bf16 %v4934_v6, %v4931_v5 }
 0x971   : > { %v3995_v55 = vpop.permute.xlu0 %3994 }
 0x972   : > { %8040 = vmatpush3.bf16.msk.msra.mxu1 %vm9622_vm2, %v8035_v15 }
 0x973   : > { %8043 = vmatprep.subr.msk.bf16.mxu1 %vm9645_vm7, %v8041_v31 }
 0x975   : > { %7618 = vmatmul.mubr.msk.f32.vlgmr.msra.gmra.mrb[20].mxu1 %vm4019_vm9, %v6972_v21 }
 0x976   : > { %8046 = vmatpush3.bf16.msk.msra.mxu1 %vm9645_vm7, %v8041_v31  ;;  %7628 = vmatprep.mubr.msk.f32.mxu1 %vm4019_vm9, %v6979_v23 }
 0x977   : > { %8049 = vmatprep.subr.msk.bf16.mxu1 %vm9645_vm7, %v8047_v45 }
 0x97a   : > { %8052 = vmatpush3.bf16.msk.msra.mxu1 %vm9645_vm7, %v8047_v45  ;;  %vm10190_vm7 = vmneg %vm916_vm3 }
 0x97b   : > { %8055 = vmatprep.subr.msk.bf16.mxu1 %vm9671_vm8, %v8053_v28 }
 0x97d   : > { %7629 = vmatmul.mubr.msk.f32.vlgmr.msra.gmra.mrb[20].mxu1 %vm4019_vm9, %v6980_v50 }
 0x97e   : > { %8058 = vmatpush3.bf16.msk.msra.mxu1 %vm9671_vm8, %v8053_v28  ;;  %7639 = vmatprep.mubr.msk.f32.mxu1 %vm4019_vm9, %v6987_v52 }
 0x97f   : > { %8061 = vmatprep.subr.msk.bf16.mxu1 %vm9671_vm8, %v8059_v14 }
 0x982   : > { %8064 = vmatpush3.bf16.msk.msra.mxu1 %vm9671_vm8, %v8059_v14  ;;  %vm8136_vm8 = vmpackc.low %vm10190_vm7, %vm10190_vm7  ;;  %vm10460_vm7 = vcmask 908288  }
 0x983   : > { %8067 = vmatprep.subr.msk.bf16.mxu1 %vm9695_vm5, %v8065_v37 }
 0x985   : > { %7640 = vmatmul.mubr.msk.f32.vlgmr.msra.gmra.mrb[20].mxu1 %vm4019_vm9, %v6988_v30 }
 0x986   : > { %8070 = vmatpush3.bf16.msk.msra.mxu1 %vm9695_vm5, %v8065_v37  ;;  %7650 = vmatprep.mubr.msk.f32.mxu1 %vm4019_vm9, %v6995_v32 }
 0x987   : > { %8073 = vmatprep.subr.msk.bf16.mxu1 %vm9695_vm5, %v8071_v33 }
 0x98a   : > { %8076 = vmatpush3.bf16.msk.msra.mxu1 %vm9695_vm5, %v8071_v33  ;;  %vm8660_vm5 = vmmov 0  }
 0x98d   : > { %7651 = vmatmul.mubr.msk.f32.vlgmr.msra.gmra.mrb[20].mxu1 %vm4019_vm9, %v6996_v54  ;;  %vm10295_vm9 = vmneg %vm730_vm1 }
 0x98e   : > { %5215 = vmatprep.mubr.f32.mxu1 %v8643_v22 }
 0xa60   : > { %v7652_v43 = vpop.f32.mrb[20].mxu1 }
 0xa61   : > { %v4892_v48 = vpop.f32.mrb[21].mxu1  ;;  %v8210_v57 = vadd.f32 %v7652_v43, %v3995_v55 }
 0xa62   : > { %v8211_v10 = vadd.f32 %v4892_v48, %v3990_v46 }
 0xa63   : > { %v4904_v61 = vmax.f32 %v8210_v57, 0.0 }
 0xa64   : > { %v4903_v58 = vmax.f32 %v8211_v10, 0.0 }
 0xa66   : > { %7005 = vmatmul.mubr.msk.f32.vlgmr.msra.gmra.mrb[12].mxu0 %vm3778_vm6, %v4903_v58 }
 0xa67   : > { %8104 = vmatpush3.bf16.msra.mxu0 %v8101_v41  ;;  %5029 = vmatprep.mubr.f32.mxu0 %v8643_v22 }
 0xa68   : > { %8106 = vmatprep.subr.bf16.mxu0 %v8105_v59 }
 0xa6a   : > { %7006 = vmatmul.mubr.msk.f32.gmra.mrb[14].mxu0 %vm3778_vm6, %v4904_v61 }
 0xa6b   : > { %8108 = vmatpush3.bf16.msra.mxu0 %v8105_v59  ;;  %7679 = vmatprep.mubr.msk.f32.mxu0 %vm3778_vm6, %v4903_v58  ;;  %v7016_v59 = vld [vmem:[%s10385_s7 + $0x4] sm:$0x7] }
 0xa6c   : > { %8110 = vmatprep.subr.bf16.mxu0 %v8109_v62 }
 0xa6f   : > { %8112 = vmatpush3.bf16.msra.mxu0 %v8109_v62 }
 0xa70   : > { %8114 = vmatprep.subr.bf16.mxu0 %v8113_v4 }
 0xa73   : > { %8116 = vmatpush3.bf16.msra.mxu0 %v8113_v4 }
 0xa74   : > { %8118 = vmatprep.subr.bf16.mxu0 %v8117_v8 }
 0xa77   : > { %8120 = vmatpush3.bf16.msra.mxu0 %v8117_v8 }
 0xa78   : > { %8122 = vmatprep.subr.bf16.mxu0 %v8121_v27 }
 0xa7b   : > { %8124 = vmatpush3.bf16.msra.mxu0 %v8121_v27 }
 0xa7c   : > { %7677 = vmatprep.subr.msk.mxu0 %vm2508_vm14, %v4943_v12 }
 0xa7f   : > { %7678 = vmatpush3.msk.msra.mxu0 %vm2508_vm14, %v4943_v12  ;;  %vm10451_vm14 = vmmov %vm10450_vm12 }
 0xa80   : > { %7680 = vmatmul.mubr.msk.f32.vlgmr.msra.gmra.mrb[16].mxu0 %vm3778_vm6, %v4904_v61  ;;  %8130 = vmatprep.subr.bf16.mxu0 %v8659_v24 }
 0xa81   : > { %7686 = vmatprep.mubr.msk.f32.mxu0 %vm8660_vm5, %v8643_v22 }
 0xb39   : > { %v10115_v13 = vpop.f32.mrb[12].mxu0 }
 0xb3a   : > { %v10117_v15 = vpop.f32.mrb[13].mxu0 }
 0xb3b   : > { %v8518_v16 = vpack.i.bf16 %v10117_v15, %v10115_v13 }
 0xb3d   : > { %v10121_v31 = vpop.f32.mrb[14].mxu0 }
 0xb3e   : > { %v10123_v18 = vpop.f32.mrb[15].mxu0  ;;  %v8573_v19 = vpack.i.bf16 %v10121_v31, %v10115_v13  ;;  %v8159_v23 = vpack.c.bf16 %v10121_v31, %v10115_v13 }
 0xb3f   : > { %v8523_v20 = vpack.i.bf16 %v10123_v18, %v10121_v31  ;;  %v8157_v21 = vpack.c.bf16 %v10123_v18, %v10117_v15 }
 0xb53   : > { %v10134_v42 = vpop.f32.mrb[16].mxu0 }
 0xb54   : > { %v10136_v45 = vpop.f32.mrb[17].mxu0  ;;  %v8508_v44 = vpack.i.bf16 %v10134_v42, %v10123_v18 }
 0xb55   : > { %v8513_v28 = vpack.i.bf16 %v10136_v45, %v10117_v15  ;;  %v8533_v56 = vpack.i.bf16 %v10134_v42, %v10136_v45  ;;  %v8162_v1 = vpack.c.bf16 %v10134_v42, %v10136_v45 }
 0xb56   : > { %8509 = vrot.lane.b32.xlu0 %v8508_v44, %s10440_s18 }
 0xb57   : > { %8514 = vrot.lane.b32.xlu1 %v8513_v28, %s10440_s18 }
 0xb5a   : > { %8524 = vrot.lane.b32.xlu0 %v8523_v20, %s10441_s22 }
 0xb5b   : > { %8519 = vrot.lane.b32.xlu1 %v8518_v16, %s10441_s22 }
 0xb5e   : > { %8529 = vrot.lane.b32.xlu0 %v8518_v16, %s10442_s15 }
 0xb5f   : > { %8534 = vrot.lane.b32.xlu1 %v8533_v56, %s10441_s22  ;;  %s467_s22 = scalar_lea.vmem %s10392_s14, %s8339_s17 }
 0xb62   : > { %8549 = vrot.lane.b32.xlu0 %v8533_v56, %s10442_s15 }
 0xb63   : > { %8539 = vrot.lane.b32.xlu1 %v8523_v20, %s10442_s15 }
 0xb66   : > { %8554 = vrot.lane.b32.xlu0 %v8523_v20, %s10437_s23 }
 0xb67   : > { %8544 = vrot.lane.b32.xlu1 %v8518_v16, %s10437_s23 }
 0xb6a   : > { %8569 = vrot.lane.b32.xlu0 %v8513_v28, %s8648_s24 }
 0xb6b   : > { %8559 = vrot.lane.b32.xlu1 %v8533_v56, %s10437_s23 }
 0xb6e   : > { %8574 = vrot.lane.b32.xlu0 %v8573_v19, %s8648_s24 }
 0xb6f   : > { %8564 = vrot.lane.b32.xlu1 %v8508_v44, %s8648_s24 }
 0xb72   : > { %8579 = vrot.lane.b32.xlu0 %v8508_v44, %s10443_s19 }
 0xb73   : > { %8584 = vrot.lane.b32.xlu1 %v8513_v28, %s10443_s19 }
 0xb76   : > { %8599 = vrot.lane.b32.xlu0 %v8513_v28, %s10444_s20 }
 0xb77   : > { %8589 = vrot.lane.b32.xlu1 %v8573_v19, %s10443_s19 }
 0xb7a   : > { %8604 = vrot.lane.b32.xlu0 %v8573_v19, %s10444_s20 }
 0xb7b   : > { %8594 = vrot.lane.b32.xlu1 %v8508_v44, %s10444_s20 }
 0xb7e   : > { %8619 = vrot.lane.b32.xlu0 %v8513_v28, %s10445_s26 }
 0xb7f   : > { %8609 = vrot.lane.b32.xlu1 %v8573_v19, %s10440_s18 }
 0xb82   : > { %8624 = vrot.lane.b32.xlu0 %v8573_v19, %s10445_s26 }
 0xb83   : > { %8614 = vrot.lane.b32.xlu1 %v8508_v44, %s10445_s26 }
 0xb87   : > { %5114 = vperm.xlu1 %8367, %v5111_v25   ;;  %v7023_v25 = vld [vmem:[%s10385_s7 + $0x8] sm:$0x7] }
 0xbc8   : > { %v10175_v50 = vpop.permute.xlu0 %8509 }
 0xbc9   : > { %v8512_v52 = vunpack.i.h.bf16 %v10175_v50  ;;  %v8511_v26 = vunpack.i.l.bf16 %v10175_v50  ;;  %v10179_v0 = vpop.permute.xlu1 %8514 }
 0xbca   : > { %v8517_v14 = vunpack.i.h.bf16 %v10179_v0  ;;  %v8516_v47 = vunpack.i.l.bf16 %v10179_v0 }
 0xbcb   : > { %v5138_v37 = vsel %vm730_vm1, %v8511_v26, %v8512_v52 }
 0xbcc   : > { %v5136_v51 = vsel %vm730_vm1, %v8516_v47, %v8517_v14  ;;  %v8525_v29 = vpop.permute.xlu0 %8524 }
 0xbcd   : > { %v8131_v30 = vpack.c.bf16 %v5138_v37, %v5136_v51  ;;  %v8527_v32 = vunpack.i.h.bf16 %v8525_v29  ;;  %v8526_v33 = vunpack.i.l.bf16 %v8525_v29  ;;  %v8520_v54 = vpop.permute.xlu1 %8519 }
 0xbce   : > { %v8522_v34 = vunpack.i.h.bf16 %v8520_v54  ;;  %v8521_v35 = vunpack.i.l.bf16 %v8520_v54 }
 0xbcf   : > { %8132 = vmatpush3.bf16.msra.mxu0 %v8131_v30  ;;  %v5309_v36 = vsel %vm916_vm3, %v8526_v33, %v8527_v32 }
 0xbd0   : > { %v8530_v38 = vpop.permute.xlu0 %8529  ;;  %v5307_v40 = vsel %vm916_vm3, %v8521_v35, %v8522_v34  ;;  %v8135_v46 = vpack.c.bf16 %v8526_v33, %v8521_v35 }
 0xbd1   : > { %v8535_v41 = vpop.permute.xlu1 %8534  ;;  %v8133_v43 = vpack.c.bf16 %v5309_v36, %v5307_v40  ;;  %v8532_v53 = vunpack.i.h.bf16 %v8530_v38  ;;  %v8531_v10 = vunpack.i.l.bf16 %v8530_v38  ;;  %v7030_v36 = vld [vmem:[%s10385_s7 + $0xc] sm:$0x7] }
 0xbd2   : > { %v8537_v48 = vunpack.i.h.bf16 %v8535_v41  ;;  %v8536_v49 = vunpack.i.l.bf16 %v8535_v41  ;;  %7687 = vmatmul.mubr.msk.f32.vlgmr.msra.gmra.mrb[18].mxu0 %vm2701_vm0, %v10197_v2 }
 0xbd3   : > { %8134 = vmatprep.subr.bf16.mxu0 %v8133_v43  ;;  %5388 = vmatprep.mubr.f32.mxu0 %v8643_v22  ;;  %v5480_v6 = vsel %vm1101_vm4, %v8531_v10, %v8532_v53 }
 0xbd4   : > { %v5310_v55 = vsel %vm916_vm3, %v8527_v32, %v8537_v48  ;;  %v5308_v57 = vsel %vm916_vm3, %v8522_v34, %v8536_v49  ;;  %v8550_v58 = vpop.permute.xlu0 %8549  ;;  %8137 = vmatpush1.bf16.msk.msra.mxu0 %vm8136_vm8, %v8135_v46  ;;  %vm8144_vm3 = vmpackc.low %vm10214_vm10, %vm10214_vm10 }
 0xbd5   : > { %v8139_v60 = vpack.c.bf16 %v5310_v55, %v5308_v57  ;;  %v8540_v17 = vpop.permute.xlu1 %8539  ;;  %8138 = vmatprep.subr.bf16.mxu0 %v8659_v24  ;;  %v8552_v3 = vunpack.i.h.bf16 %v8550_v58  ;;  %v8551_v4 = vunpack.i.l.bf16 %v8550_v58  ;;  %v7037_v55 = vld [vmem:[%s10385_s7 + $0x10] sm:$0x7]  ;;  %vm8128_vm8 = vmpackc.low %vm10295_vm9, %vm10295_vm9  ;;  %vm10470_vm9 = vcmask 891904  }
 0xbd6   : > { %v8542_v61 = vunpack.i.h.bf16 %v8540_v17  ;;  %v8541_v62 = vunpack.i.l.bf16 %v8540_v17  ;;  %vm10461_vm10 = vmmov %vm10460_vm7 }
 0xbd7   : > { %7021 = vmatmul.mubr.msk.f32.vlgmr.msra.gmra.mrb[20].mxu0 %vm2701_vm0, %v7016_v59  ;;  %v5481_v44 = vsel %vm1101_vm4, %v8532_v53, %v8551_v4 }
 0xbd8   : > { %v8555_v5 = vpop.permute.xlu0 %8554  ;;  %8140 = vmatpush3.bf16.msra.mxu0 %v8139_v60  ;;  %7693 = vmatprep.mubr.msk.f32.mxu0 %vm8660_vm5, %v8643_v22  ;;  %v5482_v8 = vsel %vm1101_vm4, %v8541_v62, %v8542_v61  ;;  %v8143_v16 = vpack.c.bf16 %v8541_v62, %v8531_v10  ;;  %v5483_v28 = vsel %vm1101_vm4, %v8542_v61, %v8552_v3  ;;  %vm10452_vm4 = vmmov %vm10450_vm12 }
 0xbd9   : > { %v8557_v9 = vunpack.i.h.bf16 %v8555_v5  ;;  %v8556_v11 = vunpack.i.l.bf16 %v8555_v5  ;;  %v8545_v27 = vpop.permute.xlu1 %8544  ;;  %v8141_v12 = vpack.c.bf16 %v5482_v8, %v5480_v6  ;;  %v8147_v51 = vpack.c.bf16 %v5483_v28, %v5481_v44  ;;  %vm10453_vm11 = vmmov %vm10452_vm4 }
 0xbda   : > { %v8547_v19 = vunpack.i.h.bf16 %v8545_v27  ;;  %v8546_v20 = vunpack.i.l.bf16 %v8545_v27 }
 0xbdb   : > { %7694 = vmatmul.mubr.msk.f32.vlgmr.msra.gmra.mrb[18].mxu0 %vm2701_vm0, %v7016_v59  ;;  %8142 = vmatprep.subr.bf16.mxu0 %v8141_v12  ;;  %v5655_v14 = vsel %vm10451_vm14, %v8556_v11, %v8557_v9  ;;  %vm10463_vm14 = vmmov %vm10460_vm7 }
 0xbdc   : > { %v10229_v56 = vpop.permute.xlu0 %8569  ;;  %8145 = vmatpush1.bf16.msk.msra.mxu0 %vm8144_vm3, %v8143_v16  ;;  %5561 = vmatprep.mubr.f32.mxu0 %v8643_v22  ;;  %v5653_v52 = vsel %vm10450_vm12, %v8546_v20, %v8547_v19  ;;  %v8151_v54 = vpack.c.bf16 %v8556_v11, %v8546_v20  ;;  %vm10462_vm3 = vcmask 547840  }
 0xbdd   : > { %v8560_v37 = vpop.permute.xlu1 %8559  ;;  %8146 = vmatprep.subr.bf16.mxu0 %v8659_v24  ;;  %v8149_v32 = vpack.c.bf16 %v5655_v14, %v5653_v52  ;;  %v8572_v48 = vunpack.i.h.bf16 %v10229_v56  ;;  %v8571_v49 = vunpack.i.l.bf16 %v10229_v56  ;;  %vm8170_vm12 = vmpackc.low %vm10462_vm3, %vm10462_vm3  ;;  %v7045_v14 = vld [vmem:[%s10385_s7 + $0x18] sm:$0x7] }
 0xbde   : > { %v8562_v29 = vunpack.i.h.bf16 %v8560_v37  ;;  %v8561_v30 = vunpack.i.l.bf16 %v8560_v37  ;;  %vm10473_vm3 = vmmov %vm10470_vm9 }
 0xbdf   : > { %7028 = vmatmul.mubr.msk.f32.vlgmr.msra.gmra.mrb[20].mxu0 %vm2701_vm0, %v7023_v25 }
 0xbe0   : > { %8148 = vmatpush3.bf16.msra.mxu0 %v8147_v51  ;;  %7700 = vmatprep.mubr.msk.f32.mxu0 %vm8660_vm5, %v8643_v22  ;;  %v8575_v34 = vpop.permute.xlu0 %8574  ;;  %v5656_v35 = vsel %vm10452_vm4, %v8557_v9, %v8562_v29  ;;  %v5654_v7 = vsel %vm10453_vm11, %v8547_v19, %v8561_v30  ;;  %v7040_v9 = vld [vmem:[%s10385_s7 + $0x14] sm:$0x7]  ;;  %vm10465_vm4 = vcmask 900096   ;;  %vm10466_vm11 = vcmask 416768  }
 0xbe1   : > { %v10241_v33 = vpop.permute.xlu1 %8564  ;;  %8150 = vmatprep.subr.bf16.mxu0 %v8149_v32  ;;  %v8155_v40 = vpack.c.bf16 %v5656_v35, %v5654_v7  ;;  %v8576_v53 = vunpack.i.l.bf16 %v8575_v34  ;;  %v8577_v10 = vunpack.i.h.bf16 %v8575_v34 }
 0xbe2   : > { %v8567_v41 = vunpack.i.h.bf16 %v10241_v33  ;;  %v8566_v43 = vunpack.i.l.bf16 %v10241_v33 }
 0xbe3   : > { %7701 = vmatmul.mubr.msk.f32.vlgmr.msra.gmra.mrb[18].mxu0 %vm2701_vm0, %v7023_v25 }
 0xbe4   : > { %8153 = vmatpush1.bf16.msk.msra.mxu0 %vm9577_vm13, %v8151_v54  ;;  %5734 = vmatprep.mubr.f32.mxu0 %v8643_v22  ;;  %v10258_v46 = vpop.permute.xlu0 %8579  ;;  %vm10454_vm13 = vcmask 1039360   ;;  %v8169_v0 = vpack.c.bf16 %v8567_v41, %v8572_v48 }
 0xbe5   : > { %v10252_v38 = vpop.permute.xlu1 %8584  ;;  %8154 = vmatprep.subr.bf16.mxu0 %v8659_v24  ;;  %v5978_v15 = vsel %vm10454_vm13, %v8566_v43, %v8567_v41  ;;  %vm10455_vm2 = vmmov %vm10454_vm13  ;;  %v8582_v31 = vunpack.i.h.bf16 %v10258_v46 }
 0xbe6   : > { %vm10456_vm6 = vmmov %vm10455_vm2  ;;  %v8587_v60 = vunpack.i.h.bf16 %v10252_v38  ;;  %v8586_v17 = vunpack.i.l.bf16 %v10252_v38 }
 0xbe7   : > { %7035 = vmatmul.mubr.msk.f32.vlgmr.msra.gmra.mrb[20].mxu0 %vm2701_vm0, %v7030_v36  ;;  %v5976_v58 = vsel %vm10456_vm6, %v8571_v49, %v8572_v48  ;;  %vm10457_vm15 = vmmov %vm10455_vm2 }
 0xbe8   : > { %8156 = vmatpush3.bf16.msra.mxu0 %v8155_v40  ;;  %7707 = vmatprep.mubr.msk.f32.mxu0 %vm8660_vm5, %v8643_v22  ;;  %v10280_v57 = vpop.permute.xlu0 %8599  ;;  %v5977_v13 = vsel %vm10457_vm15, %v8577_v10, %v8566_v43  ;;  %v8164_v59 = vpack.c.bf16 %v5978_v15, %v5976_v58  ;;  %v6149_v11 = vsel %vm10461_vm10, %v8586_v17, %v8587_v60  ;;  %vm8178_vm13 = vmpackc.low %vm10466_vm11, %vm10466_vm11  ;;  %v7050_v43 = vld [vmem:[%s10385_s7 + $0x1c] sm:$0x7]  ;;  %v7055_v15 = vld [vmem:[%s10385_s7 + $0x20] sm:$0x7] }
 0xbe9   : > { %v8590_v39 = vpop.permute.xlu1 %8589  ;;  %8158 = vmatprep.subr.bf16.mxu0 %v8157_v21  ;;  %v5975_v21 = vsel %vm10455_vm2, %v8576_v53, %v8571_v49  ;;  %v8602_v20 = vunpack.i.h.bf16 %v10280_v57  ;;  %v8601_v44 = vunpack.i.l.bf16 %v10280_v57  ;;  %v8177_v29 = vpack.c.bf16 %v8582_v31, %v8587_v60  ;;  %vm10467_vm2 = vmmov %vm10465_vm4 }
 0xbea   : > { %v8166_v63 = vpack.c.bf16 %v5977_v13, %v5975_v21  ;;  %v8592_v5 = vunpack.i.h.bf16 %v8590_v39  ;;  %v8591_v6 = vunpack.i.l.bf16 %v8590_v39  ;;  %vm10468_vm6 = vmmov %vm10467_vm2 }
 0xbeb   : > { %7708 = vmatmul.mubr.msk.f32.vlgmr.msra.gmra.mrb[18].mxu0 %vm2701_vm0, %v7030_v36  ;;  %vm10469_vm15 = vmmov %vm10467_vm2 }
 0xbec   : > { %8160 = vmatpush1.bf16.msra.mxu0 %v8159_v23  ;;  %5883 = vmatprep.mubr.f32.mxu0 %v8643_v22  ;;  %v8581_v23 = vunpack.i.l.bf16 %v10258_v46  ;;  %v8605_v45 = vpop.permute.xlu0 %8604  ;;  %vm10472_vm10 = vmmov %vm10470_vm9 }
 0xbed   : > { %v10276_v18 = vpop.permute.xlu1 %8594  ;;  %8161 = vmatprep.subr.bf16.mxu0 %v8659_v24  ;;  %v8607_v25 = vunpack.i.h.bf16 %v8605_v45  ;;  %v8606_v52 = vunpack.i.l.bf16 %v8605_v45 }
 0xbee   : > { %v6151_v42 = vsel %vm10460_vm7, %v8581_v23, %v8582_v31  ;;  %v8597_v16 = vunpack.i.h.bf16 %v10276_v18  ;;  %v8596_v19 = vunpack.i.l.bf16 %v10276_v18 }
 0xbef   : > { %7038 = vmatmul.mubr.msk.f32.vlgmr.msra.gmra.mrb[20].mxu0 %vm2701_vm0, %v7037_v55  ;;  %v8172_v12 = vpack.c.bf16 %v6151_v42, %v6149_v11  ;;  %v6321_v30 = vsel %vm10468_vm6, %v8606_v52, %v8601_v44 }
 0xbf0   : > { %8163 = vmatpush3.bf16.msra.mxu0 %v8162_v1  ;;  %7714 = vmatprep.mubr.msk.f32.mxu0 %vm8660_vm5, %v8643_v22  ;;  %v8620_v56 = vpop.permute.xlu0 %8619  ;;  %v6324_v37 = vsel %vm10465_vm4, %v8596_v19, %v8597_v16  ;;  %v6323_v32 = vsel %vm10469_vm15, %v8607_v25, %v8596_v19  ;;  %v8185_v39 = vpack.c.bf16 %v8597_v16, %v8602_v20 }
 0xbf1   : > { %v8610_v61 = vpop.permute.xlu1 %8609  ;;  %8165 = vmatprep.subr.bf16.mxu0 %v8164_v59  ;;  %v8182_v7 = vpack.c.bf16 %v6323_v32, %v6321_v30  ;;  %v8622_v36 = vunpack.i.h.bf16 %v8620_v56  ;;  %v8621_v38 = vunpack.i.l.bf16 %v8620_v56 }
 0xbf2   : > { %v8612_v3 = vunpack.i.h.bf16 %v8610_v61  ;;  %v8611_v4 = vunpack.i.l.bf16 %v8610_v61 }
 0xbf3   : > { %7715 = vmatmul.mubr.msk.f32.vlgmr.msra.gmra.mrb[18].mxu0 %vm2701_vm0, %v7037_v55  ;;  %v6495_v48 = vsel %vm10472_vm10, %v8621_v38, %v8622_v36 }
 0xbf4   : > { %8167 = vmatpush1.bf16.msra.mxu0 %v8166_v63  ;;  %6056 = vmatprep.mubr.f32.mxu0 %v8643_v22  ;;  %v5135_v1 = vsel %vm730_vm1, %v8611_v4, %v8516_v47  ;;  %v5137_v8 = vsel %vm730_vm1, %v8612_v3, %v8511_v26  ;;  %v8127_v50 = vpack.c.bf16 %v8612_v3, %v8611_v4  ;;  %vm10464_vm1 = vmmov %vm10460_vm7  ;;  %v8625_v54 = vpop.permute.xlu0 %8624  ;;  %vm10471_vm7 = vcmask 408576  }
 0xbf5   : > { %v8125_v27 = vpack.c.bf16 %v5137_v8, %v5135_v1  ;;  %8168 = vmatprep.subr.bf16.mxu0 %v8659_v24  ;;  %v6150_v26 = vsel %vm10463_vm14, %v8592_v5, %v8581_v23  ;;  %v6148_v47 = vsel %vm10464_vm1, %v8591_v6, %v8586_v17  ;;  %v8615_v51 = vpop.permute.xlu1 %8614  ;;  %v8627_v40 = vunpack.i.h.bf16 %v8625_v54 }
 0xbf6   : > { %v8174_v28 = vpack.c.bf16 %v6150_v26, %v6148_v47  ;;  %v8617_v34 = vunpack.i.h.bf16 %v8615_v51  ;;  %v8616_v35 = vunpack.i.l.bf16 %v8615_v51  ;;  %v8626_v41 = vunpack.i.l.bf16 %v8625_v54 }
 0xbf7   : > { %8126 = vmatprep.subr.bf16.mxu1 %v8125_v27  ;;  %7041 = vmatmul.mubr.msk.f32.vlgmr.msra.gmra.mrb[20].mxu0 %vm2701_vm0, %v7040_v9  ;;  %vm10475_vm14 = vcmask 400384  }
 0xbf8   : > { %8129 = vmatpush1.bf16.msk.msra.mxu1 %vm8128_vm8, %v8127_v50  ;;  %8171 = vmatpush3.bf16.msk.msra.mxu0 %vm8170_vm12, %v8169_v0  ;;  %v6497_v46 = vsel %vm10470_vm9, %v8616_v35, %v8617_v34  ;;  %vm8186_vm8 = vmpackc.low %vm10471_vm7, %vm10471_vm7  ;;  %v6494_v49 = vsel %vm10473_vm3, %v8626_v41, %v8621_v38  ;;  %v8193_v18 = vpack.c.bf16 %v8617_v34, %v8622_v36 }
 0xbf9   : > { %8173 = vmatprep.subr.bf16.mxu0 %v8172_v12  ;;  %7721 = vmatprep.mubr.msk.f32.mxu0 %vm8660_vm5, %v8643_v22  ;;  %vm10474_vm12 = vmmov %vm10473_vm3  ;;  %v8188_v10 = vpack.c.bf16 %v6497_v46, %v6495_v48 }
 0xbfa   : > { %v6496_v53 = vsel %vm10474_vm12, %v8627_v40, %v8616_v35  ;;  %vm8194_vm1 = vmpackc.low %vm10475_vm14, %vm10475_vm14 }
 0xbfb   : > { %7014 = vmatmul.mubr.msk.f32.vlgmr.msra.gmra.mrb[22].mxu1 %vm2701_vm0, %v10197_v2  ;;  %7722 = vmatmul.mubr.msk.f32.vlgmr.msra.gmra.mrb[18].mxu0 %vm2701_vm0, %v7040_v9  ;;  %v6322_v2 = vsel %vm10467_vm2, %v8601_v44, %v8602_v20  ;;  %v8190_v55 = vpack.c.bf16 %v6496_v53, %v6494_v49 }
 0xbfc   : > { %8175 = vmatpush1.bf16.msra.mxu0 %v8174_v28  ;;  %6229 = vmatprep.mubr.f32.mxu0 %v8643_v22  ;;  %v8180_v33 = vpack.c.bf16 %v6324_v37, %v6322_v2 }
 0xbfd   : > { %8176 = vmatprep.subr.bf16.mxu0 %v8659_v24 }
 0xbff   : > { %7046 = vmatmul.mubr.msk.f32.vlgmr.msra.gmra.mrb[20].mxu0 %vm2701_vm0, %v7045_v14 }
 0xc00   : > { %8179 = vmatpush3.bf16.msk.msra.mxu0 %vm8178_vm13, %v8177_v29  ;;  %7728 = vmatprep.mubr.msk.f32.mxu0 %vm8660_vm5, %v8643_v22 }
 0xc01   : > { %8181 = vmatprep.subr.bf16.mxu0 %v8180_v33 }
 0xc03   : > { %7729 = vmatmul.mubr.msk.f32.vlgmr.msra.gmra.mrb[18].mxu0 %vm2701_vm0, %v7045_v14 }
 0xc04   : > { %8183 = vmatpush1.bf16.msra.mxu0 %v8182_v7  ;;  %6402 = vmatprep.mubr.f32.mxu0 %v8643_v22 }
 0xc05   : > { %8184 = vmatprep.subr.bf16.mxu0 %v8659_v24 }
 0xc06   : > { %v5115_v58 = vpop.permute.xlu1 %5114 }
 0xc07   : > { %7051 = vmatmul.mubr.msk.f32.vlgmr.msra.gmra.mrb[20].mxu0 %vm2701_vm0, %v7050_v43 }
 0xc08   : > { %8187 = vmatpush3.bf16.msk.msra.mxu0 %vm8186_vm8, %v8185_v39  ;;  %7735 = vmatprep.mubr.msk.f32.mxu0 %vm8660_vm5, %v8643_v22 }
 0xc09   : > { %8189 = vmatprep.subr.bf16.mxu0 %v8188_v10 }
 0xc0b   : > { %7736 = vmatmul.mubr.msk.f32.vlgmr.msra.gmra.mrb[18].mxu0 %vm2701_vm0, %v7050_v43 }
 0xc0c   : > { %8191 = vmatpush1.bf16.msra.mxu0 %v8190_v55  ;;  %6575 = vmatprep.mubr.f32.mxu0 %v8643_v22 }
 0xc0d   : > { %8192 = vmatprep.subr.bf16.mxu0 %v8659_v24 }
 0xc0f   : > { %7056 = vmatmul.mubr.msk.f32.vlgmr.msra.gmra.mrb[20].mxu0 %vm2701_vm0, %v7055_v15 }
 0xc10   : > { %8195 = vmatpush3.bf16.msk.msra.mxu0 %vm8194_vm1, %v8193_v18  ;;  %7742 = vmatprep.mubr.msk.f32.mxu0 %vm8660_vm5, %v8643_v22 }
 0xc13   : > { %7743 = vmatmul.mubr.msk.f32.vlgmr.msra.gmra.mrb[18].mxu0 %vm2701_vm0, %v7055_v15  ;;  %vm6672_vm0 = vcmask 550912  }
 0xcce   : > { %v5217_v21 = vpop.f32.mrb[22].mxu1 }
 0xccf   : > { %v5219_v57 = vpop.f32.mrb[23].mxu1  ;;  %v5292_v13 = vadd.f32 %v5217_v21, %v5115_v58 }
 0xcd0   : > { %v5293_v31 = vadd.f32 %v5219_v57, %v5115_v58 }
 0xce2   : > { %v6577_v23 = vpop.f32.mrb[20].mxu0 }
 0xce3   : > { %v8213_v59 = vadd.f32 %v6577_v23, %v5292_v13  ;;  %v6579_v60 = vpop.f32.mrb[21].mxu0 }
 0xce4   : > { %v8215_v17 = vadd.f32 %v6579_v60, %v5293_v31 }
 0xce5   : > { %v6655_v24 = vmul.f32 0.5, %v8213_v59 }
 0xce6   : > { %v6656_v61 = vmul.f32 0.5, %v8215_v17  ;;  %v6648_v62 = vpop.f32.mrb[18].mxu0 }
 0xce7   : > { %8629 = vtanh.f32 %v6655_v24  ;;  %v8216_v63 = vadd.f32 %v6648_v62, %v5115_v58  ;;  %v7744_v3 = vpop.f32.mrb[19].mxu0 }
 0xce8   : > { %8631 = vtanh.f32 %v6656_v61 }
 0xce9   : > { %v6657_v22 = vmul.f32 0.5, %v8216_v63 }
 0xceb   : > { %8633 = vtanh.f32 %v6657_v22 }
 0xcf1   : > { %v8630_v4 = vpop.eup %8629 }
 0xcf2   : > { %v8632_v5 = vpop.eup %8631  ;;  %v6661_v6 = vmul.f32 0.5, %v8630_v4 }
 0xcf3   : > { %v6662_v42 = vmul.f32 0.5, %v8632_v5 }
 0xcf4   : > { %v6664_v45 = vadd.f32 0.5, %v6661_v6 }
 0xcf5   : > { %v8634_v1 = vpop.eup %8633  ;;  %v6665_v8 = vadd.f32 0.5, %v6662_v42 }
 0xcf6   : > { %v6663_v9 = vmul.f32 0.5, %v8634_v1 }
 0xcf7   : > { %v6669_v11 = vcombine.low %v6664_v45, %v6665_v8 }
 0xcf8   : > { %v6666_v27 = vadd.f32 0.5, %v6663_v9 }
 0xcf9   : > { %6671 = vst [vmem:[%s467_s22] sm:$0x77] %v6669_v11 }
 0xcfa   : > { %6673 = vst.msk [vmem:[%s467_s22 + $0x8] sm:$0x7] %vm6672_vm0, %v6666_v27 }
 0xcfb PF: > { %s24_s29 = sadd.s32 1, %s8641_s29  }
 0xcfc   : > { %p21_p4 = scmp.ge.s32.totalorder %s24_s29, 4  }
 0xcfe   :  { %23 = sbr.rel (!%p21_p4) target bundleno = 1 (0x1), region = 138 }

</bundles_post_ra>
